<compile_context>
chip_gen: v7x
topology: tpu7x:2x2x1
jax: 0.10.0
libtpu: 0.0.40
codegen_flags: <defaults>
</compile_context>

<pallas_src>
import jax
import jax.numpy as jnp
from jax import lax
from jax.experimental import pallas as pl
from jax.experimental.pallas import tpu as pltpu


def _round_up(x, m):
    return (x + m - 1) // m * m


def _pad_to(a, shape, fill=0.0):
    pads = [(0, s - d) for d, s in zip(a.shape, shape)]
    return jnp.pad(a, pads, constant_values=fill)


def _pick_tk(K, tk_max=1024, max_pad_frac=1.0 / 32.0):
    """Largest K tile (multiple of 128, <= tk_max) with ~zero padding waste."""
    K128 = _round_up(K, 128)
    if K128 <= tk_max:
        return K128
    best_tk, best_pad = tk_max, None
    for tk in range(tk_max, 127, -128):
        pad = _round_up(K128, tk) - K128
        if pad <= max_pad_frac * K128:
            return tk
        if best_pad is None or pad < best_pad:
            best_tk, best_pad = tk, pad
    return best_tk


def _pick_tb(B, tb_max=512):
    """Batch tile: no padded rows if possible, >=2 tiles for v7x megacore."""
    B8 = _round_up(B, 8)
    if B8 <= 16:
        return B8
    limit = min(tb_max, B8)
    divisors = [tb for tb in range(8, limit + 1, 8) if B8 % tb == 0]
    two_plus = [tb for tb in divisors if B8 // tb >= 2]
    if two_plus:
        return max(two_plus)
    if divisors:
        return max(divisors)
    return limit


def _const_spec(block_shape, index_map):
    """BlockSpec for a grid-invariant operand, single-buffered if supported."""
    try:
        return pl.BlockSpec(block_shape, index_map, pipeline_mode=pl.Buffered(1))
    except TypeError:  # older jax without pipeline_mode kwarg
        return pl.BlockSpec(block_shape, index_map)


# ---------------------------------------------------------------------------
# Kernel
# ---------------------------------------------------------------------------
def _make_fused_mlp_kernel(n_extra_layers):
    """n_extra_layers = n_hidden - 1 hidden->hidden blocks after the first."""

    def kernel(x_ref, w1_ref, s1_ref, t1_ref, wh_ref, sh_ref, th_ref,
               wo_ref, bo_ref, o_ref, acc_ref):
        k = pl.program_id(1)

        @pl.when(k == 0)
        def _():
            acc_ref[...] = jnp.zeros_like(acc_ref)

        # First layer partial matmul (bf16 MXU, fp32 accumulate in VMEM).
        acc_ref[...] += jnp.dot(x_ref[...], w1_ref[...],
                                preferred_element_type=jnp.float32)

        @pl.when(k == pl.num_programs(1) - 1)
        def _():
            # Folded BatchNorm (Linear bias absorbed into shift) + SiLU, fp32.
            h = acc_ref[...] * s1_ref[...] + t1_ref[...]
            h = h * jax.nn.sigmoid(h)
            # Remaining hidden blocks: small [H, H] weights are fully VMEM
            # resident (constant block index), executed once per batch tile.
            for l in range(n_extra_layers):
                z = jnp.dot(h.astype(wh_ref.dtype), wh_ref[l],
                            preferred_element_type=jnp.float32)
                z = z * sh_ref[l] + th_ref[l]
                h = z * jax.nn.sigmoid(z)
            # Final projection (lane-dense, padded to a multiple of 128).
            out = jnp.dot(h.astype(wo_ref.dtype), wo_ref[...],
                          preferred_element_type=jnp.float32) + bo_ref[...]
            o_ref[...] = out.astype(o_ref.dtype)

    return kernel


# ---------------------------------------------------------------------------
# Host-side parameter folding / packing (runs once)
# ---------------------------------------------------------------------------
def pack_params(params, *, tk_max=1024, mxu_dtype=jnp.bfloat16):
    eps = params["eps"]
    hidden = params["hidden"]
    n_hidden = len(hidden)
    K, H = hidden[0]["w"].shape
    N = params["out_w"].shape[1]

    H_pad = _round_up(H, 128)
    N_pad = _round_up(N, 128)
    tk = _pick_tk(K, tk_max)
    K_pad = _round_up(_round_up(K, 128), tk)

    def fold(layer):
        scale = layer["gamma"] * lax.rsqrt(layer["running_var"] + eps)
        shift = layer["beta"] - layer["running_mean"] * scale
        # Fold Linear bias into the BN shift: (x@W+b)*s+t == (x@W)*s + (t+b*s).
        shift = shift + layer["b"] * scale
        return scale, shift

    # First layer (streamed over K).
    s1, t1 = fold(hidden[0])
    w1 = _pad_to(hidden[0]["w"], (K_pad, H_pad))
    s1 = _pad_to(s1, (H_pad,), fill=1.0).reshape(1, H_pad)
    t1 = _pad_to(t1, (H_pad,), fill=0.0).reshape(1, H_pad)

    # Remaining hidden layers, stacked. Keep a 1-deep dummy if n_hidden == 1
    # so block shapes stay non-empty (the kernel never reads it).
    n_extra = n_hidden - 1
    depth = max(n_extra, 1)
    wh = jnp.zeros((depth, H_pad, H_pad), jnp.float32)
    sh = jnp.ones((depth, 1, H_pad), jnp.float32)
    th = jnp.zeros((depth, 1, H_pad), jnp.float32)
    for i, layer in enumerate(hidden[1:]):
        s, t = fold(layer)
        wh = wh.at[i, :H, :H].set(layer["w"])
        sh = sh.at[i, 0, :H].set(s)
        th = th.at[i, 0, :H].set(t)

    wo = _pad_to(params["out_w"], (H_pad, N_pad))
    bo = _pad_to(params["out_b"], (N_pad,)).reshape(1, N_pad)

    return {
        "w1": w1.astype(mxu_dtype), "s1": s1, "t1": t1,
        "wh": wh.astype(mxu_dtype), "sh": sh, "th": th,
        "wo": wo.astype(mxu_dtype), "bo": bo,
        "n_extra": n_extra, "tk": tk, "out_dim": N,
    }


# ---------------------------------------------------------------------------
# VMEM footprint estimate (sets vmem_limit_bytes explicitly, review item)
# ---------------------------------------------------------------------------
def _vmem_bytes(tb, tk, H_pad, N_pad, depth, w_bytes, out_bytes):
    x_tiles = 2 * tb * tk * w_bytes            # double-buffered x
    w1_tiles = 2 * tk * H_pad * w_bytes        # double-buffered w1
    consts = (2 * H_pad * 4                    # s1, t1 (fp32)
              + depth * H_pad * H_pad * w_bytes        # wh (single-buffered)
              + 2 * depth * H_pad * 4                  # sh, th
              + H_pad * N_pad * w_bytes                # wo
              + N_pad * 4)                             # bo
    out_tiles = 2 * tb * N_pad * out_bytes     # double-buffered output
    acc = tb * H_pad * 4                       # fp32 accumulator scratch
    return x_tiles + w1_tiles + consts + out_tiles + acc


# ---------------------------------------------------------------------------
# Pallas wrapper
# ---------------------------------------------------------------------------
def mlp_forward(packed, x, *, tb_max=512, out_dtype=jnp.float32):
    B, K = x.shape
    w1, s1, t1 = packed["w1"], packed["s1"], packed["t1"]
    wh, sh, th = packed["wh"], packed["sh"], packed["th"]
    wo, bo = packed["wo"], packed["bo"]
    K_pad, H_pad = w1.shape
    N_pad = wo.shape[1]
    depth = wh.shape[0]
    tk = packed["tk"]

    tb = _pick_tb(B, tb_max)
    B_pad = _round_up(B, tb)

    # Cast / pad only if needed (prefer delivering x in bf16 from the data
    # pipeline so this is a no-op and no extra HBM pass is spent on x).
    if x.dtype != w1.dtype:
        x = x.astype(w1.dtype)
    if (B_pad, K_pad) != (B, K):
        x = jnp.pad(x, ((0, B_pad - B), (0, K_pad - K)))

    grid = (B_pad // tb, K_pad // tk)

    w_bytes = jnp.dtype(w1.dtype).itemsize
    out_bytes = jnp.dtype(out_dtype).itemsize
    est = _vmem_bytes(tb, tk, H_pad, N_pad, depth, w_bytes, out_bytes)
    # Generous headroom, but stay under v7x's 64 MiB physical VMEM.
    vmem_limit = int(min(max(2 * est, 32 << 20), 64 << 20))

    out_padded = pl.pallas_call(
        _make_fused_mlp_kernel(packed["n_extra"]),
        out_shape=jax.ShapeDtypeStruct((B_pad, N_pad), out_dtype),
        grid=grid,
        in_specs=[
            pl.BlockSpec((tb, tk), lambda b, k: (b, k)),                 # x
            pl.BlockSpec((tk, H_pad), lambda b, k: (k, 0)),              # w1
            _const_spec((1, H_pad), lambda b, k: (0, 0)),                # s1
            _const_spec((1, H_pad), lambda b, k: (0, 0)),                # t1
            _const_spec((depth, H_pad, H_pad), lambda b, k: (0, 0, 0)),  # wh
            _const_spec((depth, 1, H_pad), lambda b, k: (0, 0, 0)),      # sh
            _const_spec((depth, 1, H_pad), lambda b, k: (0, 0, 0)),      # th
            _const_spec((H_pad, N_pad), lambda b, k: (0, 0)),            # wo
            _const_spec((1, N_pad), lambda b, k: (0, 0)),                # bo
        ],
        out_specs=pl.BlockSpec((tb, N_pad), lambda b, k: (b, 0)),
        scratch_shapes=[pltpu.VMEM((tb, H_pad), jnp.float32)],
        compiler_params=pltpu.CompilerParams(
            dimension_semantics=("parallel", "arbitrary"),
            vmem_limit_bytes=vmem_limit),
    )(x, w1, s1, t1, wh, sh, th, wo, bo)

    return out_padded[:B, :packed["out_dim"]]


# ---------------------------------------------------------------------------
# Parameter construction (deterministic; mirrors the PyTorch module's shapes)
# ---------------------------------------------------------------------------
def init_mlp_params(key, input_dim, output_dim, hidden_size, n_hidden, eps=1e-5):
    params = {"hidden": [], "eps": eps}
    dims = [input_dim] + [hidden_size] * n_hidden
    for i in range(n_hidden):
        k_in, k_out = dims[i], dims[i + 1]
        key, kw, kb, kg, kbe, km, kv = jax.random.split(key, 7)
        bound = 1.0 / (k_in ** 0.5)
        params["hidden"].append({
            "w": jax.random.uniform(kw, (k_in, k_out), jnp.float32, -bound, bound),
            "b": jax.random.uniform(kb, (k_out,), jnp.float32, -bound, bound),
            "gamma": 1.0 + 0.1 * jax.random.normal(kg, (k_out,), jnp.float32),
            "beta": 0.1 * jax.random.normal(kbe, (k_out,), jnp.float32),
            "running_mean": 0.1 * jax.random.normal(km, (k_out,), jnp.float32),
            "running_var": jax.random.uniform(kv, (k_out,), jnp.float32, 0.5, 1.5),
        })
    key, kw, kb = jax.random.split(key, 3)
    bound = 1.0 / (hidden_size ** 0.5)
    params["out_w"] = jax.random.uniform(
        kw, (hidden_size, output_dim), jnp.float32, -bound, bound)
    params["out_b"] = jax.random.uniform(
        kb, (output_dim,), jnp.float32, -bound, bound)
    return params


# ---------------------------------------------------------------------------
# Pure-JAX references
# ---------------------------------------------------------------------------
def mlp_forward_ref_bf16(packed, x):
    """Mirrors the kernel math exactly (bf16 MXU inputs, fp32 accumulate)."""
    B, K = x.shape
    K_pad, H_pad = packed["w1"].shape
    xb = jnp.pad(x.astype(packed["w1"].dtype), ((0, 0), (0, K_pad - K)))
    h = jnp.dot(xb, packed["w1"], preferred_element_type=jnp.float32)
    h = h * packed["s1"] + packed["t1"]
    h = h * jax.nn.sigmoid(h)
    for l in range(packed["n_extra"]):
        z = jnp.dot(h.astype(packed["wh"].dtype), packed["wh"][l],
                    preferred_element_type=jnp.float32)
        z = z * packed["sh"][l] + packed["th"][l]
        h = z * jax.nn.sigmoid(z)
    out = jnp.dot(h.astype(packed["wo"].dtype), packed["wo"],
                  preferred_element_type=jnp.float32) + packed["bo"]
    return out[:, :packed["out_dim"]]


def mlp_forward_ref_f32(params, x):
    """PyTorch-semantics (eval mode) fp32 reference."""
    eps = params["eps"]
    h = x
    for layer in params["hidden"]:
        h = h @ layer["w"] + layer["b"]
        scale = layer["gamma"] * lax.rsqrt(layer["running_var"] + eps)
        h = (h - layer["running_mean"]) * scale + layer["beta"]
        h = h * jax.nn.sigmoid(h)
    return h @ params["out_w"] + params["out_b"]


if __name__ == "__main__":
    # Small shapes consistent with the module: x is [batch, input_dim].
    # Chosen to exercise: multiple batch tiles with no padded rows
    # (B=380 -> tb=192, B_pad=384), multiple K tiles with a small K remainder
    # (K=1900 -> tk=640, K_pad=1920), and lane-dense output padding (16->128).
    batch, input_dim, hidden_size, n_hidden, output_dim = 380, 1900, 128, 3, 16

    key = jax.random.PRNGKey(0)
    key, kx = jax.random.split(key)
    x = jax.random.normal(kx, (batch, input_dim), jnp.float32)

    raw = init_mlp_params(key, input_dim, output_dim, hidden_size, n_hidden)
    packed = pack_params(raw)

    # Hoist the fp32 -> bf16 cast out of the hot path (a real data pipeline
    # would deliver bf16 directly, avoiding an extra HBM pass over x).
    x_bf16 = x.astype(jnp.bfloat16)

    out = jax.block_until_ready(mlp_forward(packed, x_bf16))
    ref = jax.block_until_ready(mlp_forward_ref_bf16(packed, x))
    ref_f32 = jax.block_until_ready(mlp_forward_ref_f32(raw, x))

    assert out.shape == (batch, output_dim), out.shape
    # Exact-math check (same bf16/fp32-accumulate recipe, different tiling).
    assert jnp.allclose(out, ref, atol=1e-2, rtol=1e-2), "mismatch vs bf16 reference"
    # Semantics check vs full-fp32 PyTorch-style math (bf16 weights => loose tol).
    assert jnp.allclose(out, ref_f32, atol=1e-1, rtol=1e-1), "mismatch vs fp32 reference"

    print("KERNEL_OK")
</pallas_src>

<mosaic_0001>
module attributes {stable_mosaic.version = 11 : i64} {
  func.func @kernel(%arg0: i32, %arg1: i32, %arg2: memref<192x640xbf16, #tpu.memory_space<vmem>>, %arg3: memref<640x128xbf16, #tpu.memory_space<vmem>>, %arg4: memref<1x128xf32, #tpu.memory_space<vmem>>, %arg5: memref<1x128xf32, #tpu.memory_space<vmem>>, %arg6: memref<2x128x128xbf16, #tpu.memory_space<vmem>>, %arg7: memref<2x1x128xf32, #tpu.memory_space<vmem>>, %arg8: memref<2x1x128xf32, #tpu.memory_space<vmem>>, %arg9: memref<128x128xbf16, #tpu.memory_space<vmem>>, %arg10: memref<1x128xf32, #tpu.memory_space<vmem>>, %arg11: memref<192x128xf32, #tpu.memory_space<vmem>>, %arg12: memref<192x128xf32, #tpu.memory_space<vmem>>) attributes {dimension_semantics = [#tpu.dimension_semantics<parallel>, #tpu.dimension_semantics<arbitrary>], iteration_bounds = array<i64: 2, 3>, scalar_prefetch = 0 : i64, scratch_operands = 1 : i64, tpu.core_type = #tpu.core_type<tc>, window_params = [{transform_indices = @transform_0, window_bounds = array<i64: 192, 640>}, {transform_indices = @transform_1, window_bounds = array<i64: 640, 128>}, {pipeline_mode = #tpu.pipeline_mode<synchronous>, transform_indices = @transform_2, window_bounds = array<i64: 1, 128>}, {pipeline_mode = #tpu.pipeline_mode<synchronous>, transform_indices = @transform_3, window_bounds = array<i64: 1, 128>}, {pipeline_mode = #tpu.pipeline_mode<synchronous>, transform_indices = @transform_4, window_bounds = array<i64: 2, 128, 128>}, {pipeline_mode = #tpu.pipeline_mode<synchronous>, transform_indices = @transform_5, window_bounds = array<i64: 2, 1, 128>}, {pipeline_mode = #tpu.pipeline_mode<synchronous>, transform_indices = @transform_6, window_bounds = array<i64: 2, 1, 128>}, {pipeline_mode = #tpu.pipeline_mode<synchronous>, transform_indices = @transform_7, window_bounds = array<i64: 128, 128>}, {pipeline_mode = #tpu.pipeline_mode<synchronous>, transform_indices = @transform_8, window_bounds = array<i64: 1, 128>}, {transform_indices = @transform_9, window_bounds = array<i64: 192, 128>}]} {
    %c0_i32 = arith.constant 0 : i32
    %0 = arith.cmpi eq, %arg1, %c0_i32 : i32
    %1 = arith.extui %0 : i1 to i32
    %c0_i32_0 = arith.constant 0 : i32
    %2 = arith.cmpi ne, %1, %c0_i32_0 : i32
    scf.if %2 {
      %cst_9 = arith.constant 0.000000e+00 : f32
      %12 = vector.broadcast %cst_9 : f32 to vector<192x128xf32>
      %c0_10 = arith.constant 0 : index
      %c0_11 = arith.constant 0 : index
      %13 = vector.load %arg12[%c0_10, %c0_11] : memref<192x128xf32, #tpu.memory_space<vmem>>, vector<192x128xf32>
      tpu.vector_store %arg12[%c0_10, %c0_11], %12 {strides = array<i32>} : memref<192x128xf32, #tpu.memory_space<vmem>>, vector<192x128xf32>,
    } else {
    }
    %c0 = arith.constant 0 : index
    %c0_1 = arith.constant 0 : index
    %3 = vector.load %arg12[%c0, %c0_1] : memref<192x128xf32, #tpu.memory_space<vmem>>, vector<192x128xf32>
    %c0_2 = arith.constant 0 : index
    %c0_3 = arith.constant 0 : index
    %4 = vector.load %arg2[%c0_2, %c0_3] : memref<192x640xbf16, #tpu.memory_space<vmem>>, vector<192x640xbf16>
    %c0_4 = arith.constant 0 : index
    %c0_5 = arith.constant 0 : index
    %5 = vector.load %arg3[%c0_4, %c0_5] : memref<640x128xbf16, #tpu.memory_space<vmem>>, vector<640x128xbf16>
    %cst = arith.constant dense<0.000000e+00> : vector<192x128xf32>
    %6 = tpu.matmul %4, %5, %cst {dimension_numbers = #tpu.dot_dimension_numbers<[1], [0], [0], [1], [0, 0, 1, 1], [], []>} : vector<192x640xbf16>, vector<640x128xbf16>, vector<192x128xf32> -> vector<192x128xf32>
    %7 = arith.addf %3, %6 : vector<192x128xf32>
    %c0_6 = arith.constant 0 : index
    %c0_7 = arith.constant 0 : index
    %8 = vector.load %arg12[%c0_6, %c0_7] : memref<192x128xf32, #tpu.memory_space<vmem>>, vector<192x128xf32>
    tpu.vector_store %arg12[%c0_6, %c0_7], %7 {strides = array<i32>} : memref<192x128xf32, #tpu.memory_space<vmem>>, vector<192x128xf32>,
    %c2_i32 = arith.constant 2 : i32
    %9 = arith.cmpi eq, %arg1, %c2_i32 : i32
    %10 = arith.extui %9 : i1 to i32
    %c0_i32_8 = arith.constant 0 : i32
    %11 = arith.cmpi ne, %10, %c0_i32_8 : i32
    scf.if %11 {
      %c0_9 = arith.constant 0 : index
      %c0_10 = arith.constant 0 : index
      %12 = vector.load %arg12[%c0_9, %c0_10] : memref<192x128xf32, #tpu.memory_space<vmem>>, vector<192x128xf32>
      %c0_11 = arith.constant 0 : index
      %c0_12 = arith.constant 0 : index
      %13 = vector.load %arg4[%c0_11, %c0_12] : memref<1x128xf32, #tpu.memory_space<vmem>>, vector<1x128xf32>
      %14 = vector.broadcast %13 : vector<1x128xf32> to vector<192x128xf32>
      %15 = arith.mulf %12, %14 : vector<192x128xf32>
      %c0_13 = arith.constant 0 : index
      %c0_14 = arith.constant 0 : index
      %16 = vector.load %arg5[%c0_13, %c0_14] : memref<1x128xf32, #tpu.memory_space<vmem>>, vector<1x128xf32>
      %17 = vector.broadcast %16 : vector<1x128xf32> to vector<192x128xf32>
      %18 = arith.addf %15, %17 : vector<192x128xf32>
      %19 = arith.negf %18 : vector<192x128xf32>
      %20 = math.exp %19 : vector<192x128xf32>
      %cst_15 = arith.constant 1.000000e+00 : f32
      %21 = vector.broadcast %cst_15 : f32 to vector<192x128xf32>
      %22 = arith.addf %21, %20 : vector<192x128xf32>
      %23 = arith.divf %21, %22 : vector<192x128xf32>
      %24 = arith.mulf %18, %23 : vector<192x128xf32>
      %25 = arith.truncf %24 : vector<192x128xf32> to vector<192x128xbf16>
      %c0_16 = arith.constant 0 : index
      %c0_17 = arith.constant 0 : index
      %c0_18 = arith.constant 0 : index
      %26 = vector.load %arg6[%c0_16, %c0_17, %c0_18] : memref<2x128x128xbf16, #tpu.memory_space<vmem>>, vector<1x128x128xbf16>
      %27 = vector.shape_cast %26 : vector<1x128x128xbf16> to vector<128x128xbf16>
      %cst_19 = arith.constant dense<0.000000e+00> : vector<192x128xf32>
      %28 = tpu.matmul %25, %27, %cst_19 {dimension_numbers = #tpu.dot_dimension_numbers<[1], [0], [0], [1], [0, 0, 1, 1], [], []>} : vector<192x128xbf16>, vector<128x128xbf16>, vector<192x128xf32> -> vector<192x128xf32>
      %c0_20 = arith.constant 0 : index
      %c0_21 = arith.constant 0 : index
      %c0_22 = arith.constant 0 : index
      %29 = vector.load %arg7[%c0_20, %c0_21, %c0_22] : memref<2x1x128xf32, #tpu.memory_space<vmem>>, vector<1x1x128xf32>
      %30 = vector.shape_cast %29 : vector<1x1x128xf32> to vector<1x128xf32>
      %31 = vector.broadcast %30 : vector<1x128xf32> to vector<192x128xf32>
      %32 = arith.mulf %28, %31 : vector<192x128xf32>
      %c0_23 = arith.constant 0 : index
      %c0_24 = arith.constant 0 : index
      %c0_25 = arith.constant 0 : index
      %33 = vector.load %arg8[%c0_23, %c0_24, %c0_25] : memref<2x1x128xf32, #tpu.memory_space<vmem>>, vector<1x1x128xf32>
      %34 = vector.shape_cast %33 : vector<1x1x128xf32> to vector<1x128xf32>
      %35 = vector.broadcast %34 : vector<1x128xf32> to vector<192x128xf32>
      %36 = arith.addf %32, %35 : vector<192x128xf32>
      %37 = arith.negf %36 : vector<192x128xf32>
      %38 = math.exp %37 : vector<192x128xf32>
      %cst_26 = arith.constant 1.000000e+00 : f32
      %39 = vector.broadcast %cst_26 : f32 to vector<192x128xf32>
      %40 = arith.addf %39, %38 : vector<192x128xf32>
      %41 = arith.divf %39, %40 : vector<192x128xf32>
      %42 = arith.mulf %36, %41 : vector<192x128xf32>
      %43 = arith.truncf %42 : vector<192x128xf32> to vector<192x128xbf16>
      %c1 = arith.constant 1 : index
      %c0_27 = arith.constant 0 : index
      %c0_28 = arith.constant 0 : index
      %44 = vector.load %arg6[%c1, %c0_27, %c0_28] : memref<2x128x128xbf16, #tpu.memory_space<vmem>>, vector<1x128x128xbf16>
      %45 = vector.shape_cast %44 : vector<1x128x128xbf16> to vector<128x128xbf16>
      %cst_29 = arith.constant dense<0.000000e+00> : vector<192x128xf32>
      %46 = tpu.matmul %43, %45, %cst_29 {dimension_numbers = #tpu.dot_dimension_numbers<[1], [0], [0], [1], [0, 0, 1, 1], [], []>} : vector<192x128xbf16>, vector<128x128xbf16>, vector<192x128xf32> -> vector<192x128xf32>
      %c1_30 = arith.constant 1 : index
      %c0_31 = arith.constant 0 : index
      %c0_32 = arith.constant 0 : index
      %47 = vector.load %arg7[%c1_30, %c0_31, %c0_32] : memref<2x1x128xf32, #tpu.memory_space<vmem>>, vector<1x1x128xf32>
      %48 = vector.shape_cast %47 : vector<1x1x128xf32> to vector<1x128xf32>
      %49 = vector.broadcast %48 : vector<1x128xf32> to vector<192x128xf32>
      %50 = arith.mulf %46, %49 : vector<192x128xf32>
      %c1_33 = arith.constant 1 : index
      %c0_34 = arith.constant 0 : index
      %c0_35 = arith.constant 0 : index
      %51 = vector.load %arg8[%c1_33, %c0_34, %c0_35] : memref<2x1x128xf32, #tpu.memory_space<vmem>>, vector<1x1x128xf32>
      %52 = vector.shape_cast %51 : vector<1x1x128xf32> to vector<1x128xf32>
      %53 = vector.broadcast %52 : vector<1x128xf32> to vector<192x128xf32>
      %54 = arith.addf %50, %53 : vector<192x128xf32>
      %55 = arith.negf %54 : vector<192x128xf32>
      %56 = math.exp %55 : vector<192x128xf32>
      %cst_36 = arith.constant 1.000000e+00 : f32
      %57 = vector.broadcast %cst_36 : f32 to vector<192x128xf32>
      %58 = arith.addf %57, %56 : vector<192x128xf32>
      %59 = arith.divf %57, %58 : vector<192x128xf32>
      %60 = arith.mulf %54, %59 : vector<192x128xf32>
      %61 = arith.truncf %60 : vector<192x128xf32> to vector<192x128xbf16>
      %c0_37 = arith.constant 0 : index
      %c0_38 = arith.constant 0 : index
      %62 = vector.load %arg9[%c0_37, %c0_38] : memref<128x128xbf16, #tpu.memory_space<vmem>>, vector<128x128xbf16>
      %cst_39 = arith.constant dense<0.000000e+00> : vector<192x128xf32>
      %63 = tpu.matmul %61, %62, %cst_39 {dimension_numbers = #tpu.dot_dimension_numbers<[1], [0], [0], [1], [0, 0, 1, 1], [], []>} : vector<192x128xbf16>, vector<128x128xbf16>, vector<192x128xf32> -> vector<192x128xf32>
      %c0_40 = arith.constant 0 : index
      %c0_41 = arith.constant 0 : index
      %64 = vector.load %arg10[%c0_40, %c0_41] : memref<1x128xf32, #tpu.memory_space<vmem>>, vector<1x128xf32>
      %65 = vector.broadcast %64 : vector<1x128xf32> to vector<192x128xf32>
      %66 = arith.addf %63, %65 : vector<192x128xf32>
      %c0_42 = arith.constant 0 : index
      %c0_43 = arith.constant 0 : index
      %67 = vector.load %arg11[%c0_42, %c0_43] : memref<192x128xf32, #tpu.memory_space<vmem>>, vector<192x128xf32>
      tpu.vector_store %arg11[%c0_42, %c0_43], %66 {strides = array<i32>} : memref<192x128xf32, #tpu.memory_space<vmem>>, vector<192x128xf32>,
    } else {
    }
    return
  }
  func.func @transform_0(%arg0: i32, %arg1: i32) -> (i32, i32) {
    %c0_i32 = arith.constant 0 : i32
    return %arg0, %arg1 : i32, i32
  }
  func.func @transform_1(%arg0: i32, %arg1: i32) -> (i32, i32) {
    %c0_i32 = arith.constant 0 : i32
    %c0_i32_0 = arith.constant 0 : i32
    return %arg1, %c0_i32 : i32, i32
  }
  func.func @transform_2(%arg0: i32, %arg1: i32) -> (i32, i32) {
    %c0_i32 = arith.constant 0 : i32
    %c0_i32_0 = arith.constant 0 : i32
    %c0_i32_1 = arith.constant 0 : i32
    return %c0_i32, %c0_i32_0 : i32, i32
  }
  func.func @transform_3(%arg0: i32, %arg1: i32) -> (i32, i32) {
    %c0_i32 = arith.constant 0 : i32
    %c0_i32_0 = arith.constant 0 : i32
    %c0_i32_1 = arith.constant 0 : i32
    return %c0_i32, %c0_i32_0 : i32, i32
  }
  func.func @transform_4(%arg0: i32, %arg1: i32) -> (i32, i32, i32) {
    %c0_i32 = arith.constant 0 : i32
    %c0_i32_0 = arith.constant 0 : i32
    %c0_i32_1 = arith.constant 0 : i32
    %c0_i32_2 = arith.constant 0 : i32
    return %c0_i32, %c0_i32_0, %c0_i32_1 : i32, i32, i32
  }
  func.func @transform_5(%arg0: i32, %arg1: i32) -> (i32, i32, i32) {
    %c0_i32 = arith.constant 0 : i32
    %c0_i32_0 = arith.constant 0 : i32
    %c0_i32_1 = arith.constant 0 : i32
    %c0_i32_2 = arith.constant 0 : i32
    return %c0_i32, %c0_i32_0, %c0_i32_1 : i32, i32, i32
  }
  func.func @transform_6(%arg0: i32, %arg1: i32) -> (i32, i32, i32) {
    %c0_i32 = arith.constant 0 : i32
    %c0_i32_0 = arith.constant 0 : i32
    %c0_i32_1 = arith.constant 0 : i32
    %c0_i32_2 = arith.constant 0 : i32
    return %c0_i32, %c0_i32_0, %c0_i32_1 : i32, i32, i32
  }
  func.func @transform_7(%arg0: i32, %arg1: i32) -> (i32, i32) {
    %c0_i32 = arith.constant 0 : i32
    %c0_i32_0 = arith.constant 0 : i32
    %c0_i32_1 = arith.constant 0 : i32
    return %c0_i32, %c0_i32_0 : i32, i32
  }
  func.func @transform_8(%arg0: i32, %arg1: i32) -> (i32, i32) {
    %c0_i32 = arith.constant 0 : i32
    %c0_i32_0 = arith.constant 0 : i32
    %c0_i32_1 = arith.constant 0 : i32
    return %c0_i32, %c0_i32_0 : i32, i32
  }
  func.func @transform_9(%arg0: i32, %arg1: i32) -> (i32, i32) {
    %c0_i32 = arith.constant 0 : i32
    %c0_i32_0 = arith.constant 0 : i32
    return %arg0, %c0_i32 : i32, i32
  }
}

</mosaic_0001>

<bundles_post_ra>
// kernel: tpu_custom_call.1
= control target key start
LH: loop header
LB: loop body
LE: loop exit
PB: predicated region body
PF: predicated region fallthrough
CT: control target
= control target key end

     0   :  { %s6290_s0 = inlined_call_operand.hbm [shape: bf16[384,1920], index: 0, kind: input, shape index: {}]   ;;  %s6291_s1 = inlined_call_operand.hbm [shape: bf16[1920,128], index: 1, kind: input, shape index: {}]   ;;  %s6292_s2 = inlined_call_operand.hbm [shape: f32[1,128], index: 2, kind: input, shape index: {}]   ;;  %s6293_s3 = inlined_call_operand.hbm [shape: f32[1,128], index: 3, kind: input, shape index: {}]   ;;  %s6294_s4 = inlined_call_operand.hbm [shape: bf16[2,128,128], index: 4, kind: input, shape index: {}]   ;;  %s6295_s5 = inlined_call_operand.hbm [shape: f32[2,1,128], index: 5, kind: input, shape index: {}]   ;;  %s6296_s6 = inlined_call_operand.hbm [shape: f32[2,1,128], index: 6, kind: input, shape index: {}]   ;;  %s6297_s7 = inlined_call_operand.hbm [shape: bf16[128,128], index: 7, kind: input, shape index: {}]   ;;  %s6298_s8 = inlined_call_operand.hbm [shape: f32[1,128], index: 8, kind: input, shape index: {}]   ;;  %s6299_s9 = inlined_call_operand.hbm [shape: f32[384,128], index: 9, kind: output, shape index: {}]  }
   0x1   :  { %6319 = sst [smem:[#allocation35_spill]] %s6290_s0 }
   0x2   :  { %6320 = sst [smem:[#allocation36_spill]] %s6291_s1 }
   0x3   :  { %6321 = sst [smem:[#allocation37_spill]] %s6292_s2 }
   0x4   :  { %6322 = sst [smem:[#allocation38_spill]] %s6293_s3 }
   0x5   :  { %6323 = sst [smem:[#allocation39_spill]] %s6294_s4 }
   0x6   :  { %6324 = sst [smem:[#allocation40_spill]] %s6295_s5 }
   0x7   :  { %6325 = sst [smem:[#allocation41_spill]] %s6296_s6 }
   0x8   :  { %6326 = sst [smem:[#allocation42_spill]] %s6297_s7 }
   0x9   :  { %6327 = sst [smem:[#allocation43_spill]] %s6298_s8 }
   0xa   :  { %6328 = sst [smem:[#allocation44_spill]] %s6299_s9 }
   0xb   :  { %14 = vsyncpa [#allocation4], 0 }
   0xc   :  { %16 = vsyncpa [#allocation4 + $0x1], 0 }
   0xd   :  { %17 = vsyncpa [#allocation7], 0 }
   0xe   :  { %19 = vsyncpa [#allocation7 + $0x1], 0 }
   0xf   :  { %20 = vsyncpa [#allocation10], 0 }
  0x10   :  { %21 = vsyncpa [#allocation13], 0 }
  0x11   :  { %22 = vsyncpa [#allocation16], 0 }
  0x12   :  { %23 = vsyncpa [#allocation5], 0 }
  0x13   :  { %25 = vsyncpa [#allocation5 + $0x1], 0  ;;  %s5084_s30 = smov 0   ;;  %s5086_s10 = smov 0  }
  0x14   :  { %s5088_s11 = smov 0   ;;  %s5090_s12 = smov 0  }
  0x15   :  { %s5092_s13 = smov 0   ;;  %s5094_s14 = smov 0  }
  0x16   :  { %s5096_s15 = smov 0   ;;  %s5098_s16 = smov 0  }
  0x17   :  { %s5100_s17 = smov 0   ;;  %s5102_s18 = smov 0  }
  0x18   :  { %s5104_s19 = smov 0   ;;  %s5106_s20 = smov 0  }
  0x19   :  { %s5108_s21 = smov 0   ;;  %s5110_s22 = smov 0  }
  0x1a LB: > { %6329 = sst [smem:[#allocation26_spill]] %s4960_s30  ;;  %s5155_s23 = sadd.s32 4294967295, %s5012_s22   ;;  %s5012_s22 = sphi %s5110_s22, %s31_s22   ;;  %s5008_s21 = sphi %s5108_s21, %s6406_s21   ;;  %s5004_s20 = sphi %s5106_s20, %s6405_s20   ;;  %s5000_s19 = sphi %s5104_s19, %s6404_s19   ;;  %s4996_s18 = sphi %s5102_s18, %s6403_s18   ;;  %s4992_s17 = sphi %s5100_s17, %s6402_s17   ;;  %s4988_s16 = sphi %s5098_s16, %s6401_s16   ;;  %s4984_s15 = sphi %s5096_s15, %s6400_s15   ;;  %s4980_s14 = sphi %s5094_s14, %s6399_s14   ;;  %s4976_s13 = sphi %s5092_s13, %s6394_s13   ;;  %s4972_s12 = sphi %s5090_s12, %s6393_s12   ;;  %s4968_s11 = sphi %s5088_s11, %s6398_s11   ;;  %s4964_s10 = sphi %s5086_s10, %s6397_s10   ;;  %s4960_s30 = sphi %s5084_s30, %s6392_s30  }
  0x1b   : > { %6330 = sst [smem:[#allocation27_spill]] %s4964_s10  ;;  %p3258_p0 = scmp.ge.s32.totalorder %s5012_s22, 1 }
  0x1c   : > { %6331 = sst [smem:[#allocation28_spill]] %s4972_s12  ;;  %p6304_p1 = scmp.eq.s32.totalorder %s5155_s23, 0 }
  0x1d   : > { %6332 = sst [smem:[#allocation29_spill]] %s4976_s13  ;;  %p275_p2 = scmp.lt.s32.totalorder %s5012_s22, 7 }
  0x1e   : > { %6333 = sst [smem:[#allocation30_spill]] %s4980_s14  ;;  %s5014_s25 = smov [#allocation8]  }
  0x1f   : > { %6334 = sst [smem:[#allocation31_spill]] %s4996_s18  ;;  %p5160_p3 = pnand %p3258_p0, %p275_p2 }
  0x20   : > { %6335 = sst [smem:[#allocation32_spill]] %s5000_s19  ;;  %s288_s26 = sshll.u32 %s5014_s25, 4  ;;  %s289_s26 = int_to_ptr.vmem [resolvable:$true] %s288_s26 }
  0x21   : > { %s6336_s24 = scalar_select %p5160_p3, 1, 0 }
  0x22   : > { %p3975_p4 = pneg %p5160_p3  ;;  %s5015_s27 = smov [#allocation9]  }
  0x23   : > { %6337 = sst [smem:[#allocation33_spill]] %s6336_s24  ;;  %s299_s28 = sshll.u32 %s5015_s27, 4  ;;  %s5172_s28 = int_to_ptr.vmem [resolvable:$true] %s299_s28 }
  0x24   : > { %p5168_p5 = pnand %p3975_p4, %p6304_p1  ;;  %s5016_s9 = smov [#allocation12]  }
  0x25   : > { %s322_s19 = sshll.u32 %s5016_s9, 4  ;;  %s6339_s2 = sld [smem:[#allocation37_spill]]  ;;  %s5174_s19 = int_to_ptr.vmem [resolvable:$true] %s322_s19 }
  0x26   : > { %p5184_p7 = pneg %p5168_p5 }
  0x2b   : > { %s4590_s25 = scalar_lea.hbm %s6339_s2, 16 }
  0x2c   : > { %p4591_p6 = scmp.ne.s32.totalorder %s6339_s2, %s4590_s25  ;;  %p4597_p10 = scmp.lt.u32.totalorder %s4590_s25, %s6339_s2 }
  0x2e   : > { %p4593_p8 = pnand %p5184_p7, %p4591_p6 }
  0x30   : > { %p4594_p9 = pneg %p4593_p8 }
  0x32   : > { %p4599_p11 = pnand %p4597_p10, %p4594_p9 }
  0x34   : > { %4602 = shalt.err (!%p4599_p11)
}
  0x35   : > { %s4603_s1 = scalar_lea.vmem %s289_s26, 16  ;;  %s4610_s12 = scalar_lea.vmem %s289_s26, 32 }
  0x36   : > { %p4604_p12 = scmp.ne.s32.totalorder %s289_s26, %s4603_s1  ;;  %p4611_p2 = scmp.lt.s32.totalorder %s289_s26, %s289_s26 }
  0x37   : > { %p4612_p4 = scmp.lt.s32.totalorder %s4610_s12, %s4603_s1 }
  0x38   : > { %p4606_p13 = pnand %p4604_p12, %p5184_p7 }
  0x39   : > { %p4613_p1 = por %p4612_p4, %p4611_p2 }
  0x3a   : > { %p4607_p0 = pneg %p4606_p13 }
  0x3c   : > { %p4614_p3 = pnand %p4613_p1, %p4607_p0 }
  0x3e   : > { %4617 = shalt.err (!%p4614_p3)
}
  0x3f   : > { %3978 = dma.hbm_to_vmem [thread:$0]  (!%p5168_p5), %s6339_s2, 16, %s289_s26, [#allocation7]  }
  0x40   : > { %s6341_s3 = sld [smem:[#allocation38_spill]] }
  0x46   : > { %s4618_s9 = scalar_lea.hbm %s6341_s3, 16 }
  0x47   : > { %p4619_p6 = scmp.ne.s32.totalorder %s6341_s3, %s4618_s9  ;;  %p4625_p1 = scmp.lt.u32.totalorder %s4618_s9, %s6341_s3 }
  0x49   : > { %p4621_p8 = pnand %p4619_p6, %p5184_p7 }
  0x4b   : > { %p4622_p9 = pneg %p4621_p8 }
  0x4d   : > { %p4627_p3 = pnand %p4625_p1, %p4622_p9 }
  0x4f   : > { %4630 = shalt.err (!%p4627_p3)
}
  0x50   : > { %s4631_s26 = scalar_lea.vmem %s5172_s28, 16  ;;  %s4638_s0 = scalar_lea.vmem %s5172_s28, 32 }
  0x51   : > { %p4632_p10 = scmp.ne.s32.totalorder %s5172_s28, %s4631_s26  ;;  %p4639_p13 = scmp.lt.s32.totalorder %s5172_s28, %s5172_s28 }
  0x52   : > { %p4640_p0 = scmp.lt.s32.totalorder %s4638_s0, %s4631_s26 }
  0x53   : > { %p4634_p11 = pnand %p4632_p10, %p5184_p7 }
  0x54   : > { %p4641_p2 = por %p4640_p0, %p4639_p13 }
  0x55   : > { %p4635_p12 = pneg %p4634_p11 }
  0x57   : > { %p4642_p4 = pnand %p4641_p2, %p4635_p12 }
  0x59   : > { %4645 = shalt.err (!%p4642_p4)
}
  0x5a   : > { %3981 = dma.hbm_to_vmem [thread:$0]  (!%p5168_p5), %s6341_s3, 16, %s5172_s28, [#allocation10]  }
  0x5b   : > { %s6342_s5 = sld [smem:[#allocation40_spill]] }
  0x61   : > { %s4646_s25 = scalar_lea.hbm %s6342_s5, 32 }
  0x62   : > { %p4647_p6 = scmp.ne.s32.totalorder %s6342_s5, %s4646_s25  ;;  %p4653_p1 = scmp.lt.u32.totalorder %s4646_s25, %s6342_s5 }
  0x64   : > { %p4649_p8 = pnand %p4647_p6, %p5184_p7 }
  0x66   : > { %p4650_p9 = pneg %p4649_p8 }
  0x68   : > { %p4655_p3 = pnand %p4653_p1, %p4650_p9 }
  0x6a   : > { %4658 = shalt.err (!%p4655_p3)
}
  0x6b   : > { %s4659_s28 = scalar_lea.vmem %s5174_s19, 32  ;;  %p4667_p13 = scmp.lt.s32.totalorder %s5174_s19, %s5174_s19 }
  0x6c   : > { %p4660_p10 = scmp.ne.s32.totalorder %s5174_s19, %s4659_s28  ;;  %p4668_p0 = scmp.lt.s32.totalorder %s4659_s28, %s4659_s28 }
  0x6e   : > { %p4662_p11 = pnand %p4660_p10, %p5184_p7  ;;  %p4669_p2 = por %p4668_p0, %p4667_p13 }
  0x70   : > { %p4663_p12 = pneg %p4662_p11 }
  0x72   : > { %p4670_p4 = pnand %p4669_p2, %p4663_p12 }
  0x74   : > { %4673 = shalt.err (!%p4670_p4)
}
  0x75   : > { %s6310_s0 = smov 16   ;;  %s5018_s14 = smov 1  }
  0x76   : > { %3987 = dma.hbm_to_vmem [thread:$0]  (!%p5168_p5), %s6342_s5, 32, %s5174_s19, [#allocation13], %s6310_s0, %s6310_s0, %s5018_s14  }
  0x77   : > { %s5019_s13 = smov [#allocation15]   ;;  %s5020_s9 = smov [#allocation11]  }
  0x78   : > { %s348_s25 = sshll.u32 %s5019_s13, 4  ;;  %s309_s1 = sshll.u32 %s5020_s9, 4  ;;  %s349_s25 = int_to_ptr.vmem [resolvable:$true] %s348_s25  ;;  %s310_s1 = int_to_ptr.vmem [resolvable:$true] %s309_s1 }
  0x79   : > { %s6343_s7 = sld [smem:[#allocation42_spill]] }
  0x7f   : > { %s4674_s28 = scalar_lea.hbm %s6343_s7, 1024 }
  0x80   : > { %p4675_p6 = scmp.ne.s32.totalorder %s6343_s7, %s4674_s28  ;;  %p4681_p1 = scmp.lt.u32.totalorder %s4674_s28, %s6343_s7 }
  0x82   : > { %p4677_p8 = pnand %p4675_p6, %p5184_p7 }
  0x84   : > { %p4678_p9 = pneg %p4677_p8 }
  0x86   : > { %p4683_p3 = pnand %p4681_p1, %p4678_p9 }
  0x88   : > { %4686 = shalt.err (!%p4683_p3)
}
  0x89   : > { %s4687_s19 = scalar_lea.vmem %s349_s25, 1024  ;;  %p4695_p13 = scmp.lt.s32.totalorder %s349_s25, %s349_s25 }
  0x8a   : > { %p4688_p10 = scmp.ne.s32.totalorder %s349_s25, %s4687_s19  ;;  %p4696_p0 = scmp.lt.s32.totalorder %s4687_s19, %s4687_s19 }
  0x8c   : > { %p4690_p11 = pnand %p4688_p10, %p5184_p7  ;;  %p4697_p2 = por %p4696_p0, %p4695_p13 }
  0x8e   : > { %p4691_p12 = pneg %p4690_p11 }
  0x90   : > { %p4698_p4 = pnand %p4697_p2, %p4691_p12 }
  0x92   : > { %4701 = shalt.err (!%p4698_p4)
}
  0x93   : > { %s6311_s2 = smov 64   ;;  %s6312_s3 = smov 4  }
  0x94   : > { %3993 = dma.hbm_to_vmem [thread:$0]  (!%p5168_p5), %s6343_s7, 1024, %s349_s25, [#allocation16], %s6311_s2, %s6311_s2, %s6312_s3  }
  0x95   : > { %s6344_s4 = sld [smem:[#allocation39_spill]] }
  0x9b   : > { %s4702_s13 = scalar_lea.hbm %s6344_s4, 2048 }
  0x9c   : > { %p4703_p6 = scmp.ne.s32.totalorder %s6344_s4, %s4702_s13  ;;  %p4709_p1 = scmp.lt.u32.totalorder %s4702_s13, %s6344_s4 }
  0x9e   : > { %p4705_p8 = pnand %p4703_p6, %p5184_p7 }
  0xa0   : > { %p4706_p9 = pneg %p4705_p8 }
  0xa2   : > { %p4711_p3 = pnand %p4709_p1, %p4706_p9 }
  0xa4   : > { %4714 = shalt.err (!%p4711_p3)
}
  0xa5   : > { %s4715_s19 = scalar_lea.vmem %s310_s1, 2048  ;;  %p4723_p13 = scmp.lt.s32.totalorder %s310_s1, %s310_s1 }
  0xa6   : > { %p4716_p10 = scmp.ne.s32.totalorder %s310_s1, %s4715_s19  ;;  %p4724_p0 = scmp.lt.s32.totalorder %s4715_s19, %s4715_s19 }
  0xa8   : > { %p4718_p11 = pnand %p4716_p10, %p5184_p7  ;;  %p4725_p2 = por %p4724_p0, %p4723_p13 }
  0xaa   : > { %p4719_p12 = pneg %p4718_p11 }
  0xac   : > { %p4726_p4 = pnand %p4725_p2, %p4719_p12 }
  0xae   : > { %4729 = shalt.err (!%p4726_p4)
}
  0xaf   : > { %3984 = dma.hbm_to_vmem [thread:$0]  (!%p5168_p5), %s6344_s4, 2048, %s310_s1, [#allocation10], %s6311_s2, %s6311_s2, %s6312_s3  }
  0xb0   : > { %s5023_s10 = smov [#allocation14]   ;;  %s5024_s24 = smov [#allocation17]  }
  0xb1   : > { %s335_s18 = sshll.u32 %s5023_s10, 4  ;;  %s362_s13 = sshll.u32 %s5024_s24, 4  ;;  %s336_s18 = int_to_ptr.vmem [resolvable:$true] %s335_s18  ;;  %s363_s13 = int_to_ptr.vmem [resolvable:$true] %s362_s13 }
  0xb2   : > { %s6345_s6 = sld [smem:[#allocation41_spill]] }
  0xb8   : > { %s4730_s26 = scalar_lea.hbm %s6345_s6, 32 }
  0xb9   : > { %p4731_p6 = scmp.ne.s32.totalorder %s6345_s6, %s4730_s26  ;;  %p4737_p1 = scmp.lt.u32.totalorder %s4730_s26, %s6345_s6 }
  0xbb   : > { %p4733_p8 = pnand %p4731_p6, %p5184_p7 }
  0xbd   : > { %p4734_p9 = pneg %p4733_p8 }
  0xbf   : > { %p4739_p3 = pnand %p4737_p1, %p4734_p9 }
  0xc1   : > { %4742 = shalt.err (!%p4739_p3)
}
  0xc2   : > { %s4743_s1 = scalar_lea.vmem %s336_s18, 32  ;;  %p4751_p13 = scmp.lt.s32.totalorder %s336_s18, %s336_s18 }
  0xc3   : > { %p4744_p10 = scmp.ne.s32.totalorder %s336_s18, %s4743_s1  ;;  %p4752_p0 = scmp.lt.s32.totalorder %s4743_s1, %s4743_s1 }
  0xc5   : > { %p4746_p11 = pnand %p4744_p10, %p5184_p7  ;;  %p4753_p2 = por %p4752_p0, %p4751_p13 }
  0xc7   : > { %p4747_p12 = pneg %p4746_p11 }
  0xc9   : > { %p4754_p4 = pnand %p4753_p2, %p4747_p12 }
  0xcb   : > { %4757 = shalt.err (!%p4754_p4)
}
  0xcc   : > { %s6346_s30 = smov 16   ;;  %s6347_s8 = sld [smem:[#allocation43_spill]] }
  0xcd   : > { %3990 = dma.hbm_to_vmem [thread:$0]  (!%p5168_p5), %s6345_s6, 32, %s336_s18, [#allocation13], %s6346_s30, %s6346_s30, %s5018_s14  }
  0xd2   : > { %s4758_s12 = scalar_lea.hbm %s6347_s8, 16 }
  0xd3   : > { %p4759_p6 = scmp.ne.s32.totalorder %s6347_s8, %s4758_s12  ;;  %p4765_p1 = scmp.lt.u32.totalorder %s4758_s12, %s6347_s8 }
  0xd5   : > { %p4761_p8 = pnand %p4759_p6, %p5184_p7 }
  0xd7   : > { %p4762_p9 = pneg %p4761_p8 }
  0xd9   : > { %p4767_p3 = pnand %p4765_p1, %p4762_p9 }
  0xdb   : > { %4770 = shalt.err (!%p4767_p3)
}
  0xdc   : > { %s4771_s1 = scalar_lea.vmem %s363_s13, 16  ;;  %s4778_s14 = scalar_lea.vmem %s363_s13, 32 }
  0xdd   : > { %p4772_p10 = scmp.ne.s32.totalorder %s363_s13, %s4771_s1  ;;  %p4779_p13 = scmp.lt.s32.totalorder %s363_s13, %s363_s13 }
  0xde   : > { %p4780_p0 = scmp.lt.s32.totalorder %s4778_s14, %s4771_s1 }
  0xdf   : > { %p4774_p11 = pnand %p4772_p10, %p5184_p7 }
  0xe0   : > { %p4781_p2 = por %p4780_p0, %p4779_p13 }
  0xe1   : > { %p4775_p12 = pneg %p4774_p11 }
  0xe3   : > { %p4782_p4 = pnand %p4781_p2, %p4775_p12 }
  0xe5   : > { %4785 = shalt.err (!%p4782_p4)
}
  0xe6   : > { %3996 = dma.hbm_to_vmem [thread:$0]  (!%p5168_p5), %s6347_s8, 16, %s363_s13, [#allocation16]  }
  0xe7   : > { %s3257_s27 = sadd.s32 4294967294, %s5012_s22   ;;  %s40_s29 = sadd.s32 1, %s5004_s20 }
  0xe8   : > { %s6348_s0 = sld [smem:[#allocation27_spill]]  ;;  %s43_s10 = sadd.s32 1, %s5008_s21 }
  0xe9   : > { %p41_p7 = scmp.ge.s32.totalorder %s40_s29, 3  ;;  %s52_s24 = sadd.s32 1, %s4992_s17 }
  0xea   : > { %p59_p6 = scmp.ne.s32.totalorder %s4992_s17, %s4988_s16  ;;  %p6314_p8 = scmp.eq.s32.totalorder %s5012_s22, 0 }
  0xeb   : > { %s6408_s29 = smov (%p41_p7, %s40_s29), 0  ;;  %s6410_s10 = smov (!%p41_p7, %s43_s10), %s5008_s21 }
  0xec   : > { %s5343_s9 = ssub.s32 %s5004_s20, %s6408_s29  ;;  %p5347_p5 = por %p6314_p8, %p59_p6 }
  0xed   : > { %s6350_s12 = sld [smem:[#allocation26_spill]]  ;;  %p45_p9 = scmp.ge.s32.totalorder %s6410_s10, 2 }
  0xee   : > { %p65_p1 = scmp.ne.s32.totalorder %s4988_s16, %s4984_s15  ;;  %s251_s26 = sadd.s32 1, %s4968_s11 }
  0xef   : > { %s6412_s10 = smov (%p45_p9, %s6410_s10), 0  ;;  %p6352_p10 = scmp.eq.s32.totalorder %s5155_s23, 0 }
  0xf0   : > { %6351 = sst [smem:[#allocation34_spill]] %s6412_s10  ;;  %p261_p12 = scmp.ne.s32.totalorder %s4968_s11, %s6348_s0 }
  0xf1   : > { %p5359_p11 = por %p6352_p10, %p65_p1  ;;  %s47_s19 = ssub.s32 %s5008_s21, %s6412_s10 }
  0xf2   : > { %p262_p13 = scmp.eq.s32.totalorder %s5155_s23, 5  ;;  %s49_s15 = sor.u32 %s5343_s9, %s47_s19 }
  0xf3   : > { %p249_p0 = scmp.eq.s32.totalorder %s47_s19, 0  ;;  %p50_p2 = scmp.eq.s32.totalorder %s49_s15, 0 }
  0xf4   : > { %p5369_p4 = por %p262_p13, %p261_p12  ;;  %p267_p7 = scmp.ne.s32.totalorder %s6348_s0, %s6350_s12 }
  0xf5   : > { %s5374_s1 = scalar_select %p249_p0, %s4968_s11, %s251_s26  }
  0xf6   : > { %s6354_s25 = scalar_select %p5369_p4, 1, 0 }
  0xf7   : > { %s5377_s14 = scalar_select %p50_p2, %s4992_s17, %s52_s24  }
  0xf8   : > { %p268_p6 = scmp.eq.s32.totalorder %s3257_s27, 5  ;;  %p6313_p9 = scmp.lt.s32.totalorder %s5012_s22, 6 }
  0xf9   : > { %s373_s18 = sand.u32 1, %s4992_s17   ;;  %s379_s26 = smul.u32 5, %s5004_s20 }
  0xfa   : > { %p5383_p1 = por %p268_p6, %p267_p7  ;;  %s3935_s2 = smul.u32 480, %s373_s18 }
  0xfb   : > { %p5391_p10 = pnand %p6313_p9, %p5347_p5  ;;  %s4016_s24 = smul.u32 360, %s5008_s21 }
  0xfc   : > { %s6355_s30 = scalar_select %p5383_p1, 1, 0 }
  0xfd   : > { %s377_s15 = scalar_lea.vmem [#allocation3], %s3935_s2  ;;  %s384_s27 = sadd.s32 %s4016_s24, %s379_s26 }
  0xfe   : > { %s387_s0 = sshll.u32 %s377_s15, 4  ;;  %s3267_s12 = sshll.u32 %s384_s27, 6  ;;  %s5397_s0 = int_to_ptr.vmem [resolvable:$true] %s387_s0 }
  0xff   : > { %s6357_s5 = sld [smem:[#allocation35_spill]]  ;;  %s5404_s13 = scalar_lea.sflag [#allocation4], %s373_s18 }
 0x100   : > { %p4788_p12 = pneg %p5391_p10 }
 0x105   : > { %s5402_s6 = scalar_lea.hbm %s6357_s5, %s3267_s12  ;;  %s4791_s4 = scalar_lea.hbm %s6357_s5, 46080 }
 0x106   : > { %s4786_s7 = scalar_lea.hbm %s5402_s6, 7680  ;;  %p4792_p2 = scmp.lt.u32.totalorder %s5402_s6, %s6357_s5 }
 0x107   : > { %p4787_p5 = scmp.ne.s32.totalorder %s5402_s6, %s4786_s7  ;;  %p4793_p7 = scmp.lt.u32.totalorder %s4791_s4, %s4786_s7 }
 0x108   : > { %p4795_p9 = scmp.lt.u32.totalorder %s4786_s7, %s5402_s6 }
 0x109   : > { %p4789_p13 = pnand %p4788_p12, %p4787_p5  ;;  %p4794_p6 = por %p4793_p7, %p4792_p2 }
 0x10b   : > { %p4790_p0 = pneg %p4789_p13  ;;  %p4796_p8 = por %p4795_p9, %p4794_p6 }
 0x10d   : > { %p4797_p3 = pnand %p4796_p8, %p4790_p0 }
 0x10f   : > { %4800 = shalt.err (!%p4797_p3)
}
 0x110   : > { %s4801_s18 = scalar_lea.vmem %s5397_s0, 7680  ;;  %s5025_s15 = smov [#allocation3]  }
 0x111   : > { %p4802_p5 = scmp.ne.s32.totalorder %s5397_s0, %s4801_s18  ;;  %s4806_s27 = sshll.u32 %s5025_s15, 4  ;;  %s4807_s27 = int_to_ptr.vmem [resolvable:$false] %s4806_s27 }
 0x112   : > { %s4808_s12 = scalar_lea.vmem %s4807_s27, 15360  ;;  %p4809_p4 = scmp.lt.s32.totalorder %s5397_s0, %s4807_s27 }
 0x113   : > { %p4804_p13 = pnand %p4802_p5, %p4788_p12  ;;  %p4810_p2 = scmp.lt.s32.totalorder %s4808_s12, %s4801_s18 }
 0x115   : > { %p4805_p1 = pneg %p4804_p13  ;;  %p4811_p7 = por %p4810_p2, %p4809_p4 }
 0x117   : > { %p4812_p9 = pnand %p4811_p7, %p4805_p1 }
 0x119   : > { %4815 = shalt.err (!%p4812_p9)
}
 0x11a   : > { %s5026_s7 = smov 960   ;;  %s6358_s2 = sld [smem:[#allocation30_spill]] }
 0x11b   : > { %s6359_s26 = sld [smem:[#allocation29_spill]]  ;;  %s6360_s4 = sld [smem:[#allocation28_spill]] }
 0x11c   : > { %s5027_s3 = smov 320   ;;  %s5028_s24 = smov 20  }
 0x11d   : > { %4000 = dma.hbm_to_vmem [thread:$0]  (!%p5391_p10), %s5402_s6, 7680, %s5397_s0, %s5404_s13, %s5026_s7, %s5027_s3, %s5028_s24  }
 0x11e   : > { %p6361_p8 = scmp.eq.s32.totalorder %s5343_s9, 0  ;;  %s397_s27 = sand.u32 1, %s5012_s22  }
 0x11f   : > { %p6362_p1 = scmp.eq.s32.totalorder %s5012_s22, 0  ;;  %p6363_p0 = scmp.eq.s32.totalorder %s5155_s23, 0 }
 0x120   : > { %s78_s18 = sadd.s32 1, %s6358_s2  ;;  %s399_s12 = sand.u32 1, %s6358_s2  }
 0x121   : > { %s5436_s15 = scalar_select %p6361_p8, %s6358_s2, %s78_s18  }
 0x122   : > { %p85_p3 = scmp.ne.s32.totalorder %s6358_s2, %s6359_s26  ;;  %p91_p4 = scmp.ne.s32.totalorder %s6359_s26, %s6360_s4 }
 0x123   : > { %s3937_s8 = smul.u32 320, %s399_s12  ;;  %p6365_p5 = scmp.lt.s32.totalorder %s5012_s22, 6 }
 0x124   : > { %p87_p12 = por %p85_p3, %p6362_p1  ;;  %p5448_p6 = por %p91_p4, %p6363_p0 }
 0x125   : > { %s3485_s10 = smul.u32 5120, %s5004_s20  ;;  %s6367_s0 = sld [smem:[#allocation36_spill]] }
 0x126   : > { %s6364_s5 = scalar_select %p5448_p6, 1, 0 }
 0x127   : > { %p5455_p13 = pnand %p6365_p5, %p87_p12  ;;  %s401_s7 = scalar_lea.vmem [#allocation6], %s3937_s8 }
 0x128   : > { %s408_s2 = sshll.u32 %s401_s7, 4  ;;  %s5466_s26 = scalar_lea.sflag [#allocation7], %s397_s27  ;;  %s5464_s2 = int_to_ptr.vmem [resolvable:$true] %s408_s2 }
 0x129   : > { %p4818_p2 = pneg %p5455_p13 }
 0x12b   : > { %s5462_s13 = scalar_lea.hbm %s6367_s0, %s3485_s10  ;;  %s4821_s24 = scalar_lea.hbm %s6367_s0, 15360 }
 0x12c   : > { %s4816_s4 = scalar_lea.hbm %s5462_s13, 5120  ;;  %p4822_p8 = scmp.lt.u32.totalorder %s5462_s13, %s6367_s0 }
 0x12d   : > { %p4817_p10 = scmp.ne.s32.totalorder %s5462_s13, %s4816_s4  ;;  %p4823_p3 = scmp.lt.u32.totalorder %s4821_s24, %s4816_s4 }
 0x12e   : > { %p4825_p1 = scmp.lt.u32.totalorder %s4816_s4, %s5462_s13 }
 0x12f   : > { %p4819_p7 = pnand %p4818_p2, %p4817_p10  ;;  %p4824_p4 = por %p4823_p3, %p4822_p8 }
 0x131   : > { %p4820_p9 = pneg %p4819_p7  ;;  %p4826_p12 = por %p4825_p1, %p4824_p4 }
 0x133   : > { %p4827_p0 = pnand %p4826_p12, %p4820_p9 }
 0x135   : > { %4830 = shalt.err (!%p4827_p0)
}
 0x136   : > { %s4831_s8 = scalar_lea.vmem %s5464_s2, 5120  ;;  %s5029_s27 = smov [#allocation6]  }
 0x137   : > { %p4832_p5 = scmp.ne.s32.totalorder %s5464_s2, %s4831_s8  ;;  %s4836_s9 = sshll.u32 %s5029_s27, 4  ;;  %s4837_s9 = int_to_ptr.vmem [resolvable:$false] %s4836_s9 }
 0x138   : > { %s4838_s19 = scalar_lea.vmem %s4837_s9, 10240  ;;  %p4839_p6 = scmp.lt.s32.totalorder %s5464_s2, %s4837_s9 }
 0x139   : > { %p4834_p10 = pnand %p4832_p5, %p4818_p2  ;;  %p4840_p8 = scmp.lt.s32.totalorder %s4838_s19, %s4831_s8 }
 0x13b   : > { %p4835_p7 = pneg %p4834_p10  ;;  %p4841_p3 = por %p4840_p8, %p4839_p6 }
 0x13d   : > { %p4842_p4 = pnand %p4841_p3, %p4835_p7 }
 0x13f   : > { %4845 = shalt.err (!%p4842_p4)
}
 0x140   : > { %s6368_s7 = smov 4   ;;  %s6369_s4 = smov 64  }
 0x141   : > { %4003 = dma.hbm_to_vmem [thread:$0]  (!%p5455_p13), %s5462_s13, 5120, %s5464_s2, %s5466_s26, %s6369_s4, %s6369_s4, %s6368_s7  }
 0x142   : > { %s6370_s10 = sld [smem:[#allocation33_spill]] }
 0x148   : > { %p6371_p2 = scmp.ne.s32.totalorder %s6370_s10, 0 }
 0x149   : > { %s422_s3 = sand.u32 (!%p6371_p2), 1, %s4988_s16  }
 0x14a   : > { %420 = sbr.rel (%p6371_p2) target bundleno = 1577 (0x629), region = 56  ;;  %s423_s18 = scalar_lea.sflag (!%p6371_p2), [#allocation4], %s422_s3 }
 0x14b   : > { %s3938_s24 = smul.u32 (!%p6371_p2), 480, %s422_s3 }
 0x14d   : > { %s5500_s12 = scalar_lea.vmem (!%p6371_p2), [#allocation3], %s3938_s24 }
 0x151   : > { %4931 = dma.done.wait (%p5359_p11), %s423_s18, 7680  }
 0x152   : > { %4933 = vsyncadd (%p5359_p11), %s423_s18, 4294959616  ;;  %s6372_s6 = sld [smem:[#allocation29_spill]]  ;;  %s431_s8 = sand.u32 1, %s5155_s23  }
 0x153   : > { %s432_s26 = scalar_lea.sflag [#allocation7], %s431_s8  ;;  %p6373_p6 = scmp.ne.s32.totalorder %s6364_s5, 0 }
 0x158   : > { %s433_s13 = sand.u32 1, %s6372_s6  }
 0x159   : > { %s3939_s2 = smul.u32 320, %s433_s13 }
 0x15b   : > { %s5508_s27 = scalar_lea.vmem [#allocation6], %s3939_s2 }
 0x15c   : > { %4935 = dma.done.wait (%p6373_p6), %s432_s26, 5120  }
 0x15d   : > { %4937 = vsyncadd (%p6373_p6), %s432_s26, 4294962176  ;;  %p6374_p13 = scmp.eq.s32.totalorder %s5155_s23, 0 }
 0x15f   : > { %4939 = dma.done.wait (%p6374_p13), [#allocation7], 16   ;;  %p6375_p9 = pmov %p6374_p13 }
 0x161   : > { %4941 = vsyncadd (%p6375_p9), [#allocation7], 4294967280  ;;  %p6376_p11 = pmov %p6375_p9 }
 0x162   : > { %p6377_p1 = pmov %p6375_p9 }
 0x163   : > { %4943 = dma.done.wait (%p6376_p11), [#allocation10], 2064  }
 0x164   : > { %4945 = vsyncadd (%p6377_p1), [#allocation10], 4294965232  ;;  %p6378_p12 = pmov %p6377_p1 }
 0x165   : > { %p6379_p0 = pmov %p6377_p1 }
 0x166   : > { %4947 = dma.done.wait (%p6378_p12), [#allocation13], 64  }
 0x167   : > { %4949 = vsyncadd (%p6379_p0), [#allocation13], 4294967232  ;;  %p6380_p5 = pmov %p6379_p0 }
 0x168   : > { %p6381_p10 = pmov %p6379_p0 }
 0x169   : > { %4951 = dma.done.wait (%p6380_p5), [#allocation16], 1040  }
 0x16a   : > { %4953 = vsyncadd (%p6381_p10), [#allocation16], 4294966256  ;;  %s6382_s5 = sld [smem:[#allocation27_spill]]  ;;  %s6383_s7 = sld [smem:[#allocation31_spill]] }
 0x170   : > { %s500_s28 = sand.u32 1, %s6382_s5   ;;  %p3277_p7 = scmp.ne.s32.totalorder %s6383_s7, 0 }
 0x171   : > { %s3940_s9 = smul.u32 192, %s500_s28  ;;  %v5030_v0 = vmov (!%p3277_p7), 0.0  }
 0x172   : > { %511 = sbr.rel (%p3277_p7) target bundleno = 382 (0x17e), region = 96  ;;  %512 = vst [vmem:[#allocation2] sm:$0xff] (!%p3277_p7), %v5030_v0  ;;  %513 = vst [vmem:[#allocation2 + $0x8] sm:$0xff] (!%p3277_p7), %v5030_v0 }
 0x173   : > { %s5533_s19 = scalar_lea.vmem [#allocation18], %s3940_s9  ;;  %514 = vst [vmem:[#allocation2 + $0x10] sm:$0xff] (!%p3277_p7), %v5030_v0  ;;  %515 = vst [vmem:[#allocation2 + $0x18] sm:$0xff] (!%p3277_p7), %v5030_v0 }
 0x174   : > { %516 = vst [vmem:[#allocation2 + $0x20] sm:$0xff] (!%p3277_p7), %v5030_v0  ;;  %517 = vst [vmem:[#allocation2 + $0x28] sm:$0xff] (!%p3277_p7), %v5030_v0 }
 0x175   : > { %518 = vst [vmem:[#allocation2 + $0x30] sm:$0xff] (!%p3277_p7), %v5030_v0  ;;  %519 = vst [vmem:[#allocation2 + $0x38] sm:$0xff] (!%p3277_p7), %v5030_v0 }
 0x176   : > { %520 = vst [vmem:[#allocation2 + $0x40] sm:$0xff] (!%p3277_p7), %v5030_v0  ;;  %521 = vst [vmem:[#allocation2 + $0x48] sm:$0xff] (!%p3277_p7), %v5030_v0 }
 0x177   : > { %522 = vst [vmem:[#allocation2 + $0x50] sm:$0xff] (!%p3277_p7), %v5030_v0  ;;  %523 = vst [vmem:[#allocation2 + $0x58] sm:$0xff] (!%p3277_p7), %v5030_v0 }
 0x178   : > { %524 = vst [vmem:[#allocation2 + $0x60] sm:$0xff] (!%p3277_p7), %v5030_v0  ;;  %525 = vst [vmem:[#allocation2 + $0x68] sm:$0xff] (!%p3277_p7), %v5030_v0 }
 0x179   : > { %526 = vst [vmem:[#allocation2 + $0x70] sm:$0xff] %v5030_v0  ;;  %527 = vst [vmem:[#allocation2 + $0x78] sm:$0xff] %v5030_v0 }
 0x17a   : > { %528 = vst [vmem:[#allocation2 + $0x80] sm:$0xff] %v5030_v0  ;;  %529 = vst [vmem:[#allocation2 + $0x88] sm:$0xff] %v5030_v0 }
 0x17b   : > { %530 = vst [vmem:[#allocation2 + $0x90] sm:$0xff] %v5030_v0  ;;  %531 = vst [vmem:[#allocation2 + $0x98] sm:$0xff] %v5030_v0 }
 0x17c   : > { %532 = vst [vmem:[#allocation2 + $0xa0] sm:$0xff] %v5030_v0  ;;  %533 = vst [vmem:[#allocation2 + $0xa8] sm:$0xff] %v5030_v0 }
 0x17d   : > { %534 = vst [vmem:[#allocation2 + $0xb0] sm:$0xff] %v5030_v0  ;;  %535 = vst [vmem:[#allocation2 + $0xb8] sm:$0xff] %v5030_v0 }
 0x17e PF: > { %v4154_v1 = vld [vmem:[%s5508_s27 + $0x40] sm:$0xff]   ;;  %v4158_v5 = vld [vmem:[%s5508_s27 + $0x48] sm:$0xff]   ;;  %v4162_v9 = vld [vmem:[%s5508_s27 + $0x50] sm:$0xff]   ;;  %s6384_s23 = sld [smem:[#allocation31_spill]] }
 0x17f   : > { %v4155_v2 = vld [vmem:[%s5508_s27 + $0xc0] sm:$0xff]   ;;  %3487 = vmatprep.subr.bf16.mxu0 %v4154_v1  ;;  %v4159_v6 = vld [vmem:[%s5508_s27 + $0xc8] sm:$0xff]   ;;  %v4163_v10 = vld [vmem:[%s5508_s27 + $0xd0] sm:$0xff]  }
 0x180   : > { %v4156_v3 = vld [vmem:[%s5508_s27] sm:$0xff]   ;;  %3575 = vmatprep.subr.bf16.mxu1 %v4155_v2  ;;  %v4160_v7 = vld [vmem:[%s5508_s27 + $0x8] sm:$0xff]   ;;  %v4164_v11 = vld [vmem:[%s5508_s27 + $0x10] sm:$0xff]  }
 0x181   : > { %v4157_v4 = vld [vmem:[%s5508_s27 + $0x80] sm:$0xff]   ;;  %3488 = vmatpush3.bf16.msra.mxu0 %v4156_v3  ;;  %v4161_v8 = vld [vmem:[%s5508_s27 + $0x88] sm:$0xff]   ;;  %v4165_v12 = vld [vmem:[%s5508_s27 + $0x90] sm:$0xff]  }
 0x182   : > { %3576 = vmatpush3.bf16.msra.mxu1 %v4157_v4  ;;  %3489 = vmatprep.subr.bf16.mxu0 %v4158_v5  ;;  %v4166_v13 = vld [vmem:[%s5508_s27 + $0x58] sm:$0xff]   ;;  %v4170_v17 = vld [vmem:[%s5508_s27 + $0x60] sm:$0xff]   ;;  %v4174_v21 = vld [vmem:[%s5508_s27 + $0x68] sm:$0xff]  }
 0x183   : > { %3577 = vmatprep.subr.bf16.mxu1 %v4159_v6  ;;  %v4167_v14 = vld [vmem:[%s5508_s27 + $0xd8] sm:$0xff]   ;;  %v4171_v18 = vld [vmem:[%s5508_s27 + $0xe0] sm:$0xff]   ;;  %v4175_v22 = vld [vmem:[%s5508_s27 + $0xe8] sm:$0xff]  }
 0x184   : > { %v4168_v15 = vld [vmem:[%s5508_s27 + $0x18] sm:$0xff]   ;;  %v4172_v19 = vld [vmem:[%s5508_s27 + $0x20] sm:$0xff]   ;;  %v4176_v23 = vld [vmem:[%s5508_s27 + $0x28] sm:$0xff]   ;;  %p3378_p8 = scmp.ne.s32.totalorder %s6384_s23, 2 }
 0x185   : > { %3490 = vmatpush3.bf16.msra.mxu0 %v4160_v7  ;;  %v4169_v16 = vld [vmem:[%s5508_s27 + $0x98] sm:$0xff]   ;;  %v4173_v20 = vld [vmem:[%s5508_s27 + $0xa0] sm:$0xff]   ;;  %v4177_v24 = vld [vmem:[%s5508_s27 + $0xa8] sm:$0xff]  }
 0x186   : > { %3578 = vmatpush3.bf16.msra.mxu1 %v4161_v8  ;;  %3491 = vmatprep.subr.bf16.mxu0 %v4162_v9  ;;  %v4178_v25 = vld [vmem:[%s5508_s27 + $0x70] sm:$0xff]   ;;  %v4182_v29 = vld [vmem:[%s5508_s27 + $0x78] sm:$0xff]   ;;  %v4191_v36 = vld [vmem:[%s5500_s12 + $0xc] ss:$20 sps:$4 sm:$0xff]  }
 0x187   : > { %3579 = vmatprep.subr.bf16.mxu1 %v4163_v10  ;;  %v4179_v26 = vld [vmem:[%s5508_s27 + $0xf0] sm:$0xff]   ;;  %v4183_v30 = vld [vmem:[%s5508_s27 + $0xf8] sm:$0xff]   ;;  %v4192_v37 = vld [vmem:[%s5508_s27 + $0x100] sm:$0xff]   ;;  %1425 = vmatprep.mubr.bf16.mxu1 %v4191_v36 }
 0x188   : > { %v4180_v27 = vld [vmem:[%s5508_s27 + $0x30] sm:$0xff]   ;;  %v4184_v31 = vld [vmem:[%s5508_s27 + $0x38] sm:$0xff]   ;;  %v4193_v38 = vld [vmem:[%s5500_s12 + $0x2c] ss:$20 sps:$4 sm:$0xff]  }
 0x189   : > { %3492 = vmatpush3.bf16.msra.mxu0 %v4164_v11  ;;  %v4181_v28 = vld [vmem:[%s5508_s27 + $0xb0] sm:$0xff]   ;;  %v4185_v32 = vld [vmem:[%s5508_s27 + $0xb8] sm:$0xff]   ;;  %v4199_v40 = vld [vmem:[%s5508_s27 + $0x108] sm:$0xff]  }
 0x18a   : > { %3580 = vmatpush3.bf16.msra.mxu1 %v4165_v12  ;;  %3493 = vmatprep.subr.bf16.mxu0 %v4166_v13  ;;  %v4186_v33 = vld [vmem:[%s5500_s12] ss:$20 sps:$4 sm:$0xff]   ;;  %v4188_v34 = vld [vmem:[%s5500_s12 + $0x4] ss:$20 sps:$4 sm:$0xff]   ;;  %v4189_v35 = vld [vmem:[%s5500_s12 + $0x8] ss:$20 sps:$4 sm:$0xff]  }
 0x18b   : > { %3581 = vmatprep.subr.bf16.mxu1 %v4167_v14  ;;  %1296 = vmatprep.mubr.bf16.mxu0 %v4188_v34  ;;  %v4195_v39 = vld [vmem:[%s5500_s12 + $0x34] ss:$20 sps:$4 sm:$0xff]   ;;  %v4198_v42 = vld [vmem:[%s5500_s12 + $0x30] ss:$20 sps:$4 sm:$0xff]   ;;  %v4205_v47 = vld [vmem:[%s5500_s12 + $0x58] ss:$20 sps:$4 sm:$0xff]  }
 0x18c   : > { %v4197_v41 = vld [vmem:[%s5500_s12 + $0x28] ss:$20 sps:$4 sm:$0xff]   ;;  %v4212_v45 = vld [vmem:[%s5508_s27 + $0x110] sm:$0xff]   ;;  %v4208_v50 = vld [vmem:[%s5500_s12 + $0x84] ss:$20 sps:$4 sm:$0xff]  }
 0x18d   : > { %3494 = vmatpush3.bf16.msra.mxu0 %v4168_v15  ;;  %v4200_v43 = vld [vmem:[%s5500_s12 + $0x54] ss:$20 sps:$4 sm:$0xff]   ;;  %v4202_v44 = vld [vmem:[%s5500_s12 + $0x5c] ss:$20 sps:$4 sm:$0xff]   ;;  %v4232_v51 = vld [vmem:[%s5508_s27 + $0x120] sm:$0xff]  }
 0x18e   : > { %3582 = vmatpush3.bf16.msra.mxu1 %v4169_v16  ;;  %3495 = vmatprep.subr.bf16.mxu0 %v4170_v17  ;;  %v4204_v46 = vld [vmem:[%s5500_s12 + $0x50] ss:$20 sps:$4 sm:$0xff]   ;;  %v4219_v49 = vld [vmem:[%s5508_s27 + $0x118] sm:$0xff]   ;;  %v4211_v53 = vld [vmem:[%s5500_s12 + $0x80] ss:$20 sps:$4 sm:$0xff]  }
 0x18f   : > { %3583 = vmatprep.subr.bf16.mxu1 %v4171_v18  ;;  %v4206_v48 = vld [vmem:[%s5500_s12 + $0x7c] ss:$20 sps:$4 sm:$0xff]   ;;  %v4210_v52 = vld [vmem:[%s5500_s12 + $0x78] ss:$20 sps:$4 sm:$0xff]   ;;  %v4217_v57 = vld [vmem:[%s5500_s12 + $0xa0] ss:$20 sps:$4 sm:$0xff]  }
 0x190   : > { %v4213_v54 = vld [vmem:[%s5500_s12 + $0xa4] ss:$20 sps:$4 sm:$0xff]   ;;  %v4215_v55 = vld [vmem:[%s5500_s12 + $0xac] ss:$20 sps:$4 sm:$0xff]   ;;  %v4218_v58 = vld [vmem:[%s5500_s12 + $0xa8] ss:$20 sps:$4 sm:$0xff]  }
 0x191   : > { %3496 = vmatpush3.bf16.msra.mxu0 %v4172_v19  ;;  %v4239_v56 = vld [vmem:[%s5508_s27 + $0x128] sm:$0xff]   ;;  %v4252_v60 = vld [vmem:[%s5508_s27 + $0x130] sm:$0xff]   ;;  %v4259_v62 = vld [vmem:[%s5508_s27 + $0x138] sm:$0xff]  }
 0x192   : > { %3584 = vmatpush3.bf16.msra.mxu1 %v4173_v20  ;;  %3497 = vmatprep.subr.bf16.mxu0 %v4174_v21  ;;  %v4220_v59 = vld [vmem:[%s5500_s12 + $0xcc] ss:$20 sps:$4 sm:$0xff]   ;;  %v4222_v61 = vld [vmem:[%s5500_s12 + $0xd4] ss:$20 sps:$4 sm:$0xff]   ;;  %v4225_v0 = vld [vmem:[%s5500_s12 + $0xd0] ss:$20 sps:$4 sm:$0xff]  }
 0x193   : > { %3585 = vmatprep.subr.bf16.mxu1 %v4175_v22  ;;  %v4224_v63 = vld [vmem:[%s5500_s12 + $0xc8] ss:$20 sps:$4 sm:$0xff]   ;;  %v4230_v3 = vld [vmem:[%s5500_s12 + $0xf0] ss:$20 sps:$4 sm:$0xff]   ;;  %v4231_v4 = vld [vmem:[%s5500_s12 + $0xf8] ss:$20 sps:$4 sm:$0xff]  }
 0x194   : > { %v4226_v1 = vld [vmem:[%s5500_s12 + $0xf4] ss:$20 sps:$4 sm:$0xff]   ;;  %v4228_v2 = vld [vmem:[%s5500_s12 + $0xfc] ss:$20 sps:$4 sm:$0xff]   ;;  %v4235_v6 = vld [vmem:[%s5500_s12 + $0x124] ss:$20 sps:$4 sm:$0xff]  }
 0x195   : > { %3498 = vmatpush3.bf16.msra.mxu0 %v4176_v23  ;;  %v4233_v5 = vld [vmem:[%s5500_s12 + $0x11c] ss:$20 sps:$4 sm:$0xff]   ;;  %v4237_v7 = vld [vmem:[%s5500_s12 + $0x118] ss:$20 sps:$4 sm:$0xff]   ;;  %v4238_v8 = vld [vmem:[%s5500_s12 + $0x120] ss:$20 sps:$4 sm:$0xff]  }
 0x196   : > { %3586 = vmatpush3.bf16.msra.mxu1 %v4177_v24  ;;  %3499 = vmatprep.subr.bf16.mxu0 %v4178_v25  ;;  %v4240_v9 = vld [vmem:[%s5500_s12 + $0x144] ss:$20 sps:$4 sm:$0xff]   ;;  %v4242_v10 = vld [vmem:[%s5500_s12 + $0x14c] ss:$20 sps:$4 sm:$0xff]   ;;  %v4245_v12 = vld [vmem:[%s5500_s12 + $0x148] ss:$20 sps:$4 sm:$0xff]  }
 0x197   : > { %3587 = vmatprep.subr.bf16.mxu1 %v4179_v26  ;;  %v4244_v11 = vld [vmem:[%s5500_s12 + $0x140] ss:$20 sps:$4 sm:$0xff]   ;;  %v4250_v15 = vld [vmem:[%s5500_s12 + $0x168] ss:$20 sps:$4 sm:$0xff]   ;;  %v4251_v16 = vld [vmem:[%s5500_s12 + $0x170] ss:$20 sps:$4 sm:$0xff]  }
 0x198   : > { %v4246_v13 = vld [vmem:[%s5500_s12 + $0x16c] ss:$20 sps:$4 sm:$0xff]   ;;  %v4248_v14 = vld [vmem:[%s5500_s12 + $0x174] ss:$20 sps:$4 sm:$0xff]   ;;  %v4255_v18 = vld [vmem:[%s5500_s12 + $0x19c] ss:$20 sps:$4 sm:$0xff]  }
 0x199   : > { %3500 = vmatpush3.bf16.msra.mxu0 %v4180_v27  ;;  %v4253_v17 = vld [vmem:[%s5500_s12 + $0x194] ss:$20 sps:$4 sm:$0xff]   ;;  %v4257_v19 = vld [vmem:[%s5500_s12 + $0x190] ss:$20 sps:$4 sm:$0xff]   ;;  %v4258_v20 = vld [vmem:[%s5500_s12 + $0x198] ss:$20 sps:$4 sm:$0xff]  }
 0x19a   : > { %3588 = vmatpush3.bf16.msra.mxu1 %v4181_v28  ;;  %3501 = vmatprep.subr.bf16.mxu0 %v4182_v29  ;;  %v4260_v21 = vld [vmem:[%s5500_s12 + $0x1bc] ss:$20 sps:$4 sm:$0xff]   ;;  %v4262_v22 = vld [vmem:[%s5500_s12 + $0x1c4] ss:$20 sps:$4 sm:$0xff]   ;;  %v4265_v24 = vld [vmem:[%s5500_s12 + $0x1c0] ss:$20 sps:$4 sm:$0xff]  }
 0x19b   : > { %3589 = vmatprep.subr.bf16.mxu1 %v4183_v30  ;;  %v4264_v23 = vld [vmem:[%s5500_s12 + $0x1b8] ss:$20 sps:$4 sm:$0xff]   ;;  %v4266_v25 = vld [vmem:[%s5500_s12 + $0x10] ss:$20 sps:$4 sm:$0xff]   ;;  %v4267_v26 = vld [vmem:[%s5500_s12 + $0x100] ss:$20 sps:$4 sm:$0xff]  }
 0x19c   : > { %v4268_v27 = vld [vmem:[%s5500_s12 + $0x38] ss:$20 sps:$4 sm:$0xff]   ;;  %v4269_v28 = vld [vmem:[%s5500_s12 + $0x128] ss:$20 sps:$4 sm:$0xff]   ;;  %v4270_v29 = vld [vmem:[%s5500_s12 + $0x60] ss:$20 sps:$4 sm:$0xff]  }
 0x19d   : > { %3502 = vmatpush3.bf16.msra.mxu0 %v4184_v31  ;;  %v4271_v30 = vld [vmem:[%s5500_s12 + $0x150] ss:$20 sps:$4 sm:$0xff]   ;;  %v4272_v31 = vld [vmem:[%s5500_s12 + $0x88] ss:$20 sps:$4 sm:$0xff]   ;;  %v4275_v34 = vld [vmem:[%s5500_s12 + $0x1a0] ss:$20 sps:$4 sm:$0xff]  }
 0x19e   : > { %3590 = vmatpush3.bf16.msra.mxu1 %v4185_v32  ;;  %3743 = vmatprep.subr.bf16.mxu0 %v4192_v37  ;;  %v4273_v32 = vld [vmem:[%s5500_s12 + $0x178] ss:$20 sps:$4 sm:$0xff]   ;;  %v4277_v36 = vld [vmem:[%s5500_s12 + $0x1c8] ss:$20 sps:$4 sm:$0xff]  }
 0x19f   : > { %3903 = vmatprep.subr.bf16.mxu1 %v4192_v37 }
 0x1a0   : > { %1297 = vmatmul.mubr.bf16.vlgmr.msra.gmra.mrb[0].mxu0 %v4186_v33  ;;  %v4274_v33 = vld [vmem:[%s5500_s12 + $0xb0] ss:$20 sps:$4 sm:$0xff]  }
 0x1a1   : > { %1426 = vmatmul.mubr.bf16.vlgmr.msra.gmra.mrb[0].mxu1 %v4189_v35  ;;  %3744 = vmatpush3.bf16.msra.mxu0 %v4192_v37  ;;  %v4276_v35 = vld [vmem:[%s5500_s12 + $0xd8] ss:$20 sps:$4 sm:$0xff]  }
 0x1a2   : > { %3911 = vmatpush3.bf16.msra.mxu1 %v4192_v37  ;;  %1304 = vmatprep.mubr.bf16.mxu0 %v4193_v38 }
 0x1a3   : > { %1433 = vmatprep.mubr.bf16.mxu1 %v4195_v39  ;;  %3745 = vmatprep.subr.bf16.mxu0 %v4199_v40 }
 0x1a4   : > { %3904 = vmatprep.subr.bf16.mxu1 %v4199_v40 }
 0x1a5   : > { %3746 = vmatpush3.bf16.msra.mxu0 %v4199_v40 }
 0x1a6   : > { %3912 = vmatpush3.bf16.msra.mxu1 %v4199_v40  ;;  %3747 = vmatprep.subr.bf16.mxu0 %v4212_v45 }
 0x1a7   : > { %3905 = vmatprep.subr.bf16.mxu1 %v4212_v45 }
 0x1a8   : > { %1305 = vmatmul.mubr.bf16.gmra.mrb[4].mxu0 %v4197_v41 }
 0x1a9   : > { %1434 = vmatmul.mubr.bf16.gmra.mrb[4].mxu1 %v4198_v42  ;;  %1312 = vmatprep.mubr.bf16.mxu0 %v4200_v43 }
 0x1aa   : > { %1441 = vmatprep.mubr.bf16.mxu1 %v4202_v44  ;;  %3748 = vmatpush3.bf16.msra.mxu0 %v4212_v45 }
 0x1ab   : > { %3913 = vmatpush3.bf16.msra.mxu1 %v4212_v45  ;;  %3749 = vmatprep.subr.bf16.mxu0 %v4219_v49 }
 0x1ac   : > { %3906 = vmatprep.subr.bf16.mxu1 %v4219_v49 }
 0x1ae   : > { %3750 = vmatpush3.bf16.msra.mxu0 %v4219_v49 }
 0x1af   : > { %3914 = vmatpush3.bf16.msra.mxu1 %v4219_v49  ;;  %3751 = vmatprep.subr.bf16.mxu0 %v4232_v51 }
 0x1b0   : > { %1313 = vmatmul.mubr.bf16.gmra.mrb[8].mxu0 %v4204_v46  ;;  %3907 = vmatprep.subr.bf16.mxu1 %v4232_v51 }
 0x1b1   : > { %1442 = vmatmul.mubr.bf16.gmra.mrb[8].mxu1 %v4205_v47  ;;  %1320 = vmatprep.mubr.bf16.mxu0 %v4206_v48 }
 0x1b2   : > { %1449 = vmatprep.mubr.bf16.mxu1 %v4208_v50  ;;  %3752 = vmatpush3.bf16.msra.mxu0 %v4232_v51 }
 0x1b3   : > { %3915 = vmatpush3.bf16.msra.mxu1 %v4232_v51  ;;  %3753 = vmatprep.subr.bf16.mxu0 %v4239_v56 }
 0x1b4   : > { %3908 = vmatprep.subr.bf16.mxu1 %v4239_v56 }
 0x1b6   : > { %3754 = vmatpush3.bf16.msra.mxu0 %v4239_v56 }
 0x1b7   : > { %3916 = vmatpush3.bf16.msra.mxu1 %v4239_v56  ;;  %3755 = vmatprep.subr.bf16.mxu0 %v4252_v60 }
 0x1b8   : > { %1321 = vmatmul.mubr.bf16.gmra.mrb[12].mxu0 %v4210_v52  ;;  %3909 = vmatprep.subr.bf16.mxu1 %v4252_v60 }
 0x1b9   : > { %1450 = vmatmul.mubr.bf16.gmra.mrb[12].mxu1 %v4211_v53  ;;  %1328 = vmatprep.mubr.bf16.mxu0 %v4213_v54 }
 0x1ba   : > { %1457 = vmatprep.mubr.bf16.mxu1 %v4215_v55  ;;  %3756 = vmatpush3.bf16.msra.mxu0 %v4252_v60 }
 0x1bb   : > { %3917 = vmatpush3.bf16.msra.mxu1 %v4252_v60  ;;  %3757 = vmatprep.subr.bf16.mxu0 %v4259_v62 }
 0x1bc   : > { %3910 = vmatprep.subr.bf16.mxu1 %v4259_v62 }
 0x1be   : > { %3758 = vmatpush3.bf16.msra.mxu0 %v4259_v62 }
 0x1bf   : > { %3918 = vmatpush3.bf16.msra.mxu1 %v4259_v62 }
 0x1c0   : > { %1329 = vmatmul.mubr.bf16.gmra.mrb[16].mxu0 %v4217_v57 }
 0x1c1   : > { %1458 = vmatmul.mubr.bf16.gmra.mrb[16].mxu1 %v4218_v58  ;;  %1336 = vmatprep.mubr.bf16.mxu0 %v4220_v59 }
 0x1c2   : > { %1465 = vmatprep.mubr.bf16.mxu1 %v4222_v61 }
 0x1c8   : > { %1337 = vmatmul.mubr.bf16.gmra.mrb[20].mxu0 %v4224_v63 }
 0x1c9   : > { %1466 = vmatmul.mubr.bf16.gmra.mrb[20].mxu1 %v4225_v0  ;;  %1344 = vmatprep.mubr.bf16.mxu0 %v4226_v1 }
 0x1ca   : > { %1473 = vmatprep.mubr.bf16.mxu1 %v4228_v2 }
 0x1d0   : > { %1345 = vmatmul.mubr.bf16.gmra.mrb[24].mxu0 %v4230_v3 }
 0x1d1   : > { %1474 = vmatmul.mubr.bf16.gmra.mrb[24].mxu1 %v4231_v4  ;;  %1352 = vmatprep.mubr.bf16.mxu0 %v4233_v5 }
 0x1d2   : > { %1481 = vmatprep.mubr.bf16.mxu1 %v4235_v6 }
 0x1d8   : > { %1353 = vmatmul.mubr.bf16.gmra.mrb[28].mxu0 %v4237_v7 }
 0x1d9   : > { %1482 = vmatmul.mubr.bf16.gmra.mrb[28].mxu1 %v4238_v8  ;;  %1360 = vmatprep.mubr.bf16.mxu0 %v4240_v9 }
 0x1da   : > { %1489 = vmatprep.mubr.bf16.mxu1 %v4242_v10 }
 0x1e0   : > { %1361 = vmatmul.mubr.bf16.gmra.mrb[32].mxu0 %v4244_v11 }
 0x1e1   : > { %1490 = vmatmul.mubr.bf16.gmra.mrb[32].mxu1 %v4245_v12  ;;  %1368 = vmatprep.mubr.bf16.mxu0 %v4246_v13 }
 0x1e2   : > { %1497 = vmatprep.mubr.bf16.mxu1 %v4248_v14 }
 0x1e8   : > { %1369 = vmatmul.mubr.bf16.gmra.mrb[36].mxu0 %v4250_v15 }
 0x1e9   : > { %1498 = vmatmul.mubr.bf16.gmra.mrb[36].mxu1 %v4251_v16  ;;  %1376 = vmatprep.mubr.bf16.mxu0 %v4253_v17 }
 0x1ea   : > { %1505 = vmatprep.mubr.bf16.mxu1 %v4255_v18 }
 0x1f0   : > { %1377 = vmatmul.mubr.bf16.gmra.mrb[40].mxu0 %v4257_v19 }
 0x1f1   : > { %1506 = vmatmul.mubr.bf16.gmra.mrb[40].mxu1 %v4258_v20  ;;  %1384 = vmatprep.mubr.bf16.mxu0 %v4260_v21 }
 0x1f2   : > { %1513 = vmatprep.mubr.bf16.mxu1 %v4262_v22 }
 0x1f8   : > { %1385 = vmatmul.mubr.bf16.gmra.mrb[44].mxu0 %v4264_v23 }
 0x1f9   : > { %1514 = vmatmul.mubr.bf16.gmra.mrb[44].mxu1 %v4265_v24  ;;  %3759 = vmatprep.mubr.bf16.mxu0 %v4266_v25 }
 0x1fa   : > { %3771 = vmatprep.mubr.bf16.mxu1 %v4267_v26 }
 0x200   : > { %3760 = vmatmul.mubr.bf16.vlgmr.msra.gmra.mrb[48].mxu0 %v4268_v27 }
 0x201   : > { %3772 = vmatmul.mubr.bf16.vlgmr.msra.gmra.mrb[48].mxu1 %v4269_v28  ;;  %3763 = vmatprep.mubr.bf16.mxu0 %v4270_v29 }
 0x202   : > { %3775 = vmatprep.mubr.bf16.mxu1 %v4271_v30 }
 0x208   : > { %3764 = vmatmul.mubr.bf16.gmra.mrb[52].mxu0 %v4272_v31 }
 0x209   : > { %3776 = vmatmul.mubr.bf16.gmra.mrb[52].mxu1 %v4273_v32  ;;  %3767 = vmatprep.mubr.bf16.mxu0 %v4274_v33 }
 0x20a   : > { %3779 = vmatprep.mubr.bf16.mxu1 %v4275_v34 }
 0x210   : > { %3768 = vmatmul.mubr.bf16.gmra.mrb[56].mxu0 %v4276_v35 }
 0x211   : > { %3780 = vmatmul.mubr.bf16.gmra.mrb[56].mxu1 %v4277_v36 }
 0x273   : > { %v3503_v37 = vpop.f32.mrb[0].mxu0 }
 0x274   : > { %v3591_v38 = vpop.f32.mrb[0].mxu1  ;;  %v3504_v39 = vpop.f32.mrb[1].mxu0 }
 0x275   : > { %v3505_v40 = vadd.f32 %v3504_v39, %v3503_v37  ;;  %v3592_v41 = vpop.f32.mrb[1].mxu1  ;;  %v3506_v42 = vpop.f32.mrb[2].mxu0 }
 0x276   : > { %v3593_v43 = vadd.f32 %v3592_v41, %v3591_v38  ;;  %v3594_v44 = vpop.f32.mrb[2].mxu1  ;;  %v3507_v45 = vpop.f32.mrb[3].mxu0 }
 0x277   : > { %v3508_v46 = vadd.f32 %v3507_v45, %v3506_v42  ;;  %v3595_v47 = vpop.f32.mrb[3].mxu1 }
 0x278   : > { %v3596_v48 = vadd.f32 %v3595_v47, %v3594_v44  ;;  %v5636_v49 = vadd.f32 %v3593_v43, %v3505_v40 }
 0x27a   : > { %v5638_v50 = vadd.f32 %v3596_v48, %v3508_v46 }
 0x27b   : > { %v3509_v51 = vpop.f32.mrb[4].mxu0 }
 0x27c   : > { %v3597_v52 = vpop.f32.mrb[4].mxu1  ;;  %v3510_v53 = vpop.f32.mrb[5].mxu0 }
 0x27d   : > { %v3511_v54 = vadd.f32 %v3510_v53, %v3509_v51  ;;  %v3598_v55 = vpop.f32.mrb[5].mxu1  ;;  %v3512_v56 = vpop.f32.mrb[6].mxu0 }
 0x27e   : > { %v3599_v57 = vadd.f32 %v3598_v55, %v3597_v52  ;;  %v3600_v58 = vpop.f32.mrb[6].mxu1  ;;  %v3513_v59 = vpop.f32.mrb[7].mxu0 }
 0x27f   : > { %v3514_v60 = vadd.f32 %v3513_v59, %v3512_v56  ;;  %v3601_v61 = vpop.f32.mrb[7].mxu1 }
 0x280   : > { %v3602_v62 = vadd.f32 %v3601_v61, %v3600_v58  ;;  %v5640_v63 = vadd.f32 %v3599_v57, %v3511_v54 }
 0x282   : > { %v5642_v0 = vadd.f32 %v3602_v62, %v3514_v60 }
 0x283   : > { %v3515_v1 = vpop.f32.mrb[8].mxu0 }
 0x284   : > { %v3603_v2 = vpop.f32.mrb[8].mxu1  ;;  %v3516_v3 = vpop.f32.mrb[9].mxu0 }
 0x285   : > { %v3517_v4 = vadd.f32 %v3516_v3, %v3515_v1  ;;  %v3604_v5 = vpop.f32.mrb[9].mxu1  ;;  %v3518_v6 = vpop.f32.mrb[10].mxu0 }
 0x286   : > { %v3605_v7 = vadd.f32 %v3604_v5, %v3603_v2  ;;  %v3606_v8 = vpop.f32.mrb[10].mxu1  ;;  %v3519_v9 = vpop.f32.mrb[11].mxu0 }
 0x287   : > { %v3520_v10 = vadd.f32 %v3519_v9, %v3518_v6  ;;  %v3607_v11 = vpop.f32.mrb[11].mxu1 }
 0x288   : > { %v3608_v12 = vadd.f32 %v3607_v11, %v3606_v8  ;;  %v5644_v13 = vadd.f32 %v3605_v7, %v3517_v4 }
 0x28a   : > { %v5646_v14 = vadd.f32 %v3608_v12, %v3520_v10 }
 0x28b   : > { %v3521_v15 = vpop.f32.mrb[12].mxu0 }
 0x28c   : > { %v3609_v16 = vpop.f32.mrb[12].mxu1  ;;  %v3522_v17 = vpop.f32.mrb[13].mxu0 }
 0x28d   : > { %v3523_v18 = vadd.f32 %v3522_v17, %v3521_v15  ;;  %v3610_v19 = vpop.f32.mrb[13].mxu1  ;;  %v3524_v20 = vpop.f32.mrb[14].mxu0 }
 0x28e   : > { %v3611_v21 = vadd.f32 %v3610_v19, %v3609_v16  ;;  %v3612_v22 = vpop.f32.mrb[14].mxu1  ;;  %v3525_v23 = vpop.f32.mrb[15].mxu0 }
 0x28f   : > { %v3526_v24 = vadd.f32 %v3525_v23, %v3524_v20  ;;  %v3613_v25 = vpop.f32.mrb[15].mxu1 }
 0x290   : > { %v3614_v26 = vadd.f32 %v3613_v25, %v3612_v22  ;;  %v5648_v27 = vadd.f32 %v3611_v21, %v3523_v18 }
 0x292   : > { %v5650_v28 = vadd.f32 %v3614_v26, %v3526_v24 }
 0x293   : > { %v3527_v29 = vpop.f32.mrb[16].mxu0 }
 0x294   : > { %v3615_v30 = vpop.f32.mrb[16].mxu1  ;;  %v3528_v31 = vpop.f32.mrb[17].mxu0 }
 0x295   : > { %v3529_v32 = vadd.f32 %v3528_v31, %v3527_v29  ;;  %v3616_v33 = vpop.f32.mrb[17].mxu1  ;;  %v3530_v34 = vpop.f32.mrb[18].mxu0 }
 0x296   : > { %v3617_v35 = vadd.f32 %v3616_v33, %v3615_v30  ;;  %v3618_v36 = vpop.f32.mrb[18].mxu1  ;;  %v3531_v37 = vpop.f32.mrb[19].mxu0 }
 0x297   : > { %v3532_v38 = vadd.f32 %v3531_v37, %v3530_v34  ;;  %v3619_v39 = vpop.f32.mrb[19].mxu1 }
 0x298   : > { %v3620_v40 = vadd.f32 %v3619_v39, %v3618_v36  ;;  %v5652_v41 = vadd.f32 %v3617_v35, %v3529_v32 }
 0x29a   : > { %v5654_v42 = vadd.f32 %v3620_v40, %v3532_v38 }
 0x29b   : > { %v3533_v43 = vpop.f32.mrb[20].mxu0 }
 0x29c   : > { %v3621_v44 = vpop.f32.mrb[20].mxu1  ;;  %v3534_v45 = vpop.f32.mrb[21].mxu0 }
 0x29d   : > { %v3535_v46 = vadd.f32 %v3534_v45, %v3533_v43  ;;  %v3622_v47 = vpop.f32.mrb[21].mxu1  ;;  %v3536_v48 = vpop.f32.mrb[22].mxu0 }
 0x29e   : > { %v3623_v51 = vadd.f32 %v3622_v47, %v3621_v44  ;;  %v3624_v52 = vpop.f32.mrb[22].mxu1  ;;  %v3537_v53 = vpop.f32.mrb[23].mxu0 }
 0x29f   : > { %v3538_v54 = vadd.f32 %v3537_v53, %v3536_v48  ;;  %v3625_v55 = vpop.f32.mrb[23].mxu1 }
 0x2a0   : > { %v3626_v56 = vadd.f32 %v3625_v55, %v3624_v52  ;;  %v5656_v57 = vadd.f32 %v3623_v51, %v3535_v46 }
 0x2a2   : > { %v5658_v58 = vadd.f32 %v3626_v56, %v3538_v54 }
 0x2a3   : > { %v3539_v59 = vpop.f32.mrb[24].mxu0 }
 0x2a4   : > { %v3627_v60 = vpop.f32.mrb[24].mxu1  ;;  %v3540_v61 = vpop.f32.mrb[25].mxu0 }
 0x2a5   : > { %v3541_v62 = vadd.f32 %v3540_v61, %v3539_v59  ;;  %v3628_v1 = vpop.f32.mrb[25].mxu1  ;;  %v3542_v2 = vpop.f32.mrb[26].mxu0 }
 0x2a6   : > { %v3629_v3 = vadd.f32 %v3628_v1, %v3627_v60  ;;  %v3630_v4 = vpop.f32.mrb[26].mxu1  ;;  %v3543_v5 = vpop.f32.mrb[27].mxu0 }
 0x2a7   : > { %v3544_v6 = vadd.f32 %v3543_v5, %v3542_v2  ;;  %v3631_v7 = vpop.f32.mrb[27].mxu1 }
 0x2a8   : > { %v3632_v8 = vadd.f32 %v3631_v7, %v3630_v4  ;;  %v5660_v9 = vadd.f32 %v3629_v3, %v3541_v62 }
 0x2aa   : > { %v5662_v10 = vadd.f32 %v3632_v8, %v3544_v6 }
 0x2ab   : > { %v3545_v11 = vpop.f32.mrb[28].mxu0 }
 0x2ac   : > { %v3633_v12 = vpop.f32.mrb[28].mxu1  ;;  %v3546_v15 = vpop.f32.mrb[29].mxu0 }
 0x2ad   : > { %v3547_v16 = vadd.f32 %v3546_v15, %v3545_v11  ;;  %v3634_v17 = vpop.f32.mrb[29].mxu1  ;;  %v3548_v18 = vpop.f32.mrb[30].mxu0 }
 0x2ae   : > { %v3635_v19 = vadd.f32 %v3634_v17, %v3633_v12  ;;  %v3636_v20 = vpop.f32.mrb[30].mxu1  ;;  %v3549_v21 = vpop.f32.mrb[31].mxu0 }
 0x2af   : > { %v3550_v22 = vadd.f32 %v3549_v21, %v3548_v18  ;;  %v3637_v23 = vpop.f32.mrb[31].mxu1 }
 0x2b0   : > { %v3638_v24 = vadd.f32 %v3637_v23, %v3636_v20  ;;  %v5664_v25 = vadd.f32 %v3635_v19, %v3547_v16 }
 0x2b2   : > { %v5666_v26 = vadd.f32 %v3638_v24, %v3550_v22 }
 0x2b3   : > { %v3551_v29 = vpop.f32.mrb[32].mxu0 }
 0x2b4   : > { %v3639_v30 = vpop.f32.mrb[32].mxu1  ;;  %v3552_v31 = vpop.f32.mrb[33].mxu0 }
 0x2b5   : > { %v3553_v32 = vadd.f32 %v3552_v31, %v3551_v29  ;;  %v3640_v33 = vpop.f32.mrb[33].mxu1  ;;  %v3554_v34 = vpop.f32.mrb[34].mxu0 }
 0x2b6   : > { %v3641_v35 = vadd.f32 %v3640_v33, %v3639_v30  ;;  %v3642_v36 = vpop.f32.mrb[34].mxu1  ;;  %v3555_v37 = vpop.f32.mrb[35].mxu0 }
 0x2b7   : > { %v3556_v38 = vadd.f32 %v3555_v37, %v3554_v34  ;;  %v3643_v39 = vpop.f32.mrb[35].mxu1  ;;  %v538_v37 = vld [vmem:[#allocation2 + $0x10] sm:$0xff] }
 0x2b8   : > { %v3644_v40 = vadd.f32 %v3643_v39, %v3642_v36  ;;  %v5668_v43 = vadd.f32 %v3641_v35, %v3553_v32 }
 0x2ba   : > { %v5670_v44 = vadd.f32 %v3644_v40, %v3556_v38  ;;  %v550_v40 = vld [vmem:[#allocation2 + $0x70] sm:$0xff] }
 0x2bb   : > { %v3557_v45 = vpop.f32.mrb[36].mxu0 }
 0x2bc   : > { %v3645_v46 = vpop.f32.mrb[36].mxu1  ;;  %v3558_v47 = vpop.f32.mrb[37].mxu0 }
 0x2bd   : > { %v3559_v48 = vadd.f32 %v3558_v47, %v3557_v45  ;;  %v3646_v51 = vpop.f32.mrb[37].mxu1  ;;  %v3560_v52 = vpop.f32.mrb[38].mxu0 }
 0x2be   : > { %v3647_v53 = vadd.f32 %v3646_v51, %v3645_v46  ;;  %v3648_v54 = vpop.f32.mrb[38].mxu1  ;;  %v3561_v55 = vpop.f32.mrb[39].mxu0  ;;  %v536_v46 = vld [vmem:[#allocation2] sm:$0xff] }
 0x2bf   : > { %v3562_v56 = vadd.f32 %v3561_v55, %v3560_v52  ;;  %v3649_v59 = vpop.f32.mrb[39].mxu1  ;;  %v548_v52 = vld [vmem:[#allocation2 + $0x60] sm:$0xff] }
 0x2c0   : > { %v3650_v60 = vadd.f32 %v3649_v59, %v3648_v54  ;;  %v5672_v61 = vadd.f32 %v3647_v53, %v3559_v48  ;;  %v539_v54 = vld [vmem:[#allocation2 + $0x18] sm:$0xff] }
 0x2c2   : > { %v5674_v62 = vadd.f32 %v3650_v60, %v3562_v56 }
 0x2c3   : > { %v3563_v1 = vpop.f32.mrb[40].mxu0 }
 0x2c4   : > { %v3651_v2 = vpop.f32.mrb[40].mxu1  ;;  %v3564_v3 = vpop.f32.mrb[41].mxu0 }
 0x2c5   : > { %v3565_v4 = vadd.f32 %v3564_v3, %v3563_v1  ;;  %v3652_v5 = vpop.f32.mrb[41].mxu1  ;;  %v3566_v6 = vpop.f32.mrb[42].mxu0  ;;  %v551_v1 = vld [vmem:[#allocation2 + $0x78] sm:$0xff] }
 0x2c6   : > { %v3653_v7 = vadd.f32 %v3652_v5, %v3651_v2  ;;  %v3654_v8 = vpop.f32.mrb[42].mxu1  ;;  %v3567_v11 = vpop.f32.mrb[43].mxu0 }
 0x2c7   : > { %v3568_v12 = vadd.f32 %v3567_v11, %v3566_v6  ;;  %v3655_v15 = vpop.f32.mrb[43].mxu1 }
 0x2c8   : > { %v3656_v16 = vadd.f32 %v3655_v15, %v3654_v8  ;;  %v5676_v17 = vadd.f32 %v3653_v7, %v3565_v4 }
 0x2ca   : > { %v5678_v18 = vadd.f32 %v3656_v16, %v3568_v12  ;;  %v542_v16 = vld [vmem:[#allocation2 + $0x30] sm:$0xff] }
 0x2cb   : > { %v3569_v19 = vpop.f32.mrb[44].mxu0 }
 0x2cc   : > { %v3657_v20 = vpop.f32.mrb[44].mxu1  ;;  %v3570_v21 = vpop.f32.mrb[45].mxu0 }
 0x2cd   : > { %v3571_v22 = vadd.f32 %v3570_v21, %v3569_v19  ;;  %v3658_v23 = vpop.f32.mrb[45].mxu1  ;;  %v3572_v24 = vpop.f32.mrb[46].mxu0  ;;  %v554_v19 = vld [vmem:[#allocation2 + $0x90] sm:$0xff]  ;;  %v540_v21 = vld [vmem:[#allocation2 + $0x20] sm:$0xff] }
 0x2ce   : > { %v3659_v29 = vadd.f32 %v3658_v23, %v3657_v20  ;;  %v3660_v30 = vpop.f32.mrb[46].mxu1  ;;  %v3573_v31 = vpop.f32.mrb[47].mxu0 }
 0x2cf   : > { %v3574_v32 = vadd.f32 %v3573_v31, %v3572_v24  ;;  %v3661_v33 = vpop.f32.mrb[47].mxu1  ;;  %v552_v24 = vld [vmem:[#allocation2 + $0x80] sm:$0xff] }
 0x2d0   : > { %v3662_v34 = vadd.f32 %v3661_v33, %v3660_v30  ;;  %v5680_v35 = vadd.f32 %v3659_v29, %v3571_v22  ;;  %v543_v30 = vld [vmem:[#allocation2 + $0x38] sm:$0xff] }
 0x2d2   : > { %v5682_v36 = vadd.f32 %v3662_v34, %v3574_v32 }
 0x2d3   : > { %v3761_v38 = vpop.f32.mrb[48].mxu0 }
 0x2d4   : > { %v1565_v39 = vadd.f32 %v3761_v38, %v5640_v63  ;;  %v3773_v45 = vpop.f32.mrb[48].mxu1  ;;  %v1556_v47 = vpop.f32.mrb[49].mxu0  ;;  %v537_v63 = vld [vmem:[#allocation2 + $0x8] sm:$0xff] }
 0x2d5   : > { %v1613_v48 = vadd.f32 %v3773_v45, %v5664_v25  ;;  %v1557_v51 = vadd.f32 %v1556_v47, %v5636_v49  ;;  %v1604_v53 = vpop.f32.mrb[49].mxu1  ;;  %v3762_v55 = vpop.f32.mrb[50].mxu0  ;;  %v549_v49 = vld [vmem:[#allocation2 + $0x68] sm:$0xff] }
 0x2d6   : > { %v1653_v56 = vadd.f32 %v1565_v39, %v538_v37  ;;  %v1605_v59 = vadd.f32 %v1604_v53, %v5660_v9  ;;  %v1568_v60 = vadd.f32 %v3762_v55, %v5642_v0  ;;  %v3774_v2 = vpop.f32.mrb[50].mxu1  ;;  %v1559_v3 = vpop.f32.mrb[51].mxu0  ;;  %v555_v37 = vld [vmem:[#allocation2 + $0x98] sm:$0xff]  ;;  %v558_v55 = vld [vmem:[#allocation2 + $0xb0] sm:$0xff] }
 0x2d7   : > { %v1665_v4 = vadd.f32 %v1613_v48, %v550_v40  ;;  %v1651_v5 = vadd.f32 %v1557_v51, %v536_v46  ;;  %v1616_v6 = vadd.f32 %v3774_v2, %v5666_v26  ;;  %v1560_v25 = vadd.f32 %v1559_v3, %v5638_v50  ;;  %v1607_v7 = vpop.f32.mrb[51].mxu1  ;;  %v556_v2 = vld [vmem:[#allocation2 + $0xa0] sm:$0xff]  ;;  %v547_v3 = vld [vmem:[#allocation2 + $0x58] sm:$0xff] }
 0x2d8   : > { %1677 = vst [vmem:[#allocation2 + $0x10] sm:$0xff] %v1653_v56  ;;  %v1663_v8 = vadd.f32 %v1605_v59, %v548_v52  ;;  %v1654_v11 = vadd.f32 %v1568_v60, %v539_v54  ;;  %v1608_v12 = vadd.f32 %v1607_v7, %v5662_v10  ;;  %v546_v54 = vld [vmem:[#allocation2 + $0x50] sm:$0xff]  ;;  %v544_v59 = vld [vmem:[#allocation2 + $0x40] sm:$0xff] }
 0x2d9   : > { %1689 = vst [vmem:[#allocation2 + $0x70] sm:$0xff] %v1665_v4  ;;  %1675 = vst [vmem:[#allocation2] sm:$0xff] %v1651_v5  ;;  %v1666_v0 = vadd.f32 %v1616_v6, %v551_v1  ;;  %v1652_v9 = vadd.f32 %v1560_v25, %v537_v63 }
 0x2da   : > { %1687 = vst [vmem:[#allocation2 + $0x60] sm:$0xff] %v1663_v8  ;;  %1678 = vst [vmem:[#allocation2 + $0x18] sm:$0xff] %v1654_v11  ;;  %v1664_v15 = vadd.f32 %v1608_v12, %v549_v49  ;;  %v559_v49 = vld [vmem:[#allocation2 + $0xb8] sm:$0xff] }
 0x2db   : > { %1690 = vst [vmem:[#allocation2 + $0x78] sm:$0xff] %v1666_v0  ;;  %1676 = vst [vmem:[#allocation2 + $0x8] sm:$0xff] %v1652_v9  ;;  %v3765_v26 = vpop.f32.mrb[52].mxu0 }
 0x2dc   : > { %1688 = vst [vmem:[#allocation2 + $0x68] sm:$0xff] %v1664_v15  ;;  %v1581_v50 = vadd.f32 %v3765_v26, %v5648_v27  ;;  %v3777_v20 = vpop.f32.mrb[52].mxu1  ;;  %v1572_v22 = vpop.f32.mrb[53].mxu0  ;;  %v541_v27 = vld [vmem:[#allocation2 + $0x28] sm:$0xff] }
 0x2dd   : > { %v1629_v10 = vadd.f32 %v3777_v20, %v5672_v61  ;;  %v1573_v23 = vadd.f32 %v1572_v22, %v5644_v13  ;;  %v1620_v29 = vpop.f32.mrb[53].mxu1  ;;  %v3766_v31 = vpop.f32.mrb[54].mxu0  ;;  %v553_v13 = vld [vmem:[#allocation2 + $0x88] sm:$0xff]  ;;  %v5709_v22 = vld [vmem:[#allocation8] ss:$0 sm:$0xff] (!%p3378_p8) }
 0x2de   : > { %v1657_v32 = vadd.f32 %v1581_v50, %v542_v16  ;;  %v1621_v33 = vadd.f32 %v1620_v29, %v5668_v43  ;;  %v1584_v34 = vadd.f32 %v3766_v31, %v5650_v28  ;;  %v3778_v38 = vpop.f32.mrb[54].mxu1  ;;  %v1575_v39 = vpop.f32.mrb[55].mxu0 }
 0x2df   : > { %v1669_v40 = vadd.f32 %v1629_v10, %v554_v19  ;;  %v1655_v45 = vadd.f32 %v1573_v23, %v540_v21  ;;  %v1632_v46 = vadd.f32 %v3778_v38, %v5674_v62  ;;  %v1576_v61 = vadd.f32 %v1575_v39, %v5646_v14  ;;  %v1623_v47 = vpop.f32.mrb[55].mxu1  ;;  %v4280_v19 = vld [vmem:[#allocation11 + $0x10] sm:$0xff] (!%p3378_p8)  }
 0x2e0   : > { %1681 = vst [vmem:[#allocation2 + $0x30] sm:$0xff] %v1657_v32  ;;  %v1667_v48 = vadd.f32 %v1621_v33, %v552_v24  ;;  %v1658_v51 = vadd.f32 %v1584_v34, %v543_v30  ;;  %v1624_v52 = vadd.f32 %v1623_v47, %v5670_v44  ;;  %v1703_v20 = vld [vmem:[#allocation2] sm:$0xff] (!%p3378_p8)  ;;  %v1705_v29 = vld [vmem:[#allocation2 + $0x10] sm:$0xff] (!%p3378_p8) }
 0x2e1   : > { %1693 = vst [vmem:[#allocation2 + $0x90] sm:$0xff] %v1669_v40  ;;  %1679 = vst [vmem:[#allocation2 + $0x20] sm:$0xff] %v1655_v45  ;;  %v1670_v28 = vadd.f32 %v1632_v46, %v555_v37  ;;  %v1656_v43 = vadd.f32 %v1576_v61, %v541_v27  ;;  %v1734_v10 = vmul.f32 (!%p3378_p8), %v5709_v22, %v1703_v20  ;;  %v5713_v24 = vld [vmem:[#allocation9] ss:$0 sm:$0xff] (!%p3378_p8)  ;;  %v1706_v30 = vld [vmem:[#allocation2 + $0x18] sm:$0xff] (!%p3378_p8) }
 0x2e2   : > { %1691 = vst [vmem:[#allocation2 + $0x80] sm:$0xff] %v1667_v48  ;;  %1682 = vst [vmem:[#allocation2 + $0x38] sm:$0xff] %v1658_v51  ;;  %v1668_v53 = vadd.f32 %v1624_v52, %v553_v13  ;;  %v1704_v21 = vld [vmem:[#allocation2 + $0x8] sm:$0xff] (!%p3378_p8)  ;;  %v1736_v31 = vmul.f32 (!%p3378_p8), %v5709_v22, %v1705_v29  ;;  %v1737_v32 = vmul.f32 (!%p3378_p8), %v5709_v22, %v1706_v30 }
 0x2e3   : > { %1694 = vst [vmem:[#allocation2 + $0x98] sm:$0xff] %v1670_v28  ;;  %1680 = vst [vmem:[#allocation2 + $0x28] sm:$0xff] %v1656_v43  ;;  %v3769_v62 = vpop.f32.mrb[56].mxu0  ;;  %v1735_v23 = vmul.f32 (!%p3378_p8), %v5709_v22, %v1704_v21  ;;  %v5718_v38 = vadd.f32 (!%p3378_p8), %v5713_v24, %v1734_v10  ;;  %v4282_v46 = vld [vmem:[#allocation11 + $0x20] sm:$0xff] (!%p3378_p8)  }
 0x2e4   : > { %1692 = vst [vmem:[#allocation2 + $0x88] sm:$0xff] %v1668_v53  ;;  %v1597_v14 = vadd.f32 %v3769_v62, %v5656_v57  ;;  %v3781_v56 = vpop.f32.mrb[56].mxu1  ;;  %v1588_v60 = vpop.f32.mrb[57].mxu0  ;;  %v545_v57 = vld [vmem:[#allocation2 + $0x48] sm:$0xff]  ;;  %v5726_v61 = vadd.f32 (!%p3378_p8), %v5713_v24, %v1736_v31  ;;  %v5729_v13 = vadd.f32 (!%p3378_p8), %v5713_v24, %v1737_v32 }
 0x2e5   : > { %v1645_v44 = vadd.f32 %v3781_v56, %v5680_v35  ;;  %v1589_v1 = vadd.f32 %v1588_v60, %v5652_v41  ;;  %v1636_v63 = vpop.f32.mrb[57].mxu1  ;;  %v3770_v4 = vpop.f32.mrb[58].mxu0  ;;  %v557_v41 = vld [vmem:[#allocation2 + $0xa8] sm:$0xff]  ;;  %v5721_v27 = vadd.f32 (!%p3378_p8), %v5713_v24, %v1735_v23  ;;  %v3381_v52 = vmul.f32 (!%p3378_p8), -1.442695, %v5718_v38 }
 0x2e6   : > { %v1661_v5 = vadd.f32 %v1597_v14, %v546_v54  ;;  %v1637_v6 = vadd.f32 %v1636_v63, %v5676_v17  ;;  %v1600_v25 = vadd.f32 %v3770_v4, %v5658_v58  ;;  %v3782_v7 = vpop.f32.mrb[58].mxu1  ;;  %v1591_v8 = vpop.f32.mrb[59].mxu0  ;;  %1702 = sbr.rel (%p3378_p8) target bundleno = 1550 (0x60e), region = 100  ;;  %v3383_v62 = vmul.f32 (!%p3378_p8), -1.442695, %v5726_v61  ;;  %v1715_v63 = vld [vmem:[#allocation2 + $0x60] sm:$0xff] (!%p3378_p8) }
 0x2e7   : > { %v1673_v11 = vadd.f32 %v1645_v44, %v558_v55  ;;  %v1659_v12 = vadd.f32 %v1589_v1, %v544_v59  ;;  %v1648_v0 = vadd.f32 %v3782_v7, %v5682_v36  ;;  %v1592_v35 = vadd.f32 %v1591_v8, %v5654_v42  ;;  %v1639_v9 = vpop.f32.mrb[59].mxu1  ;;  %v4278_v42 = vld [vmem:[#allocation11] sm:$0xff] (!%p3378_p8)   ;;  %v4279_v36 = vld [vmem:[#allocation11 + $0x8] sm:$0xff] (!%p3378_p8)  }
 0x2e8   : > { %1685 = vst [vmem:[#allocation2 + $0x50] sm:$0xff] %v1661_v5  ;;  %v1671_v15 = vadd.f32 %v1637_v6, %v556_v2  ;;  %v1662_v16 = vadd.f32 %v1600_v25, %v547_v3  ;;  %v1640_v26 = vadd.f32 %v1639_v9, %v5678_v18  ;;  %3783 = vmatprep.subr.bf16.mxu0 (!%p3378_p8), %v4278_v42  ;;  %v4281_v18 = vld [vmem:[#allocation11 + $0x18] sm:$0xff] (!%p3378_p8)   ;;  %v1709_v37 = vld [vmem:[#allocation2 + $0x30] sm:$0xff] (!%p3378_p8)  ;;  %v3382_v28 = vmul.f32 (!%p3378_p8), -1.442695, %v5721_v27 }
 0x2e9   : > { %1697 = vst [vmem:[#allocation2 + $0xb0] sm:$0xff] %v1673_v11  ;;  %1683 = vst [vmem:[#allocation2 + $0x40] sm:$0xff] %v1659_v12  ;;  %v1674_v58 = vadd.f32 %v1648_v0, %v559_v49  ;;  %v1660_v17 = vadd.f32 %v1592_v35, %v545_v57  ;;  %3784 = vmatpush3.bf16.msra.mxu0 (!%p3378_p8), %v4278_v42  ;;  %v1707_v33 = vld [vmem:[#allocation2 + $0x20] sm:$0xff] (!%p3378_p8)  ;;  %v1710_v45 = vld [vmem:[#allocation2 + $0x38] sm:$0xff] (!%p3378_p8)  ;;  %v1740_v47 = vmul.f32 (!%p3378_p8), %v5709_v22, %v1709_v37 }
 0x2ea   : > { %1695 = vst [vmem:[#allocation2 + $0xa0] sm:$0xff] %v1671_v15  ;;  %1686 = vst [vmem:[#allocation2 + $0x58] sm:$0xff] %v1662_v16  ;;  %v1672_v50 = vadd.f32 %v1640_v26, %v557_v41  ;;  %3785 = vmatprep.subr.bf16.mxu0 (!%p3378_p8), %v4279_v36  ;;  %v1708_v34 = vld [vmem:[#allocation2 + $0x28] sm:$0xff] (!%p3378_p8)  ;;  %v1738_v39 = vmul.f32 (!%p3378_p8), %v5709_v22, %v1707_v33  ;;  %v1741_v48 = vmul.f32 (!%p3378_p8), %v5709_v22, %v1710_v45  ;;  %v4284_v57 = vld [vmem:[#allocation11 + $0x30] sm:$0xff] (!%p3378_p8)  }
 0x2eb   : > { %1698 = vst [vmem:[#allocation2 + $0xb8] sm:$0xff] %v1674_v58  ;;  %1684 = vst [vmem:[#allocation2 + $0x48] sm:$0xff] %v1660_v17  ;;  %v1739_v40 = vmul.f32 (!%p3378_p8), %v5709_v22, %v1708_v34  ;;  %v3384_v14 = vmul.f32 (!%p3378_p8), -1.442695, %v5729_v13  ;;  %v5744_v55 = vadd.f32 (!%p3378_p8), %v5713_v24, %v1740_v47  ;;  %4302 = vpow2.f32 (!%p3378_p8), %v3381_v52  ;;  %v4283_v3 = vld [vmem:[#allocation11 + $0x28] sm:$0xff] (!%p3378_p8)   ;;  %v4285_v58 = vld [vmem:[#allocation11 + $0x38] sm:$0xff] (!%p3378_p8)  }
 0x2ec   : > { %1696 = vst [vmem:[#allocation2 + $0xa8] sm:$0xff] %v1672_v50  ;;  %v5736_v43 = vadd.f32 (!%p3378_p8), %v5713_v24, %v1738_v39  ;;  %v5747_v56 = vadd.f32 (!%p3378_p8), %v5713_v24, %v1741_v48  ;;  %4304 = vpow2.f32 (!%p3378_p8), %v3382_v28  ;;  %v1746_v11 = vmul.f32 (!%p3378_p8), %v5709_v22, %v1715_v63  ;;  %v1716_v16 = vld [vmem:[#allocation2 + $0x68] sm:$0xff] (!%p3378_p8)  ;;  %v1717_v26 = vld [vmem:[#allocation2 + $0x70] sm:$0xff] (!%p3378_p8)  ;;  %v1719_v29 = vld [vmem:[#allocation2 + $0x80] sm:$0xff] (!%p3378_p8) }
 0x2ed   : > { %3786 = vmatpush3.bf16.msra.mxu0 %v4279_v36  ;;  %v5739_v53 = vadd.f32 %v5713_v24, %v1739_v40  ;;  %v3387_v4 = vmul.f32 -1.442695, %v5744_v55  ;;  %4306 = vpow2.f32 %v3383_v62  ;;  %v1747_v36 = vmul.f32 %v5709_v22, %v1716_v16  ;;  %v1720_v33 = vld [vmem:[#allocation2 + $0x88] sm:$0xff]  ;;  %v1721_v48 = vld [vmem:[#allocation2 + $0x90] sm:$0xff] }
 0x2ee   : > { %3787 = vmatprep.subr.bf16.mxu0 %v4280_v19  ;;  %v3385_v44 = vmul.f32 -1.442695, %v5736_v43  ;;  %v3388_v5 = vmul.f32 -1.442695, %v5747_v56  ;;  %4308 = vpow2.f32 %v3384_v14  ;;  %v5773_v9 = vadd.f32 %v5713_v24, %v1746_v11 }
 0x2ef   : > { %v1713_v59 = vld [vmem:[#allocation2 + $0x50] sm:$0xff]  ;;  %v3386_v1 = vmul.f32 -1.442695, %v5739_v53  ;;  %v1748_v21 = vmul.f32 %v5709_v22, %v1717_v26  ;;  %v5782_v39 = vadd.f32 %v5713_v24, %v1747_v36  ;;  %v1750_v47 = vmul.f32 %v5709_v22, %v1719_v29 }
 0x2f0   : > { %v1711_v51 = vld [vmem:[#allocation2 + $0x40] sm:$0xff]  ;;  %v1744_v49 = vmul.f32 %v5709_v22, %v1713_v59  ;;  %4310 = vpow2.f32 %v3385_v44  ;;  %v3393_v50 = vmul.f32 -1.442695, %v5773_v9  ;;  %v1751_v28 = vmul.f32 %v5709_v22, %v1720_v33  ;;  %v1722_v59 = vld [vmem:[#allocation2 + $0x98] sm:$0xff] }
 0x2f1   : > { %3788 = vmatpush3.bf16.msra.mxu0 %v4280_v19  ;;  %v1714_v60 = vld [vmem:[#allocation2 + $0x58] sm:$0xff]  ;;  %v1742_v2 = vmul.f32 %v5709_v22, %v1711_v51  ;;  %4312 = vpow2.f32 %v3386_v1  ;;  %v3394_v1 = vmul.f32 -1.442695, %v5782_v39  ;;  %v1723_v63 = vld [vmem:[#allocation2 + $0xa0] sm:$0xff] }
 0x2f2   : > { %3789 = vmatprep.subr.bf16.mxu0 %v4281_v18  ;;  %v1712_v54 = vld [vmem:[#allocation2 + $0x48] sm:$0xff]  ;;  %v1745_v7 = vmul.f32 %v5709_v22, %v1714_v60  ;;  %v5766_v0 = vadd.f32 %v5713_v24, %v1744_v49  ;;  %4314 = vpow2.f32 %v3387_v4  ;;  %v1718_v19 = vld [vmem:[#allocation2 + $0x78] sm:$0xff]  ;;  %v5796_v49 = vadd.f32 %v5713_v24, %v1750_v47 }
 0x2f3   : > { %v1743_v6 = vmul.f32 %v5709_v22, %v1712_v54  ;;  %v5756_v25 = vadd.f32 %v5713_v24, %v1742_v2  ;;  %4316 = vpow2.f32 %v3388_v5  ;;  %v1749_v32 = vmul.f32 %v5709_v22, %v1718_v19 }
 0x2f4   : > { %v5769_v35 = vadd.f32 %v5713_v24, %v1745_v7  ;;  %v3391_v15 = vmul.f32 -1.442695, %v5766_v0  ;;  %v1752_v2 = vmul.f32 %v5709_v22, %v1721_v48  ;;  %v1725_v7 = vld [vmem:[#allocation2 + $0xb0] sm:$0xff] }
 0x2f5   : > { %3790 = vmatpush3.bf16.msra.mxu0 %v4281_v18  ;;  %v5761_v8 = vadd.f32 %v5713_v24, %v1743_v6  ;;  %v3389_v12 = vmul.f32 -1.442695, %v5756_v25  ;;  %v4303_v42 = vpop.eup %4302  ;;  %v5790_v14 = vadd.f32 %v5713_v24, %v1749_v32  ;;  %v1756_v19 = vmul.f32 %v5709_v22, %v1725_v7 }
 0x2f6   : > { %3791 = vmatprep.subr.bf16.mxu0 %v4282_v46  ;;  %v3392_v17 = vmul.f32 -1.442695, %v5769_v35  ;;  %v4305_v18 = vpop.eup %4304  ;;  %v1861_v20 = vadd.f32 1.0, %v4303_v42 }
 0x2f7   : > { %v3390_v41 = vmul.f32 -1.442695, %v5761_v8  ;;  %4318 = vpow2.f32 %v3389_v12  ;;  %v4307_v10 = vpop.eup %4306  ;;  %v1862_v23 = vadd.f32 1.0, %v4305_v18  ;;  %v5799_v12 = vadd.f32 %v5713_v24, %v1751_v28 }
 0x2f8   : > { %v4309_v30 = vpop.eup %4308  ;;  %v1863_v31 = vadd.f32 1.0, %v4307_v10  ;;  %v3396_v26 = vmul.f32 -1.442695, %v5790_v14  ;;  %v5808_v10 = vadd.f32 %v5713_v24, %v1752_v2  ;;  %v5825_v47 = vadd.f32 %v5713_v24, %v1756_v19 }
 0x2f9   : > { %3792 = vmatpush3.bf16.msra.mxu0 %v4282_v46  ;;  %4320 = vpow2.f32 %v3390_v41  ;;  %v1864_v37 = vadd.f32 1.0, %v4309_v30  ;;  %v5785_v46 = vadd.f32 %v5713_v24, %v1748_v21  ;;  %v1753_v41 = vmul.f32 %v5709_v22, %v1722_v59 }
 0x2fa   : > { %3793 = vmatprep.subr.bf16.mxu0 %v4283_v3  ;;  %4322 = vpow2.f32 %v3391_v15  ;;  %v4311_v34 = vpop.eup %4310  ;;  %v3397_v21 = vmul.f32 -1.442695, %v5796_v49 }
 0x2fb   : > { %4324 = vpow2.f32 %v3392_v17  ;;  %v4313_v40 = vpop.eup %4312  ;;  %v1865_v45 = vadd.f32 1.0, %v4311_v34  ;;  %v3395_v6 = vmul.f32 -1.442695, %v5785_v46  ;;  %v1726_v17 = vld [vmem:[#allocation2 + $0xb8] sm:$0xff]  ;;  %v5812_v30 = vadd.f32 %v5713_v24, %v1753_v41 }
 0x2fc   : > { %4326 = vpow2.f32 %v3393_v50  ;;  %v4315_v51 = vpop.eup %4314  ;;  %v1866_v52 = vadd.f32 1.0, %v4313_v40  ;;  %v3398_v34 = vmul.f32 -1.442695, %v5799_v12 }
 0x2fd   : > { %3794 = vmatpush3.bf16.msra.mxu0 %v4283_v3  ;;  %4328 = vrcp.f32 %v1861_v20  ;;  %v4317_v54 = vpop.eup %4316  ;;  %v1867_v62 = vadd.f32 1.0, %v4315_v51  ;;  %v1724_v3 = vld [vmem:[#allocation2 + $0xa8] sm:$0xff]  ;;  %v3399_v51 = vmul.f32 -1.442695, %v5808_v10 }
 0x2fe   : > { %3795 = vmatprep.subr.bf16.mxu0 %v4284_v57  ;;  %4330 = vrcp.f32 %v1862_v23  ;;  %v1868_v44 = vadd.f32 1.0, %v4317_v54  ;;  %v1755_v36 = vmul.f32 %v5709_v22, %v1724_v3 }
 0x2ff   : > { %4332 = vrcp.f32 %v1863_v31  ;;  %v1757_v31 = vmul.f32 %v5709_v22, %v1726_v17 }
 0x300   : > { %4334 = vrcp.f32 %v1864_v37 }
 0x301   : > { %3796 = vmatpush3.bf16.msra.mxu0 %v4284_v57  ;;  %4336 = vrcp.f32 %v1865_v45  ;;  %v4319_v60 = vpop.eup %4318  ;;  %v5832_v54 = vadd.f32 %v5713_v24, %v1757_v31 }
 0x302   : > { %3797 = vmatprep.subr.bf16.mxu0 %v4285_v58  ;;  %4338 = vrcp.f32 %v1866_v52  ;;  %v1869_v5 = vadd.f32 1.0, %v4319_v60 }
 0x303   : > { %v4321_v4 = vpop.eup %4320  ;;  %4340 = vrcp.f32 %v1867_v62 }
 0x304   : > { %v4323_v57 = vpop.eup %4322  ;;  %4342 = vrcp.f32 %v1868_v44  ;;  %v1870_v11 = vadd.f32 1.0, %v4321_v4 }
 0x305   : > { %3798 = vmatpush3.bf16.msra.mxu0 %v4285_v58  ;;  %v4325_v15 = vpop.eup %4324  ;;  %4344 = vrcp.f32 %v1869_v5  ;;  %v1871_v16 = vadd.f32 1.0, %v4323_v57  ;;  %v1754_v58 = vmul.f32 %v5709_v22, %v1723_v63  ;;  %v3404_v5 = vmul.f32 -1.442695, %v5832_v54 }
 0x306   : > { %v4327_v50 = vpop.eup %4326  ;;  %4346 = vrcp.f32 %v1870_v11  ;;  %v1872_v42 = vadd.f32 1.0, %v4325_v15 }
 0x307   : > { %v4329_v18 = vpop.eup %4328  ;;  %4348 = vrcp.f32 %v1871_v16  ;;  %v1873_v20 = vadd.f32 1.0, %v4327_v50  ;;  %v5818_v37 = vadd.f32 %v5713_v24, %v1754_v58 }
 0x308   : > { %v4331_v23 = vpop.eup %4330  ;;  %v1933_v29 = vmul.f32 %v4329_v18, %v5718_v38  ;;  %4350 = vrcp.f32 %v1872_v42  ;;  %v5822_v38 = vadd.f32 %v5713_v24, %v1755_v36 }
 0x309   : > { %v4333_v32 = vpop.eup %4332  ;;  %v1934_v33 = vmul.f32 %v4331_v23, %v5721_v27  ;;  %4352 = vpow2.f32 %v3394_v1 }
 0x30a   : > { %v4335_v40 = vpop.eup %4334  ;;  %v1935_v45 = vmul.f32 %v4333_v32, %v5726_v61  ;;  %4354 = vrcp.f32 %v1873_v20  ;;  %v3400_v61 = vmul.f32 -1.442695, %v5812_v30  ;;  %v3402_v1 = vmul.f32 -1.442695, %v5822_v38 }
 0x30b   : > { %v4337_v22 = vpop.eup %4336  ;;  %v1957_v48 = vpack.c.bf16 %v1934_v33, %v1933_v29  ;;  %v1936_v27 = vmul.f32 %v4335_v40, %v5729_v13  ;;  %4356 = vpow2.f32 %v3395_v6  ;;  %v3401_v13 = vmul.f32 -1.442695, %v5818_v37 }
 0x30c   : > { %v4339_v52 = vpop.eup %4338  ;;  %v1937_v28 = vmul.f32 %v4337_v22, %v5736_v43  ;;  %4358 = vpow2.f32 %v3396_v26  ;;  %v3403_v43 = vmul.f32 -1.442695, %v5825_v47 }
 0x30d   : > { %v4341_v62 = vpop.eup %4340  ;;  %3799 = vmatprep.mubr.bf16.mxu0 %v1957_v48  ;;  %v1958_v59 = vpack.c.bf16 %v1936_v27, %v1935_v45  ;;  %v1938_v60 = vmul.f32 %v4339_v52, %v5739_v53  ;;  %4360 = vpow2.f32 %v3397_v21 }
 0x30e   : > { %v4343_v44 = vpop.eup %4342  ;;  %4362 = vpow2.f32 %v3398_v34  ;;  %v1939_v24 = vmul.f32 %v4341_v62, %v5744_v55 }
 0x30f   : > { %v4345_v2 = vpop.eup %4344  ;;  %3800 = vmatmul.mubr.bf16.vlgmr.msra.gmra.mrb[0].mxu0 %v1958_v59  ;;  %v1959_v63 = vpack.c.bf16 %v1938_v60, %v1937_v28  ;;  %v1940_v3 = vmul.f32 %v4343_v44, %v5747_v56  ;;  %4364 = vpow2.f32 %v3399_v51 }
 0x310   : > { %v4347_v4 = vpop.eup %4346  ;;  %v1941_v53 = vmul.f32 %v4345_v2, %v5756_v25  ;;  %4366 = vpow2.f32 %v3400_v61 }
 0x311   : > { %v4349_v6 = vpop.eup %4348  ;;  %3803 = vmatprep.mubr.bf16.mxu0 %v1959_v63  ;;  %v1942_v7 = vmul.f32 %v4347_v4, %v5761_v8  ;;  %4368 = vpow2.f32 %v3401_v13  ;;  %v1960_v41 = vpack.c.bf16 %v1940_v3, %v1939_v24 }
 0x312   : > { %v4351_v57 = vpop.eup %4350  ;;  %4370 = vpow2.f32 %v3402_v1  ;;  %v1943_v17 = vmul.f32 %v4349_v6, %v5766_v0 }
 0x313   : > { %v4353_v11 = vpop.eup %4352  ;;  %4372 = vpow2.f32 %v3403_v43  ;;  %v1961_v15 = vpack.c.bf16 %v1942_v7, %v1941_v53  ;;  %v1944_v8 = vmul.f32 %v4351_v57, %v5769_v35  ;;  %v4290_v57 = vld [vmem:[#allocation11 + $0x60] sm:$0xff]  }
 0x314   : > { %v4355_v55 = vpop.eup %4354  ;;  %v1874_v56 = vadd.f32 1.0, %v4353_v11  ;;  %4374 = vpow2.f32 %v3404_v5  ;;  %v4293_v11 = vld [vmem:[#allocation11 + $0x78] sm:$0xff]  }
 0x315   : > { %v4357_v16 = vpop.eup %4356  ;;  %v1962_v29 = vpack.c.bf16 %v1944_v8, %v1943_v17  ;;  %v1945_v45 = vmul.f32 %v4355_v55, %v5773_v9 }
 0x316   : > { %v4359_v26 = vpop.eup %4358  ;;  %4376 = vrcp.f32 %v1874_v56  ;;  %v1875_v25 = vadd.f32 1.0, %v4357_v16 }
 0x317   : > { %v4361_v58 = vpop.eup %4360  ;;  %3804 = vmatmul.mubr.bf16.gmra.mrb[4].mxu0 %v1960_v41  ;;  %v1876_v50 = vadd.f32 1.0, %v4359_v26  ;;  %v5857_v41 = vld [vmem:[#allocation12] ss:$0 sm:$0xff] }
 0x318   : > { %v4363_v42 = vpop.eup %4362  ;;  %3807 = vmatprep.mubr.bf16.mxu0 %v1961_v15  ;;  %4378 = vrcp.f32 %v1875_v25  ;;  %v1877_v36 = vadd.f32 1.0, %v4361_v58  ;;  %v5859_v15 = vld [vmem:[#allocation14] ss:$0 sm:$0xff] }
 0x319   : > { %v4365_v19 = vpop.eup %4364  ;;  %4380 = vrcp.f32 %v1876_v50  ;;  %v1878_v18 = vadd.f32 1.0, %v4363_v42 }
 0x31a   : > { %v4367_v20 = vpop.eup %4366  ;;  %4382 = vrcp.f32 %v1877_v36  ;;  %v1879_v21 = vadd.f32 1.0, %v4365_v19 }
 0x31b   : > { %v4369_v23 = vpop.eup %4368  ;;  %4384 = vrcp.f32 %v1878_v18  ;;  %v1880_v31 = vadd.f32 1.0, %v4367_v20 }
 0x31c   : > { %v4371_v32 = vpop.eup %4370  ;;  %4386 = vrcp.f32 %v1879_v21  ;;  %v1881_v0 = vadd.f32 1.0, %v4369_v23 }
 0x31d   : > { %v4373_v33 = vpop.eup %4372  ;;  %4388 = vrcp.f32 %v1880_v31  ;;  %v1882_v35 = vadd.f32 1.0, %v4371_v32 }
 0x31e   : > { %v4375_v34 = vpop.eup %4374  ;;  %4390 = vrcp.f32 %v1881_v0  ;;  %v1883_v40 = vadd.f32 1.0, %v4373_v33 }
 0x31f   : > { %3808 = vmatmul.mubr.bf16.gmra.mrb[8].mxu0 %v1962_v29  ;;  %4392 = vrcp.f32 %v1882_v35  ;;  %v1884_v22 = vadd.f32 1.0, %v4375_v34 }
 0x320   : > { %v4377_v48 = vpop.eup %4376  ;;  %4394 = vrcp.f32 %v1883_v40 }
 0x321   : > { %v1946_v27 = vmul.f32 %v4377_v48, %v5782_v39  ;;  %4396 = vrcp.f32 %v1884_v22 }
 0x322   : > { %v4379_v51 = vpop.eup %4378 }
 0x323   : > { %v4381_v52 = vpop.eup %4380  ;;  %v1963_v28 = vpack.c.bf16 %v1946_v27, %v1945_v45  ;;  %v1947_v61 = vmul.f32 %v4379_v51, %v5785_v46 }
 0x324   : > { %v4383_v62 = vpop.eup %4382  ;;  %v1948_v59 = vmul.f32 %v4381_v52, %v5790_v14 }
 0x325   : > { %v4385_v60 = vpop.eup %4384  ;;  %3811 = vmatprep.mubr.bf16.mxu0 %v1963_v28  ;;  %v1949_v13 = vmul.f32 %v4383_v62, %v5796_v49 }
 0x326   : > { %v4387_v9 = vpop.eup %4386  ;;  %v1964_v44 = vpack.c.bf16 %v1948_v59, %v1947_v61  ;;  %v1950_v1 = vmul.f32 %v4385_v60, %v5799_v12 }
 0x327   : > { %v4389_v43 = vpop.eup %4388  ;;  %v1951_v63 = vmul.f32 %v4387_v9, %v5808_v10  ;;  %v4286_v10 = vld [vmem:[#allocation11 + $0x40] sm:$0xff]  }
 0x328   : > { %v4391_v39 = vpop.eup %4390  ;;  %3812 = vmatmul.mubr.bf16.gmra.mrb[12].mxu0 %v1964_v44  ;;  %v1965_v2 = vpack.c.bf16 %v1950_v1, %v1949_v13  ;;  %v1952_v46 = vmul.f32 %v4389_v43, %v5812_v30  ;;  %3823 = vmatprep.subr.bf16.mxu1 %v4286_v10  ;;  %v4287_v30 = vld [vmem:[#allocation11 + $0x48] sm:$0xff]  }
 0x329   : > { %v4393_v24 = vpop.eup %4392  ;;  %v1953_v3 = vmul.f32 %v4391_v39, %v5818_v37  ;;  %3824 = vmatpush3.bf16.msra.mxu1 %v4286_v10  ;;  %v4288_v37 = vld [vmem:[#allocation11 + $0x50] sm:$0xff]  }
 0x32a   : > { %3815 = vmatprep.mubr.bf16.mxu0 %v1965_v2  ;;  %v1954_v14 = vmul.f32 %v4393_v24, %v5822_v38  ;;  %v4395_v4 = vpop.eup %4394  ;;  %v1966_v49 = vpack.c.bf16 %v1952_v46, %v1951_v63  ;;  %3825 = vmatprep.subr.bf16.mxu1 %v4287_v30  ;;  %v4289_v38 = vld [vmem:[#allocation11 + $0x58] sm:$0xff]  }
 0x32b   : > { %v4397_v53 = vpop.eup %4396  ;;  %v1955_v12 = vmul.f32 %v4395_v4, %v5825_v47  ;;  %v4291_v47 = vld [vmem:[#allocation11 + $0x68] sm:$0xff]  }
 0x32c   : > { %v1967_v5 = vpack.c.bf16 %v1954_v14, %v1953_v3  ;;  %v1956_v6 = vmul.f32 %v4397_v53, %v5832_v54  ;;  %v4292_v54 = vld [vmem:[#allocation11 + $0x70] sm:$0xff]  }
 0x32d   : > { %3826 = vmatpush3.bf16.msra.mxu1 %v4287_v30 }
 0x32e   : > { %v1968_v7 = vpack.c.bf16 %v1956_v6, %v1955_v12  ;;  %3827 = vmatprep.subr.bf16.mxu1 %v4288_v37 }
 0x330   : > { %3816 = vmatmul.mubr.bf16.gmra.mrb[16].mxu0 %v1966_v49 }
 0x331   : > { %3819 = vmatprep.mubr.bf16.mxu0 %v1967_v5  ;;  %3828 = vmatpush3.bf16.msra.mxu1 %v4288_v37 }
 0x332   : > { %3829 = vmatprep.subr.bf16.mxu1 %v4289_v38 }
 0x335   : > { %3830 = vmatpush3.bf16.msra.mxu1 %v4289_v38 }
 0x336   : > { %3831 = vmatprep.subr.bf16.mxu1 %v4290_v57 }
 0x338   : > { %3820 = vmatmul.mubr.bf16.gmra.mrb[20].mxu0 %v1968_v7 }
 0x339   : > { %3832 = vmatpush3.bf16.msra.mxu1 %v4290_v57 }
 0x33a   : > { %3833 = vmatprep.subr.bf16.mxu1 %v4291_v47 }
 0x33d   : > { %3834 = vmatpush3.bf16.msra.mxu1 %v4291_v47 }
 0x33e   : > { %3835 = vmatprep.subr.bf16.mxu1 %v4292_v54 }
 0x341   : > { %3836 = vmatpush3.bf16.msra.mxu1 %v4292_v54 }
 0x342   : > { %3837 = vmatprep.subr.bf16.mxu1 %v4293_v11 }
 0x345   : > { %3838 = vmatpush3.bf16.msra.mxu1 %v4293_v11 }
 0x3e2   : > { %v3801_v55 = vpop.f32.mrb[0].mxu0 }
 0x3e3   : > { %v2171_v56 = vmul.f32 %v3801_v55, %v5857_v41  ;;  %v2067_v16 = vpop.f32.mrb[1].mxu0 }
 0x3e4   : > { %v2169_v26 = vmul.f32 %v5857_v41, %v2067_v16  ;;  %v3802_v25 = vpop.f32.mrb[2].mxu0 }
 0x3e5   : > { %v5864_v58 = vadd.f32 %v5859_v15, %v2171_v56  ;;  %v2172_v17 = vmul.f32 %v3802_v25, %v5857_v41  ;;  %v2070_v8 = vpop.f32.mrb[3].mxu0 }
 0x3e6   : > { %v5868_v50 = vadd.f32 %v5859_v15, %v2169_v26  ;;  %v2170_v42 = vmul.f32 %v5857_v41, %v2070_v8 }
 0x3e7   : > { %v3417_v36 = vmul.f32 -1.442695, %v5864_v58  ;;  %v5873_v19 = vadd.f32 %v5859_v15, %v2172_v17 }
 0x3e8   : > { %v3415_v18 = vmul.f32 -1.442695, %v5868_v50  ;;  %v5877_v20 = vadd.f32 %v5859_v15, %v2170_v42 }
 0x3e9   : > { %4398 = vpow2.f32 %v3417_v36  ;;  %v3418_v21 = vmul.f32 -1.442695, %v5873_v19 }
 0x3ea   : > { %4400 = vpow2.f32 %v3415_v18  ;;  %v3416_v23 = vmul.f32 -1.442695, %v5877_v20  ;;  %v3805_v29 = vpop.f32.mrb[4].mxu0 }
 0x3eb   : > { %4402 = vpow2.f32 %v3418_v21  ;;  %v2175_v31 = vmul.f32 %v3805_v29, %v5857_v41  ;;  %v2083_v32 = vpop.f32.mrb[5].mxu0 }
 0x3ec   : > { %4404 = vpow2.f32 %v3416_v23  ;;  %v2173_v0 = vmul.f32 %v5857_v41, %v2083_v32  ;;  %v3806_v33 = vpop.f32.mrb[6].mxu0 }
 0x3ed   : > { %v5884_v35 = vadd.f32 %v5859_v15, %v2175_v31  ;;  %v2176_v34 = vmul.f32 %v3806_v33, %v5857_v41  ;;  %v2086_v40 = vpop.f32.mrb[7].mxu0 }
 0x3ee   : > { %v5888_v45 = vadd.f32 %v5859_v15, %v2173_v0  ;;  %v2174_v22 = vmul.f32 %v5857_v41, %v2086_v40 }
 0x3ef   : > { %v3421_v48 = vmul.f32 -1.442695, %v5884_v35  ;;  %v5893_v27 = vadd.f32 %v5859_v15, %v2176_v34 }
 0x3f0   : > { %v3419_v51 = vmul.f32 -1.442695, %v5888_v45  ;;  %v5897_v52 = vadd.f32 %v5859_v15, %v2174_v22 }
 0x3f1   : > { %4406 = vpow2.f32 %v3421_v48  ;;  %v3422_v28 = vmul.f32 -1.442695, %v5893_v27 }
 0x3f2   : > { %4408 = vpow2.f32 %v3419_v51  ;;  %v3420_v61 = vmul.f32 -1.442695, %v5897_v52  ;;  %v3809_v62 = vpop.f32.mrb[8].mxu0 }
 0x3f3   : > { %v4399_v59 = vpop.eup %4398  ;;  %4410 = vpow2.f32 %v3422_v28  ;;  %v2179_v60 = vmul.f32 %v3809_v62, %v5857_v41  ;;  %v2099_v13 = vpop.f32.mrb[9].mxu0 }
 0x3f4   : > { %v4401_v9 = vpop.eup %4400  ;;  %v2298_v44 = vadd.f32 1.0, %v4399_v59  ;;  %4412 = vpow2.f32 %v3420_v61  ;;  %v2177_v1 = vmul.f32 %v5857_v41, %v2099_v13  ;;  %v3810_v43 = vpop.f32.mrb[10].mxu0 }
 0x3f5   : > { %v4403_v39 = vpop.eup %4402  ;;  %v2296_v2 = vadd.f32 1.0, %v4401_v9  ;;  %v5904_v63 = vadd.f32 %v5859_v15, %v2179_v60  ;;  %v2180_v46 = vmul.f32 %v3810_v43, %v5857_v41  ;;  %v2102_v24 = vpop.f32.mrb[11].mxu0 }
 0x3f6   : > { %v4405_v3 = vpop.eup %4404  ;;  %4414 = vrcp.f32 %v2298_v44  ;;  %v2299_v14 = vadd.f32 1.0, %v4403_v39  ;;  %v5908_v4 = vadd.f32 %v5859_v15, %v2177_v1  ;;  %v2178_v49 = vmul.f32 %v5857_v41, %v2102_v24 }
 0x3f7   : > { %4416 = vrcp.f32 %v2296_v2  ;;  %v2297_v53 = vadd.f32 1.0, %v4405_v3  ;;  %v3425_v5 = vmul.f32 -1.442695, %v5904_v63  ;;  %v5913_v12 = vadd.f32 %v5859_v15, %v2180_v46 }
 0x3f8   : > { %4418 = vrcp.f32 %v2299_v14  ;;  %v3423_v6 = vmul.f32 -1.442695, %v5908_v4  ;;  %v5917_v7 = vadd.f32 %v5859_v15, %v2178_v49 }
 0x3f9   : > { %4420 = vrcp.f32 %v2297_v53  ;;  %v3426_v10 = vmul.f32 -1.442695, %v5913_v12 }
 0x3fa   : > { %4422 = vpow2.f32 %v3425_v5  ;;  %v3424_v30 = vmul.f32 -1.442695, %v5917_v7 }
 0x3fb   : > { %v4407_v37 = vpop.eup %4406  ;;  %4424 = vpow2.f32 %v3423_v6  ;;  %v3813_v38 = vpop.f32.mrb[12].mxu0 }
 0x3fc   : > { %v4409_v57 = vpop.eup %4408  ;;  %v2302_v47 = vadd.f32 1.0, %v4407_v37  ;;  %4426 = vpow2.f32 %v3426_v10  ;;  %v2183_v54 = vmul.f32 %v3813_v38, %v5857_v41  ;;  %v2115_v11 = vpop.f32.mrb[13].mxu0 }
 0x3fd   : > { %v4411_v55 = vpop.eup %4410  ;;  %v2300_v56 = vadd.f32 1.0, %v4409_v57  ;;  %4428 = vpow2.f32 %v3424_v30  ;;  %v2181_v16 = vmul.f32 %v5857_v41, %v2115_v11  ;;  %v3814_v26 = vpop.f32.mrb[14].mxu0 }
 0x3fe   : > { %v4413_v25 = vpop.eup %4412  ;;  %4430 = vrcp.f32 %v2302_v47  ;;  %v2303_v17 = vadd.f32 1.0, %v4411_v55  ;;  %v5924_v8 = vadd.f32 %v5859_v15, %v2183_v54  ;;  %v2184_v42 = vmul.f32 %v3814_v26, %v5857_v41  ;;  %v2118_v36 = vpop.f32.mrb[15].mxu0 }
 0x3ff   : > { %4432 = vrcp.f32 %v2300_v56  ;;  %v2301_v18 = vadd.f32 1.0, %v4413_v25  ;;  %v5928_v21 = vadd.f32 %v5859_v15, %v2181_v16  ;;  %v2182_v23 = vmul.f32 %v5857_v41, %v2118_v36 }
 0x400   : > { %v4415_v29 = vpop.eup %4414  ;;  %4434 = vrcp.f32 %v2303_v17  ;;  %v3429_v31 = vmul.f32 -1.442695, %v5924_v8  ;;  %v5933_v32 = vadd.f32 %v5859_v15, %v2184_v42 }
 0x401   : > { %v4417_v0 = vpop.eup %4416  ;;  %4436 = vrcp.f32 %v2301_v18  ;;  %v3427_v33 = vmul.f32 -1.442695, %v5928_v21  ;;  %v5937_v34 = vadd.f32 %v5859_v15, %v2182_v23  ;;  %v2370_v51 = vmul.f32 %v4415_v29, %v5864_v58 }
 0x402   : > { %v4419_v40 = vpop.eup %4418  ;;  %4438 = vpow2.f32 %v3429_v31  ;;  %v3430_v22 = vmul.f32 -1.442695, %v5933_v32  ;;  %v2368_v9 = vmul.f32 %v4417_v0, %v5868_v50 }
 0x403   : > { %v4421_v48 = vpop.eup %4420  ;;  %v2371_v28 = vmul.f32 %v4419_v40, %v5873_v19  ;;  %4440 = vpow2.f32 %v3427_v33  ;;  %v3428_v61 = vmul.f32 -1.442695, %v5937_v34  ;;  %v3817_v62 = vpop.f32.mrb[16].mxu0 }
 0x404   : > { %v4423_v59 = vpop.eup %4422  ;;  %4442 = vpow2.f32 %v3430_v22  ;;  %v2187_v60 = vmul.f32 %v3817_v62, %v5857_v41  ;;  %v2131_v13 = vpop.f32.mrb[17].mxu0  ;;  %v2369_v44 = vmul.f32 %v4421_v48, %v5877_v20 }
 0x405   : > { %v4425_v1 = vpop.eup %4424  ;;  %v2306_v43 = vadd.f32 1.0, %v4423_v59  ;;  %4444 = vpow2.f32 %v3428_v61  ;;  %v2185_v58 = vmul.f32 %v5857_v41, %v2131_v13  ;;  %v3818_v39 = vpop.f32.mrb[18].mxu0  ;;  %v2393_v19 = vpack.c.bf16 %v2371_v28, %v2370_v51 }
 0x406   : > { %v4427_v2 = vpop.eup %4426  ;;  %v2304_v46 = vadd.f32 1.0, %v4425_v1  ;;  %v5948_v24 = vadd.f32 %v5859_v15, %v2187_v60  ;;  %v2188_v3 = vmul.f32 %v3818_v39, %v5857_v41  ;;  %v2134_v14 = vpop.f32.mrb[19].mxu0  ;;  %v2392_v49 = vpack.c.bf16 %v2369_v44, %v2368_v9 }
 0x407   : > { %v4429_v53 = vpop.eup %4428  ;;  %4446 = vrcp.f32 %v2306_v43  ;;  %v2307_v50 = vadd.f32 1.0, %v4427_v2  ;;  %v5952_v20 = vadd.f32 %v5859_v15, %v2185_v58  ;;  %v2186_v5 = vmul.f32 %v5857_v41, %v2134_v14 }
 0x408   : > { %v4431_v6 = vpop.eup %4430  ;;  %4448 = vrcp.f32 %v2304_v46  ;;  %v2305_v10 = vadd.f32 1.0, %v4429_v53  ;;  %v3433_v30 = vmul.f32 -1.442695, %v5948_v24  ;;  %v5957_v37 = vadd.f32 %v5859_v15, %v2188_v3  ;;  %3839 = vmatprep.mubr.bf16.mxu1 %v2392_v49 }
 0x409   : > { %v4433_v38 = vpop.eup %4432  ;;  %4450 = vrcp.f32 %v2307_v50  ;;  %v3431_v57 = vmul.f32 -1.442695, %v5952_v20  ;;  %v5961_v47 = vadd.f32 %v5859_v15, %v2186_v5  ;;  %3840 = vmatmul.mubr.bf16.vlgmr.msra.gmra.mrb[0].mxu1 %v2393_v19  ;;  %v2374_v56 = vmul.f32 %v4431_v6, %v5884_v35 }
 0x40a   : > { %v4435_v54 = vpop.eup %4434  ;;  %4452 = vrcp.f32 %v2305_v10  ;;  %v3434_v11 = vmul.f32 -1.442695, %v5957_v37  ;;  %v2372_v42 = vmul.f32 %v4433_v38, %v5888_v45 }
 0x40b   : > { %v4437_v55 = vpop.eup %4436  ;;  %v2375_v16 = vmul.f32 %v4435_v54, %v5893_v27  ;;  %4454 = vpow2.f32 %v3433_v30  ;;  %v3432_v26 = vmul.f32 -1.442695, %v5961_v47  ;;  %v3821_v25 = vpop.f32.mrb[20].mxu0 }
 0x40c   : > { %v4439_v17 = vpop.eup %4438  ;;  %v2373_v36 = vmul.f32 %v4437_v55, %v5897_v52  ;;  %4456 = vpow2.f32 %v3431_v57  ;;  %v2191_v18 = vmul.f32 %v3821_v25, %v5857_v41  ;;  %v2147_v23 = vpop.f32.mrb[21].mxu0 }
 0x40d   : > { %v4441_v29 = vpop.eup %4440  ;;  %v2310_v31 = vadd.f32 1.0, %v4439_v17  ;;  %4458 = vpow2.f32 %v3434_v11  ;;  %v2189_v35 = vmul.f32 %v5857_v41, %v2147_v23  ;;  %v3822_v0 = vpop.f32.mrb[22].mxu0  ;;  %v2395_v27 = vpack.c.bf16 %v2375_v16, %v2374_v56 }
 0x40e   : > { %v4443_v33 = vpop.eup %4442  ;;  %v2308_v40 = vadd.f32 1.0, %v4441_v29  ;;  %4460 = vpow2.f32 %v3432_v26  ;;  %v5972_v22 = vadd.f32 %v5859_v15, %v2191_v18  ;;  %v2192_v45 = vmul.f32 %v3822_v0, %v5857_v41  ;;  %v2150_v52 = vpop.f32.mrb[23].mxu0 }
 0x40f   : > { %v4445_v48 = vpop.eup %4444  ;;  %4462 = vrcp.f32 %v2310_v31  ;;  %v2311_v51 = vadd.f32 1.0, %v4443_v33  ;;  %v5976_v28 = vadd.f32 %v5859_v15, %v2189_v35  ;;  %v2190_v61 = vmul.f32 %v5857_v41, %v2150_v52 }
 0x410   : > { %4464 = vrcp.f32 %v2308_v40  ;;  %v2309_v62 = vadd.f32 1.0, %v4445_v48  ;;  %v3437_v59 = vmul.f32 -1.442695, %v5972_v22  ;;  %v5981_v60 = vadd.f32 %v5859_v15, %v2192_v45 }
 0x411   : > { %v4447_v13 = vpop.eup %4446  ;;  %4466 = vrcp.f32 %v2311_v51  ;;  %v3435_v9 = vmul.f32 -1.442695, %v5976_v28  ;;  %v5985_v44 = vadd.f32 %v5859_v15, %v2190_v61  ;;  %v2394_v1 = vpack.c.bf16 %v2373_v36, %v2372_v42 }
 0x412   : > { %v4449_v43 = vpop.eup %4448  ;;  %4468 = vrcp.f32 %v2309_v62  ;;  %v3438_v58 = vmul.f32 -1.442695, %v5981_v60  ;;  %v2378_v2 = vmul.f32 %v4447_v13, %v5904_v63 }
 0x413   : > { %v4451_v41 = vpop.eup %4450  ;;  %4470 = vpow2.f32 %v3437_v59  ;;  %v3436_v39 = vmul.f32 -1.442695, %v5985_v44  ;;  %3843 = vmatprep.mubr.bf16.mxu1 %v2394_v1  ;;  %v2376_v15 = vmul.f32 %v4449_v43, %v5908_v4  ;;  %v4300_v1 = vld [vmem:[#allocation15 + $0x30] sm:$0xff]   ;;  %v4301_v43 = vld [vmem:[#allocation15 + $0x38] sm:$0xff]  }
 0x414   : > { %v4453_v19 = vpop.eup %4452  ;;  %v2379_v46 = vmul.f32 %v4451_v41, %v5913_v12  ;;  %4472 = vpow2.f32 %v3435_v9  ;;  %3844 = vmatmul.mubr.bf16.gmra.mrb[4].mxu1 %v2395_v27  ;;  %v4295_v9 = vld [vmem:[#allocation15 + $0x8] sm:$0xff]  }
 0x415   : > { %v4455_v3 = vpop.eup %4454  ;;  %v2377_v14 = vmul.f32 %v4453_v19, %v5917_v7  ;;  %4474 = vpow2.f32 %v3438_v58  ;;  %v6005_v58 = vld [vmem:[#allocation12 + $0x1] ss:$0 sm:$0xff] }
 0x416   : > { %v4457_v49 = vpop.eup %4456  ;;  %v2314_v53 = vadd.f32 1.0, %v4455_v3  ;;  %4476 = vpow2.f32 %v3436_v39  ;;  %v2397_v50 = vpack.c.bf16 %v2379_v46, %v2378_v2  ;;  %v6007_v39 = vld [vmem:[#allocation14 + $0x1] ss:$0 sm:$0xff] }
 0x417   : > { %v4459_v5 = vpop.eup %4458  ;;  %v2312_v6 = vadd.f32 1.0, %v4457_v49  ;;  %v2396_v10 = vpack.c.bf16 %v2377_v14, %v2376_v15 }
 0x418   : > { %v4461_v30 = vpop.eup %4460  ;;  %4478 = vrcp.f32 %v2314_v53  ;;  %v2315_v63 = vadd.f32 1.0, %v4459_v5 }
 0x419   : > { %v4463_v38 = vpop.eup %4462  ;;  %4480 = vrcp.f32 %v2312_v6  ;;  %v2313_v12 = vadd.f32 1.0, %v4461_v30  ;;  %3847 = vmatprep.mubr.bf16.mxu1 %v2396_v10 }
 0x41a   : > { %v4465_v57 = vpop.eup %4464  ;;  %4482 = vrcp.f32 %v2315_v63  ;;  %v2382_v54 = vmul.f32 %v4463_v38, %v5924_v8 }
 0x41b   : > { %v4467_v4 = vpop.eup %4466  ;;  %4484 = vrcp.f32 %v2313_v12  ;;  %v2380_v56 = vmul.f32 %v4465_v57, %v5928_v21 }
 0x41c   : > { %v4469_v7 = vpop.eup %4468  ;;  %v2383_v11 = vmul.f32 %v4467_v4, %v5933_v32  ;;  %3848 = vmatmul.mubr.bf16.gmra.mrb[8].mxu1 %v2397_v50 }
 0x41d   : > { %v4471_v55 = vpop.eup %4470  ;;  %v2381_v16 = vmul.f32 %v4469_v7, %v5937_v34 }
 0x41e   : > { %v4473_v26 = vpop.eup %4472  ;;  %v2318_v25 = vadd.f32 1.0, %v4471_v55  ;;  %v2399_v17 = vpack.c.bf16 %v2383_v11, %v2382_v54 }
 0x41f   : > { %v4475_v42 = vpop.eup %4474  ;;  %v2316_v36 = vadd.f32 1.0, %v4473_v26  ;;  %v2398_v18 = vpack.c.bf16 %v2381_v16, %v2380_v56 }
 0x420   : > { %v4477_v23 = vpop.eup %4476  ;;  %4486 = vrcp.f32 %v2318_v25  ;;  %v2319_v29 = vadd.f32 1.0, %v4475_v42 }
 0x421   : > { %4488 = vrcp.f32 %v2316_v36  ;;  %v2317_v31 = vadd.f32 1.0, %v4477_v23  ;;  %3851 = vmatprep.mubr.bf16.mxu1 %v2398_v18 }
 0x422   : > { %v4479_v8 = vpop.eup %4478  ;;  %4490 = vrcp.f32 %v2319_v29 }
 0x423   : > { %v4481_v32 = vpop.eup %4480  ;;  %4492 = vrcp.f32 %v2317_v31  ;;  %v2386_v34 = vmul.f32 %v4479_v8, %v5948_v24 }
 0x424   : > { %v4483_v35 = vpop.eup %4482  ;;  %3852 = vmatmul.mubr.bf16.gmra.mrb[12].mxu1 %v2399_v17  ;;  %v2384_v27 = vmul.f32 %v4481_v32, %v5952_v20 }
 0x425   : > { %v4485_v21 = vpop.eup %4484  ;;  %v2387_v0 = vmul.f32 %v4483_v35, %v5957_v37 }
 0x426   : > { %v2385_v33 = vmul.f32 %v4485_v21, %v5961_v47  ;;  %v4294_v47 = vld [vmem:[#allocation15] sm:$0xff]  }
 0x427   : > { %v2401_v40 = vpack.c.bf16 %v2387_v0, %v2386_v34  ;;  %3863 = vmatprep.subr.bf16.mxu0 %v4294_v47  ;;  %3919 = vmatprep.subr.bf16.mxu1 %v4294_v47 }
 0x428   : > { %v2400_v45 = vpack.c.bf16 %v2385_v33, %v2384_v27  ;;  %3864 = vmatpush3.bf16.msra.mxu0 %v4294_v47  ;;  %3927 = vmatpush3.bf16.msra.mxu1 %v4294_v47 }
 0x429   : > { %3865 = vmatprep.subr.bf16.mxu0 %v4295_v9  ;;  %3920 = vmatprep.subr.bf16.mxu1 %v4295_v9 }
 0x42a   : > { %v4487_v52 = vpop.eup %4486  ;;  %3855 = vmatprep.mubr.bf16.mxu1 %v2400_v45 }
 0x42b   : > { %v4489_v48 = vpop.eup %4488  ;;  %v2390_v62 = vmul.f32 %v4487_v52, %v5972_v22  ;;  %v4296_v22 = vld [vmem:[#allocation15 + $0x10] sm:$0xff]  }
 0x42c   : > { %v4491_v51 = vpop.eup %4490  ;;  %3856 = vmatmul.mubr.bf16.gmra.mrb[16].mxu1 %v2401_v40  ;;  %v2388_v24 = vmul.f32 %v4489_v48, %v5976_v28  ;;  %3866 = vmatpush3.bf16.msra.mxu0 %v4295_v9  ;;  %v4297_v28 = vld [vmem:[#allocation15 + $0x18] sm:$0xff]  }
 0x42d   : > { %v4493_v61 = vpop.eup %4492  ;;  %v2391_v59 = vmul.f32 %v4491_v51, %v5981_v60  ;;  %3928 = vmatpush3.bf16.msra.mxu1 %v4295_v9  ;;  %3867 = vmatprep.subr.bf16.mxu0 %v4296_v22  ;;  %v4298_v60 = vld [vmem:[#allocation15 + $0x20] sm:$0xff]  }
 0x42e   : > { %v2389_v37 = vmul.f32 %v4493_v61, %v5985_v44  ;;  %3921 = vmatprep.subr.bf16.mxu1 %v4296_v22  ;;  %v4299_v44 = vld [vmem:[#allocation15 + $0x28] sm:$0xff]  }
 0x42f   : > { %v2403_v13 = vpack.c.bf16 %v2391_v59, %v2390_v62 }
 0x430   : > { %v2402_v20 = vpack.c.bf16 %v2389_v37, %v2388_v24  ;;  %3868 = vmatpush3.bf16.msra.mxu0 %v4296_v22 }
 0x431   : > { %3929 = vmatpush3.bf16.msra.mxu1 %v4296_v22  ;;  %3869 = vmatprep.subr.bf16.mxu0 %v4297_v28 }
 0x432   : > { %3859 = vmatprep.mubr.bf16.mxu1 %v2402_v20  ;;  %3922 = vmatprep.subr.bf16.mxu1 %v4297_v28 }
 0x434   : > { %3860 = vmatmul.mubr.bf16.gmra.mrb[20].mxu1 %v2403_v13  ;;  %3870 = vmatpush3.bf16.msra.mxu0 %v4297_v28 }
 0x435   : > { %3930 = vmatpush3.bf16.msra.mxu1 %v4297_v28  ;;  %3871 = vmatprep.subr.bf16.mxu0 %v4298_v60 }
 0x436   : > { %3923 = vmatprep.subr.bf16.mxu1 %v4298_v60 }
 0x438   : > { %3872 = vmatpush3.bf16.msra.mxu0 %v4298_v60 }
 0x439   : > { %3931 = vmatpush3.bf16.msra.mxu1 %v4298_v60  ;;  %3873 = vmatprep.subr.bf16.mxu0 %v4299_v44 }
 0x43a   : > { %3924 = vmatprep.subr.bf16.mxu1 %v4299_v44 }
 0x43c   : > { %3874 = vmatpush3.bf16.msra.mxu0 %v4299_v44 }
 0x43d   : > { %3932 = vmatpush3.bf16.msra.mxu1 %v4299_v44  ;;  %3875 = vmatprep.subr.bf16.mxu0 %v4300_v1 }
 0x43e   : > { %3925 = vmatprep.subr.bf16.mxu1 %v4300_v1 }
 0x440   : > { %3876 = vmatpush3.bf16.msra.mxu0 %v4300_v1 }
 0x441   : > { %3933 = vmatpush3.bf16.msra.mxu1 %v4300_v1  ;;  %3877 = vmatprep.subr.bf16.mxu0 %v4301_v43 }
 0x442   : > { %3926 = vmatprep.subr.bf16.mxu1 %v4301_v43 }
 0x444   : > { %3878 = vmatpush3.bf16.msra.mxu0 %v4301_v43 }
 0x445   : > { %3934 = vmatpush3.bf16.msra.mxu1 %v4301_v43 }
 0x4dc   : > { %v3841_v41 = vpop.f32.mrb[0].mxu1 }
 0x4dd   : > { %v2608_v19 = vmul.f32 %v3841_v41, %v6005_v58  ;;  %v2503_v2 = vpop.f32.mrb[1].mxu1 }
 0x4de   : > { %v2606_v46 = vmul.f32 %v6005_v58, %v2503_v2  ;;  %v3842_v3 = vpop.f32.mrb[2].mxu1 }
 0x4df   : > { %v6012_v15 = vadd.f32 %v6007_v39, %v2608_v19  ;;  %v2609_v14 = vmul.f32 %v3842_v3, %v6005_v58  ;;  %v2506_v49 = vpop.f32.mrb[3].mxu1 }
 0x4e0   : > { %v6016_v53 = vadd.f32 %v6007_v39, %v2606_v46  ;;  %v2607_v50 = vmul.f32 %v6005_v58, %v2506_v49 }
 0x4e1   : > { %v3451_v5 = vmul.f32 -1.442695, %v6012_v15  ;;  %v6021_v6 = vadd.f32 %v6007_v39, %v2609_v14 }
 0x4e2   : > { %v3449_v10 = vmul.f32 -1.442695, %v6016_v53  ;;  %v6025_v30 = vadd.f32 %v6007_v39, %v2607_v50 }
 0x4e3   : > { %4494 = vpow2.f32 %v3451_v5  ;;  %v3452_v63 = vmul.f32 -1.442695, %v6021_v6 }
 0x4e4   : > { %4496 = vpow2.f32 %v3449_v10  ;;  %v3450_v38 = vmul.f32 -1.442695, %v6025_v30 }
 0x4e5   : > { %4498 = vpow2.f32 %v3452_v63 }
 0x4e6   : > { %4500 = vpow2.f32 %v3450_v38 }
 0x4e7   : > { %v3845_v12 = vpop.f32.mrb[4].mxu1 }
 0x4e8   : > { %v2612_v57 = vmul.f32 %v3845_v12, %v6005_v58  ;;  %v2519_v4 = vpop.f32.mrb[5].mxu1 }
 0x4e9   : > { %v2610_v7 = vmul.f32 %v6005_v58, %v2519_v4  ;;  %v3846_v54 = vpop.f32.mrb[6].mxu1 }
 0x4ea   : > { %v6032_v11 = vadd.f32 %v6007_v39, %v2612_v57  ;;  %v2613_v55 = vmul.f32 %v3846_v54, %v6005_v58  ;;  %v2522_v56 = vpop.f32.mrb[7].mxu1 }
 0x4eb   : > { %v6036_v16 = vadd.f32 %v6007_v39, %v2610_v7  ;;  %v2611_v26 = vmul.f32 %v6005_v58, %v2522_v56 }
 0x4ec   : > { %v3455_v25 = vmul.f32 -1.442695, %v6032_v11  ;;  %v6041_v17 = vadd.f32 %v6007_v39, %v2613_v55 }
 0x4ed   : > { %v4495_v42 = vpop.eup %4494  ;;  %v3453_v36 = vmul.f32 -1.442695, %v6036_v16  ;;  %v6045_v18 = vadd.f32 %v6007_v39, %v2611_v26 }
 0x4ee   : > { %v4497_v23 = vpop.eup %4496  ;;  %v2736_v29 = vadd.f32 1.0, %v4495_v42  ;;  %4502 = vpow2.f32 %v3455_v25  ;;  %v3456_v34 = vmul.f32 -1.442695, %v6041_v17 }
 0x4ef   : > { %v4499_v31 = vpop.eup %4498  ;;  %v2734_v8 = vadd.f32 1.0, %v4497_v23  ;;  %4504 = vpow2.f32 %v3453_v36  ;;  %v3849_v32 = vpop.f32.mrb[8].mxu1  ;;  %v3454_v40 = vmul.f32 -1.442695, %v6045_v18 }
 0x4f0   : > { %v4501_v35 = vpop.eup %4500  ;;  %4506 = vrcp.f32 %v2736_v29  ;;  %v2737_v21 = vadd.f32 1.0, %v4499_v31  ;;  %v2616_v0 = vmul.f32 %v3849_v32, %v6005_v58  ;;  %v2535_v27 = vpop.f32.mrb[9].mxu1 }
 0x4f1   : > { %4508 = vrcp.f32 %v2734_v8  ;;  %v2735_v33 = vadd.f32 1.0, %v4501_v35  ;;  %v2614_v45 = vmul.f32 %v6005_v58, %v2535_v27  ;;  %v3850_v52 = vpop.f32.mrb[10].mxu1 }
 0x4f2   : > { %4510 = vrcp.f32 %v2737_v21  ;;  %v6052_v48 = vadd.f32 %v6007_v39, %v2616_v0  ;;  %v2617_v51 = vmul.f32 %v3850_v52, %v6005_v58  ;;  %v2538_v61 = vpop.f32.mrb[11].mxu1 }
 0x4f3   : > { %4512 = vrcp.f32 %v2735_v33  ;;  %v6056_v62 = vadd.f32 %v6007_v39, %v2614_v45  ;;  %v2615_v59 = vmul.f32 %v6005_v58, %v2538_v61 }
 0x4f4   : > { %4514 = vpow2.f32 %v3456_v34  ;;  %v3459_v24 = vmul.f32 -1.442695, %v6052_v48  ;;  %v6061_v37 = vadd.f32 %v6007_v39, %v2617_v51 }
 0x4f5   : > { %4516 = vpow2.f32 %v3454_v40  ;;  %v3457_v13 = vmul.f32 -1.442695, %v6056_v62  ;;  %v6065_v20 = vadd.f32 %v6007_v39, %v2615_v59 }
 0x4f6   : > { %4518 = vpow2.f32 %v3459_v24  ;;  %v3460_v47 = vmul.f32 -1.442695, %v6061_v37 }
 0x4f7   : > { %4520 = vpow2.f32 %v3457_v13  ;;  %v3458_v9 = vmul.f32 -1.442695, %v6065_v20  ;;  %v3853_v22 = vpop.f32.mrb[12].mxu1 }
 0x4f8   : > { %v4503_v28 = vpop.eup %4502  ;;  %4522 = vpow2.f32 %v3460_v47  ;;  %v2620_v60 = vmul.f32 %v3853_v22, %v6005_v58  ;;  %v2551_v44 = vpop.f32.mrb[13].mxu1 }
 0x4f9   : > { %v4505_v1 = vpop.eup %4504  ;;  %v2740_v43 = vadd.f32 1.0, %v4503_v28  ;;  %4524 = vpow2.f32 %v3458_v9  ;;  %v2618_v41 = vmul.f32 %v6005_v58, %v2551_v44  ;;  %v3854_v19 = vpop.f32.mrb[14].mxu1 }
 0x4fa   : > { %v4507_v2 = vpop.eup %4506  ;;  %v2738_v46 = vadd.f32 1.0, %v4505_v1  ;;  %v6072_v3 = vadd.f32 %v6007_v39, %v2620_v60  ;;  %v2621_v14 = vmul.f32 %v3854_v19, %v6005_v58  ;;  %v2554_v49 = vpop.f32.mrb[15].mxu1 }
 0x4fb   : > { %v4509_v50 = vpop.eup %4508  ;;  %4526 = vrcp.f32 %v2740_v43  ;;  %v6076_v5 = vadd.f32 %v6007_v39, %v2618_v41  ;;  %v2619_v10 = vmul.f32 %v6005_v58, %v2554_v49  ;;  %v2808_v4 = vmul.f32 %v4507_v2, %v6012_v15 }
 0x4fc   : > { %v4511_v63 = vpop.eup %4510  ;;  %4528 = vrcp.f32 %v2738_v46  ;;  %v3463_v38 = vmul.f32 -1.442695, %v6072_v3  ;;  %v6081_v12 = vadd.f32 %v6007_v39, %v2621_v14  ;;  %v2806_v26 = vmul.f32 %v4509_v50, %v6016_v53 }
 0x4fd   : > { %v4513_v57 = vpop.eup %4512  ;;  %v2809_v7 = vmul.f32 %v4511_v63, %v6021_v6  ;;  %v3461_v54 = vmul.f32 -1.442695, %v6076_v5  ;;  %v6087_v55 = vadd.f32 %v6007_v39, %v2619_v10 }
 0x4fe   : > { %v4515_v56 = vpop.eup %4514  ;;  %v2807_v25 = vmul.f32 %v4513_v57, %v6025_v30  ;;  %4530 = vpow2.f32 %v3463_v38  ;;  %v3464_v42 = vmul.f32 -1.442695, %v6081_v12 }
 0x4ff   : > { %v4517_v36 = vpop.eup %4516  ;;  %v2831_v23 = vpack.c.bf16 %v2809_v7, %v2808_v4  ;;  %v2741_v29 = vadd.f32 1.0, %v4515_v56  ;;  %4532 = vpow2.f32 %v3461_v54  ;;  %v3857_v15 = vpop.f32.mrb[16].mxu1  ;;  %v3462_v30 = vmul.f32 -1.442695, %v6087_v55 }
 0x500   : > { %v4519_v31 = vpop.eup %4518  ;;  %v2739_v6 = vadd.f32 1.0, %v4517_v36  ;;  %4534 = vpow2.f32 %v3464_v42  ;;  %v2624_v8 = vmul.f32 %v3857_v15, %v6005_v58  ;;  %v2567_v32 = vpop.f32.mrb[17].mxu1  ;;  %v2830_v35 = vpack.c.bf16 %v2807_v25, %v2806_v26 }
 0x501   : > { %v4521_v21 = vpop.eup %4520  ;;  %4536 = vrcp.f32 %v2741_v29  ;;  %v2744_v53 = vadd.f32 1.0, %v4519_v31  ;;  %v2622_v34 = vmul.f32 %v6005_v58, %v2567_v32  ;;  %v3858_v0 = vpop.f32.mrb[18].mxu1 }
 0x502   : > { %v4523_v27 = vpop.eup %4522  ;;  %4538 = vrcp.f32 %v2739_v6  ;;  %v2742_v33 = vadd.f32 1.0, %v4521_v21  ;;  %v6096_v40 = vadd.f32 %v6007_v39, %v2624_v8  ;;  %v2625_v45 = vmul.f32 %v3858_v0, %v6005_v58  ;;  %v2570_v52 = vpop.f32.mrb[19].mxu1  ;;  %3879 = vmatprep.mubr.bf16.mxu0 %v2830_v35 }
 0x503   : > { %v4525_v51 = vpop.eup %4524  ;;  %4540 = vrcp.f32 %v2744_v53  ;;  %v2745_v61 = vadd.f32 1.0, %v4523_v27  ;;  %v6100_v59 = vadd.f32 %v6007_v39, %v2622_v34  ;;  %v2623_v24 = vmul.f32 %v6005_v58, %v2570_v52  ;;  %3880 = vmatmul.mubr.bf16.vlgmr.msra.gmra.mrb[24].mxu0 %v2831_v23 }
 0x504   : > { %4542 = vrcp.f32 %v2742_v33  ;;  %v2743_v13 = vadd.f32 1.0, %v4525_v51  ;;  %v3467_v47 = vmul.f32 -1.442695, %v6096_v40  ;;  %v6105_v9 = vadd.f32 %v6007_v39, %v2625_v45 }
 0x505   : > { %v4527_v22 = vpop.eup %4526  ;;  %4544 = vrcp.f32 %v2745_v61  ;;  %v3465_v28 = vmul.f32 -1.442695, %v6100_v59  ;;  %v6109_v60 = vadd.f32 %v6007_v39, %v2623_v24 }
 0x506   : > { %v4529_v44 = vpop.eup %4528  ;;  %4546 = vrcp.f32 %v2743_v13  ;;  %v3468_v1 = vmul.f32 -1.442695, %v6105_v9  ;;  %v2812_v19 = vmul.f32 %v4527_v22, %v6032_v11 }
 0x507   : > { %4548 = vpow2.f32 %v3462_v30  ;;  %v3861_v43 = vpop.f32.mrb[20].mxu1  ;;  %v2810_v2 = vmul.f32 %v4529_v44, %v6036_v16  ;;  %v3466_v10 = vmul.f32 -1.442695, %v6109_v60 }
 0x508   : > { %v4531_v41 = vpop.eup %4530  ;;  %4550 = vpow2.f32 %v3467_v47  ;;  %v2628_v46 = vmul.f32 %v3861_v43, %v6005_v58  ;;  %v2583_v14 = vpop.f32.mrb[21].mxu1 }
 0x509   : > { %v4533_v49 = vpop.eup %4532  ;;  %v2748_v50 = vadd.f32 1.0, %v4531_v41  ;;  %4552 = vpow2.f32 %v3465_v28  ;;  %v2626_v63 = vmul.f32 %v6005_v58, %v2583_v14  ;;  %v3862_v38 = vpop.f32.mrb[22].mxu1 }
 0x50a   : > { %v4535_v57 = vpop.eup %4534  ;;  %v2746_v4 = vadd.f32 1.0, %v4533_v49  ;;  %4554 = vpow2.f32 %v3468_v1  ;;  %v6118_v7 = vadd.f32 %v6007_v39, %v2628_v46  ;;  %v2629_v11 = vmul.f32 %v3862_v38, %v6005_v58  ;;  %v2586_v16 = vpop.f32.mrb[23].mxu1 }
 0x50b   : > { %v4537_v54 = vpop.eup %4536  ;;  %4556 = vrcp.f32 %v2748_v50  ;;  %v2749_v56 = vadd.f32 1.0, %v4535_v57  ;;  %v6122_v26 = vadd.f32 %v6007_v39, %v2626_v63  ;;  %v2627_v25 = vmul.f32 %v6005_v58, %v2586_v16 }
 0x50c   : > { %v4539_v42 = vpop.eup %4538  ;;  %v2813_v36 = vmul.f32 %v4537_v54, %v6041_v17  ;;  %4558 = vrcp.f32 %v2746_v4  ;;  %v3471_v23 = vmul.f32 -1.442695, %v6118_v7  ;;  %v6128_v29 = vadd.f32 %v6007_v39, %v2629_v11 }
 0x50d   : > { %v4541_v15 = vpop.eup %4540  ;;  %v2811_v31 = vmul.f32 %v4539_v42, %v6045_v18  ;;  %4560 = vrcp.f32 %v2749_v56  ;;  %v3469_v6 = vmul.f32 -1.442695, %v6122_v26  ;;  %v6133_v8 = vadd.f32 %v6007_v39, %v2627_v25 }
 0x50e   : > { %v4543_v32 = vpop.eup %4542  ;;  %4562 = vpow2.f32 %v3466_v10  ;;  %v3472_v58 = vmul.f32 -1.442695, %v6128_v29  ;;  %v2833_v17 = vpack.c.bf16 %v2813_v36, %v2812_v19  ;;  %v2816_v34 = vmul.f32 %v4541_v15, %v6052_v48 }
 0x50f   : > { %v4545_v35 = vpop.eup %4544  ;;  %4564 = vpow2.f32 %v3471_v23  ;;  %v3470_v21 = vmul.f32 -1.442695, %v6133_v8  ;;  %v2832_v53 = vpack.c.bf16 %v2811_v31, %v2810_v2  ;;  %v2814_v39 = vmul.f32 %v4543_v32, %v6056_v62 }
 0x510   : > { %v4547_v30 = vpop.eup %4546  ;;  %v2817_v18 = vmul.f32 %v4545_v35, %v6061_v37  ;;  %4566 = vpow2.f32 %v3469_v6 }
 0x511   : > { %v4549_v0 = vpop.eup %4548  ;;  %v2815_v27 = vmul.f32 %v4547_v30, %v6065_v20  ;;  %4568 = vpow2.f32 %v3472_v58  ;;  %3883 = vmatprep.mubr.bf16.mxu0 %v2832_v53 }
 0x512   : > { %v4551_v33 = vpop.eup %4550  ;;  %v2747_v45 = vadd.f32 1.0, %v4549_v0  ;;  %4570 = vpow2.f32 %v3470_v21  ;;  %3884 = vmatmul.mubr.bf16.gmra.mrb[28].mxu0 %v2833_v17  ;;  %v2835_v52 = vpack.c.bf16 %v2817_v18, %v2816_v34 }
 0x513   : > { %v4553_v51 = vpop.eup %4552  ;;  %v2752_v61 = vadd.f32 1.0, %v4551_v33  ;;  %v2834_v24 = vpack.c.bf16 %v2815_v27, %v2814_v39 }
 0x514   : > { %v4555_v13 = vpop.eup %4554  ;;  %4572 = vrcp.f32 %v2747_v45  ;;  %v2750_v37 = vadd.f32 1.0, %v4553_v51 }
 0x515   : > { %v4557_v48 = vpop.eup %4556  ;;  %4574 = vrcp.f32 %v2752_v61  ;;  %v2753_v47 = vadd.f32 1.0, %v4555_v13  ;;  %3887 = vmatprep.mubr.bf16.mxu0 %v2834_v24 }
 0x516   : > { %v4559_v62 = vpop.eup %4558  ;;  %v2820_v28 = vmul.f32 %v4557_v48, %v6072_v3 }
 0x517   : > { %v4561_v22 = vpop.eup %4560  ;;  %4576 = vrcp.f32 %v2753_v47 }
 0x518   : > { %v4563_v20 = vpop.eup %4562  ;;  %v2821_v44 = vmul.f32 %v4561_v22, %v6081_v12  ;;  %4578 = vrcp.f32 %v2750_v37  ;;  %v2818_v12 = vmul.f32 %v4559_v62, %v6076_v5 }
 0x519   : > { %v4565_v1 = vpop.eup %4564  ;;  %v2751_v43 = vadd.f32 1.0, %v4563_v20 }
 0x51a   : > { %v4567_v41 = vpop.eup %4566  ;;  %v2837_v19 = vpack.c.bf16 %v2821_v44, %v2820_v28  ;;  %v2756_v2 = vadd.f32 1.0, %v4565_v1  ;;  %3888 = vmatmul.mubr.bf16.gmra.mrb[32].mxu0 %v2835_v52 }
 0x51b   : > { %v4569_v46 = vpop.eup %4568  ;;  %4580 = vrcp.f32 %v2751_v43  ;;  %v2754_v14 = vadd.f32 1.0, %v4567_v41 }
 0x51c   : > { %v4571_v49 = vpop.eup %4570  ;;  %4582 = vrcp.f32 %v2756_v2  ;;  %v2757_v50 = vadd.f32 1.0, %v4569_v46 }
 0x51d   : > { %4584 = vrcp.f32 %v2754_v14  ;;  %v2755_v10 = vadd.f32 1.0, %v4571_v49 }
 0x51e   : > { %v4573_v63 = vpop.eup %4572  ;;  %4586 = vrcp.f32 %v2757_v50 }
 0x51f   : > { %v4575_v3 = vpop.eup %4574  ;;  %v2819_v38 = vmul.f32 %v4573_v63, %v6087_v55  ;;  %4588 = vrcp.f32 %v2755_v10 }
 0x520   : > { %v2824_v11 = vmul.f32 %v4575_v3, %v6096_v40 }
 0x521   : > { %v4577_v57 = vpop.eup %4576  ;;  %v2836_v4 = vpack.c.bf16 %v2819_v38, %v2818_v12 }
 0x522   : > { %v2825_v16 = vmul.f32 %v4577_v57, %v6105_v9  ;;  %v4579_v54 = vpop.eup %4578 }
 0x523   : > { %3891 = vmatprep.mubr.bf16.mxu1 %v2836_v4  ;;  %v2822_v36 = vmul.f32 %v4579_v54, %v6100_v59 }
 0x524   : > { %3892 = vmatmul.mubr.bf16.vlgmr.msra.gmra.mrb[24].mxu1 %v2837_v19  ;;  %v2839_v56 = vpack.c.bf16 %v2825_v16, %v2824_v11 }
 0x525   : > { %v4581_v25 = vpop.eup %4580 }
 0x526   : > { %v4583_v42 = vpop.eup %4582  ;;  %v2823_v23 = vmul.f32 %v4581_v25, %v6109_v60  ;;  %v6153_v60 = vld [vmem:[#allocation17] ss:$0 sm:$0xff] }
 0x527   : > { %v4585_v5 = vpop.eup %4584  ;;  %v2828_v6 = vmul.f32 %v4583_v42, %v6118_v7 }
 0x528   : > { %v4587_v15 = vpop.eup %4586  ;;  %v2838_v55 = vpack.c.bf16 %v2823_v23, %v2822_v36  ;;  %v2826_v9 = vmul.f32 %v4585_v5, %v6122_v26 }
 0x529   : > { %v4589_v31 = vpop.eup %4588  ;;  %v2829_v40 = vmul.f32 %v4587_v15, %v6128_v29 }
 0x52a   : > { %v2827_v32 = vmul.f32 %v4589_v31, %v6133_v8  ;;  %3895 = vmatprep.mubr.bf16.mxu1 %v2838_v55 }
 0x52b   : > { %v2841_v58 = vpack.c.bf16 %v2829_v40, %v2828_v6 }
 0x52c   : > { %3896 = vmatmul.mubr.bf16.gmra.mrb[28].mxu1 %v2839_v56  ;;  %v2840_v59 = vpack.c.bf16 %v2827_v32, %v2826_v9 }
 0x52e   : > { %3899 = vmatprep.mubr.bf16.mxu1 %v2840_v59 }
 0x534   : > { %3900 = vmatmul.mubr.bf16.gmra.mrb[32].mxu1 %v2841_v58 }
 0x5d6   : > { %v3881_v17 = vpop.f32.mrb[24].mxu0 }
 0x5d7   : > { %v2956_v7 = vadd.f32 %v3881_v17, %v6153_v60  ;;  %v2947_v29 = vpop.f32.mrb[25].mxu0 }
 0x5d8   : > { %v2948_v26 = vadd.f32 %v6153_v60, %v2947_v29  ;;  %v3882_v35 = vpop.f32.mrb[26].mxu0 }
 0x5d9   : > { %3044 = vst [vmem:[%s5533_s19 + $0x10] sm:$0xff] %v2956_v7  ;;  %v2959_v8 = vadd.f32 %v3882_v35, %v6153_v60  ;;  %v2950_v21 = vpop.f32.mrb[27].mxu0 }
 0x5da   : > { %3042 = vst [vmem:[%s5533_s19] sm:$0xff] %v2948_v26  ;;  %v2951_v53 = vadd.f32 %v6153_v60, %v2950_v21 }
 0x5db   : > { %3045 = vst [vmem:[%s5533_s19 + $0x18] sm:$0xff] %v2959_v8 }
 0x5dc   : > { %3043 = vst [vmem:[%s5533_s19 + $0x8] sm:$0xff] %v2951_v53 }
 0x5e5   : > { %v3885_v30 = vpop.f32.mrb[28].mxu0 }
 0x5e6   : > { %v2972_v34 = vadd.f32 %v3885_v30, %v6153_v60  ;;  %v2963_v18 = vpop.f32.mrb[29].mxu0 }
 0x5e7   : > { %v2964_v0 = vadd.f32 %v6153_v60, %v2963_v18  ;;  %v3886_v39 = vpop.f32.mrb[30].mxu0 }
 0x5e8   : > { %3048 = vst [vmem:[%s5533_s19 + $0x30] sm:$0xff] %v2972_v34  ;;  %v2975_v27 = vadd.f32 %v3886_v39, %v6153_v60  ;;  %v2966_v33 = vpop.f32.mrb[31].mxu0 }
 0x5e9   : > { %3046 = vst [vmem:[%s5533_s19 + $0x20] sm:$0xff] %v2964_v0  ;;  %v2967_v45 = vadd.f32 %v6153_v60, %v2966_v33 }
 0x5ea   : > { %3049 = vst [vmem:[%s5533_s19 + $0x38] sm:$0xff] %v2975_v27 }
 0x5eb   : > { %3047 = vst [vmem:[%s5533_s19 + $0x28] sm:$0xff] %v2967_v45 }
 0x5ed   : > { %v3889_v52 = vpop.f32.mrb[32].mxu0 }
 0x5ee   : > { %v2988_v51 = vadd.f32 %v3889_v52, %v6153_v60  ;;  %v2979_v61 = vpop.f32.mrb[33].mxu0 }
 0x5ef   : > { %v2980_v24 = vadd.f32 %v6153_v60, %v2979_v61  ;;  %v3890_v13 = vpop.f32.mrb[34].mxu0 }
 0x5f0   : > { %3052 = vst [vmem:[%s5533_s19 + $0x50] sm:$0xff] %v2988_v51  ;;  %v2991_v48 = vadd.f32 %v3890_v13, %v6153_v60  ;;  %v2982_v37 = vpop.f32.mrb[35].mxu0 }
 0x5f1   : > { %3050 = vst [vmem:[%s5533_s19 + $0x40] sm:$0xff] %v2980_v24  ;;  %v2983_v47 = vadd.f32 %v6153_v60, %v2982_v37 }
 0x5f2   : > { %3053 = vst [vmem:[%s5533_s19 + $0x58] sm:$0xff] %v2991_v48 }
 0x5f3   : > { %3051 = vst [vmem:[%s5533_s19 + $0x48] sm:$0xff] %v2983_v47 }
 0x5f7   : > { %v3893_v62 = vpop.f32.mrb[24].mxu1 }
 0x5f8   : > { %v3004_v22 = vadd.f32 %v3893_v62, %v6153_v60  ;;  %v2995_v20 = vpop.f32.mrb[25].mxu1 }
 0x5f9   : > { %v2996_v28 = vadd.f32 %v6153_v60, %v2995_v20  ;;  %v3894_v44 = vpop.f32.mrb[26].mxu1 }
 0x5fa   : > { %3056 = vst [vmem:[%s5533_s19 + $0x70] sm:$0xff] %v3004_v22  ;;  %v3007_v1 = vadd.f32 %v3894_v44, %v6153_v60  ;;  %v2998_v43 = vpop.f32.mrb[27].mxu1 }
 0x5fb   : > { %3054 = vst [vmem:[%s5533_s19 + $0x60] sm:$0xff] %v2996_v28  ;;  %v2999_v41 = vadd.f32 %v6153_v60, %v2998_v43 }
 0x5fc   : > { %3057 = vst [vmem:[%s5533_s19 + $0x78] sm:$0xff] %v3007_v1 }
 0x5fd   : > { %3055 = vst [vmem:[%s5533_s19 + $0x68] sm:$0xff] %v2999_v41 }
 0x5ff   : > { %v3897_v19 = vpop.f32.mrb[28].mxu1 }
 0x600   : > { %v3020_v2 = vadd.f32 %v3897_v19, %v6153_v60  ;;  %v3011_v46 = vpop.f32.mrb[29].mxu1 }
 0x601   : > { %v3012_v14 = vadd.f32 %v6153_v60, %v3011_v46  ;;  %v3898_v49 = vpop.f32.mrb[30].mxu1 }
 0x602   : > { %3060 = vst [vmem:[%s5533_s19 + $0x90] sm:$0xff] %v3020_v2  ;;  %v3023_v50 = vadd.f32 %v3898_v49, %v6153_v60  ;;  %v3014_v10 = vpop.f32.mrb[31].mxu1 }
 0x603   : > { %3058 = vst [vmem:[%s5533_s19 + $0x80] sm:$0xff] %v3012_v14  ;;  %v3015_v63 = vadd.f32 %v6153_v60, %v3014_v10 }
 0x604   : > { %3061 = vst [vmem:[%s5533_s19 + $0x98] sm:$0xff] %v3023_v50 }
 0x605   : > { %3059 = vst [vmem:[%s5533_s19 + $0x88] sm:$0xff] %v3015_v63 }
 0x607   : > { %v3901_v3 = vpop.f32.mrb[32].mxu1 }
 0x608   : > { %v3036_v12 = vadd.f32 %v3901_v3, %v6153_v60  ;;  %v3027_v38 = vpop.f32.mrb[33].mxu1 }
 0x609   : > { %v3028_v57 = vadd.f32 %v6153_v60, %v3027_v38  ;;  %v3902_v4 = vpop.f32.mrb[34].mxu1 }
 0x60a   : > { %3064 = vst [vmem:[%s5533_s19 + $0xb0] sm:$0xff] %v3036_v12  ;;  %v3039_v11 = vadd.f32 %v3902_v4, %v6153_v60  ;;  %v3030_v16 = vpop.f32.mrb[35].mxu1 }
 0x60b   : > { %3062 = vst [vmem:[%s5533_s19 + $0xa0] sm:$0xff] %v3028_v57  ;;  %v3031_v54 = vadd.f32 %v6153_v60, %v3030_v16 }
 0x60c   : > { %3065 = vst [vmem:[%s5533_s19 + $0xb8] sm:$0xff] %v3039_v11 }
 0x60d   : > { %3063 = vst [vmem:[%s5533_s19 + $0xa8] sm:$0xff] %v3031_v54 }
 0x60e PF: > { %s6385_s4 = sld [smem:[#allocation32_spill]]  ;;  %s3080_s24 = sshll.u32 %s5533_s19, 4  ;;  %s6210_s24 = int_to_ptr.vmem [resolvable:$true] %s3080_s24 }
 0x60f   : > { %s6387_s6 = sld [smem:[#allocation44_spill]]  ;;  %s6214_s13 = scalar_lea.sflag [#allocation5], %s500_s28 }
 0x610   : > { %s4846_s2 = scalar_lea.vmem %s6210_s24, 3072  ;;  %p6388_p4 = scmp.ne.s32.totalorder %s6354_s25, 0 }
 0x611   : > { %p4847_p3 = scmp.ne.s32.totalorder %s6210_s24, %s4846_s2  ;;  %s5031_s26 = smov [#allocation18]  }
 0x612   : > { %s4850_s27 = sshll.u32 %s5031_s26, 4  ;;  %s4851_s27 = int_to_ptr.vmem [resolvable:$false] %s4850_s27 }
 0x613   : > { %p4848_p2 = pnand %p4847_p3, %p6388_p4  ;;  %s4852_s5 = scalar_lea.vmem %s4851_s27, 6144 }
 0x614   : > { %s3486_s3 = smul.u32 3072, %s6385_s4  ;;  %p4853_p13 = scmp.lt.s32.totalorder %s6210_s24, %s4851_s27 }
 0x615   : > { %p4849_p6 = pneg %p4848_p2  ;;  %p4854_p9 = scmp.lt.s32.totalorder %s4852_s5, %s4846_s2 }
 0x616   : > { %s6208_s8 = scalar_lea.hbm %s6387_s6, %s3486_s3 }
 0x617   : > { %p4855_p11 = por %p4854_p9, %p4853_p13 }
 0x619   : > { %p4856_p1 = pnand %p4855_p11, %p4849_p6 }
 0x61b   : > { %4859 = shalt.err (!%p4856_p1)
}
 0x61c   : > { %s4860_s28 = scalar_lea.hbm %s6208_s8, 3072  ;;  %s4864_s7 = scalar_lea.hbm %s6387_s6, 6144 }
 0x61d   : > { %p4861_p12 = scmp.ne.s32.totalorder %s6208_s8, %s4860_s28  ;;  %p4865_p10 = scmp.lt.u32.totalorder %s6208_s8, %s6387_s6 }
 0x61e   : > { %p4866_p7 = scmp.lt.u32.totalorder %s4864_s7, %s4860_s28  ;;  %p4868_p3 = scmp.lt.u32.totalorder %s4860_s28, %s6208_s8 }
 0x61f   : > { %p4862_p0 = pnand %p4861_p12, %p6388_p4 }
 0x620   : > { %p4867_p8 = por %p4866_p7, %p4865_p10 }
 0x621   : > { %p4863_p5 = pneg %p4862_p0 }
 0x622   : > { %p4869_p2 = por %p4868_p3, %p4867_p8 }
 0x624   : > { %p4870_p6 = pnand %p4869_p2, %p4863_p5 }
 0x626   : > { %4873 = shalt.err (!%p4870_p6)
}
 0x627   : > { %s5032_s10 = smov 128   ;;  %s5033_s3 = smov 8  }
 0x628   : > { %3973 = dma.vmem_to_hbm [thread:$0]  (%p6388_p4), %s6210_s24, 3072, %s6208_s8, %s6214_s13, %s5032_s10, %s5032_s10, %s5033_s3  }
 0x629 PF: > { %s6389_s18 = sld [smem:[#allocation26_spill]]  ;;  %p4024_p13 = scmp.ge.s32.totalorder %s5012_s22, 2 }
 0x62a   : > { %p6390_p9 = scmp.ne.s32.totalorder %s6355_s30, 0 }
 0x62c   : > { %p4005_p11 = pnand %p4024_p13, %p6390_p9 }
 0x62f   : > { %s3095_s12 = sand.u32 1, %s6389_s18  }
 0x630   : > { %s3096_s2 = scalar_lea.sflag [#allocation5], %s3095_s12 }
 0x631   : > { %4955 = dma.done.wait (!%p4005_p11), %s3096_s2, 3072  }
 0x632   : > { %4957 = vsyncadd (!%p4005_p11), %s3096_s2, 4294964224  ;;  %s31_s22 = sadd.s32 1, %s5012_s22   ;;  %s6392_s30 = sld [smem:[#allocation27_spill]] }
 0x633   : > { %p6243_p1 = scmp.ge.s32.totalorder %s31_s22, 8   ;;  %s6393_s12 = sld [smem:[#allocation29_spill]] }
 0x634   : > { %s6394_s13 = sld [smem:[#allocation30_spill]]  ;;  %s6395_s25 = smov %s5377_s14 }
 0x635   : > { %s6396_s24 = sld [smem:[#allocation34_spill]]  ;;  %s6397_s10 = smov %s4968_s11 }
 0x636   : > { %s6398_s11 = smov %s5374_s1  ;;  %s6399_s14 = smov %s5436_s15 }
 0x637   : > { %s6400_s15 = smov %s4988_s16  ;;  %s6401_s16 = smov %s4992_s17 }
 0x638   : > { %s6402_s17 = smov %s6395_s25  ;;  %s6403_s18 = smov %s5004_s20 }
 0x639   : > { %s6404_s19 = smov %s5008_s21  ;;  %s6405_s20 = smov %s6408_s29 }
 0x63a   :  { %30 = sbr.rel (!%p6243_p1) target bundleno = 26 (0x1a), region = 153 }
 0x63b   : > { %s6406_s21 = smov %s6396_s24 }
 0x641   :  { %3101 = vsyncpa [#allocation4], 1 }
 0x642   :  { %3103 = vsyncpa [#allocation4 + $0x1], 1 }
 0x643   :  { %3104 = vsyncpa [#allocation7], 1 }
 0x644   :  { %3106 = vsyncpa [#allocation7 + $0x1], 1 }
 0x645   :  { %3107 = vsyncpa [#allocation10], 1 }
 0x646   :  { %3108 = vsyncpa [#allocation13], 1 }
 0x647   :  { %3109 = vsyncpa [#allocation16], 1 }
 0x648   :  { %3110 = vsyncpa [#allocation5], 1 }
 0x649   :  { %3112 = vsyncpa [#allocation5 + $0x1], 1 }

</bundles_post_ra>
